<compile_context>
chip_gen: v5e
topology: v5e:2x2
jax: 0.10.0
libtpu: 0.0.40
codegen_flags: <defaults>
</compile_context>

<pallas_src>
import functools
import math

import jax
import jax.numpy as jnp
from jax.experimental import pallas as pl
from jax.experimental.pallas import tpu as pltpu

# ----------------------------- tiny synthetic config -----------------------------
# vision (SigLIP) config
V_HIDDEN = 32
V_INTER = 64
V_LAYERS = 2
V_HEADS = 4
V_HEAD_DIM = V_HIDDEN // V_HEADS          # 8
CHANNELS = 3
IMAGE_SIZE = 16
PATCH = 8
NUM_PATCHES = (IMAGE_SIZE // PATCH) ** 2  # 4 image tokens
LN_EPS = 1e-6

# text (Gemma) config
HIDDEN = 32
INTER = 64
LAYERS = 2
N_HEADS = 4
N_KV = 2
HEAD_DIM = 8
VOCAB = 128
RMS_EPS = 1e-6
ROPE_THETA = 10000.0
ATTENTION_DROPOUT = 0.0                   # dropout is identity at p=0

IMAGE_TOKEN_INDEX = 127
PAD_TOKEN_ID = -1                          # config.pad_token_id is None -> -1

BATCH = 2
SEQ = NUM_PATCHES + 4                      # 4 image tokens + 4 text tokens = 8


def _default_vmem_limit():
    """~3/4 of physical VMEM, capped at 112 MiB (v5e/v6e ~96 MiB, v7x ~48 MiB)."""
    try:
        cap = int(pltpu.get_tpu_info().vmem_capacity_bytes)
        return max(min(cap * 3 // 4, 112 * 1024 * 1024), 32 * 1024 * 1024)
    except Exception:
        return 48 * 1024 * 1024


VMEM_LIMIT = _default_vmem_limit()


def _tile(dim, pref, align):
    """Largest tile <= pref that is a multiple of `align` and divides dim, else full dim."""
    if dim <= pref:
        return dim
    t = (pref // align) * align
    while t >= align:
        if dim % t == 0:
            return t
        t -= align
    return dim


def _as_bf16(x):
    return x if x.dtype == jnp.bfloat16 else x.astype(jnp.bfloat16)


# ================================ Pallas kernels ================================

def _matmul_kernel(x_ref, w_ref, o_ref, acc_ref):
    @pl.when(pl.program_id(2) == 0)
    def _():
        acc_ref[...] = jnp.zeros_like(acc_ref)
    acc_ref[...] += jnp.dot(x_ref[...], w_ref[...], preferred_element_type=jnp.float32)

    @pl.when(pl.program_id(2) == pl.num_programs(2) - 1)
    def _():
        o_ref[...] = acc_ref[...].astype(o_ref.dtype)


def _matmul_bias_kernel(x_ref, w_ref, b_ref, o_ref, acc_ref):
    @pl.when(pl.program_id(2) == 0)
    def _():
        acc_ref[...] = jnp.zeros_like(acc_ref)
    acc_ref[...] += jnp.dot(x_ref[...], w_ref[...], preferred_element_type=jnp.float32)

    # bias only touched on the last K step (bias block index is constant across k,
    # so it stays resident — no per-step DMA).
    @pl.when(pl.program_id(2) == pl.num_programs(2) - 1)
    def _():
        o_ref[...] = (acc_ref[...] + b_ref[...]).astype(o_ref.dtype)


def linear(x, w, b=None, out_dtype=jnp.bfloat16):
    """x: (..., K) @ w: (K, N) (+ b) -> (..., N). Tiled bf16 matmul, f32 accumulation."""
    K = x.shape[-1]
    N = w.shape[-1]
    lead = x.shape[:-1]
    xm = _as_bf16(x.reshape(-1, K))
    wm = _as_bf16(w)
    M = xm.shape[0]
    tm = _tile(M, 256, 8)
    tn = _tile(N, 512, 128)
    tk = _tile(K, 512, 128)
    grid = (M // tm, N // tn, K // tk)

    in_specs = [
        pl.BlockSpec((tm, tk), lambda i, j, k: (i, k)),
        pl.BlockSpec((tk, tn), lambda i, j, k: (k, j)),
    ]
    args = [xm, wm]
    if b is None:
        kern = _matmul_kernel
    else:
        kern = _matmul_bias_kernel
        in_specs.append(pl.BlockSpec((1, tn), lambda i, j, k: (0, j)))
        args.append(b.reshape(1, N).astype(jnp.float32))

    out = pl.pallas_call(
        kern,
        grid=grid,
        in_specs=in_specs,
        out_specs=pl.BlockSpec((tm, tn), lambda i, j, k: (i, j)),
        out_shape=jax.ShapeDtypeStruct((M, N), out_dtype),
        scratch_shapes=[pltpu.VMEM((tm, tn), jnp.float32)],
        compiler_params=pltpu.CompilerParams(
            dimension_semantics=("parallel", "parallel", "arbitrary"),
            vmem_limit_bytes=VMEM_LIMIT,
        ),
        cost_estimate=pl.CostEstimate(
            flops=2 * M * N * K,
            transcendentals=0,
            bytes_accessed=M * K * 2 + K * N * 2 + M * N * 2,
        ),
    )(*args)
    return out.reshape(*lead, N)


def _rms_matmul_kernel(x_ref, g_ref, w_ref, o_ref, nx_ref, *, eps):
    # Normalized activations computed once per row-tile, cached in bf16 scratch
    # and reused for every output-column tile j.
    @pl.when(pl.program_id(1) == 0)
    def _():
        x = x_ref[...].astype(jnp.float32)
        var = jnp.mean(x * x, axis=-1, keepdims=True)
        nx_ref[...] = ((x * jax.lax.rsqrt(var + eps)) * (1.0 + g_ref[...])).astype(jnp.bfloat16)
    o_ref[...] = jnp.dot(
        nx_ref[...], w_ref[...], preferred_element_type=jnp.float32
    ).astype(o_ref.dtype)


def rms_matmul(x, norm_w, w, *, eps=RMS_EPS, out_dtype=jnp.bfloat16):
    """Fused Gemma RMSNorm + (no-bias) projection: rmsnorm(x) @ w."""
    lead = x.shape[:-1]
    D = x.shape[-1]
    N = w.shape[-1]
    xm = _as_bf16(x.reshape(-1, D))
    M = xm.shape[0]
    tm = _tile(M, 256, 8)
    tn = _tile(N, 512, 128)
    out = pl.pallas_call(
        functools.partial(_rms_matmul_kernel, eps=eps),
        grid=(M // tm, N // tn),
        in_specs=[
            pl.BlockSpec((tm, D), lambda i, j: (i, 0)),
            pl.BlockSpec((1, D), lambda i, j: (0, 0)),
            pl.BlockSpec((D, tn), lambda i, j: (0, j)),
        ],
        out_specs=pl.BlockSpec((tm, tn), lambda i, j: (i, j)),
        out_shape=jax.ShapeDtypeStruct((M, N), out_dtype),
        scratch_shapes=[pltpu.VMEM((tm, D), jnp.bfloat16)],
        compiler_params=pltpu.CompilerParams(
            # inner axis is "arbitrary" so the cached nx scratch stays valid
            dimension_semantics=("parallel", "arbitrary"),
            vmem_limit_bytes=VMEM_LIMIT,
        ),
        cost_estimate=pl.CostEstimate(
            flops=2 * M * N * D,
            transcendentals=0,
            bytes_accessed=M * D * 2 + D * N * 2 + M * N * 2,
        ),
    )(xm, norm_w.reshape(1, D).astype(jnp.float32), _as_bf16(w))
    return out.reshape(*lead, N)


def _ln_matmul_kernel(x_ref, g_ref, b_ref, w_ref, bias_ref, o_ref, nx_ref, *, eps):
    @pl.when(pl.program_id(1) == 0)
    def _():
        x = x_ref[...].astype(jnp.float32)
        mu = jnp.mean(x, axis=-1, keepdims=True)
        var = jnp.mean((x - mu) * (x - mu), axis=-1, keepdims=True)
        nx_ref[...] = ((x - mu) * jax.lax.rsqrt(var + eps) * g_ref[...] + b_ref[...]
                       ).astype(jnp.bfloat16)
    o_ref[...] = (
        jnp.dot(nx_ref[...], w_ref[...], preferred_element_type=jnp.float32) + bias_ref[...]
    ).astype(o_ref.dtype)


def ln_matmul(x, ln_w, ln_b, w, bias, *, eps=LN_EPS, out_dtype=jnp.bfloat16):
    """Fused LayerNorm + biased projection: layernorm(x) @ w + bias."""
    lead = x.shape[:-1]
    D = x.shape[-1]
    N = w.shape[-1]
    xm = _as_bf16(x.reshape(-1, D))
    M = xm.shape[0]
    tm = _tile(M, 256, 8)
    tn = _tile(N, 512, 128)
    out = pl.pallas_call(
        functools.partial(_ln_matmul_kernel, eps=eps),
        grid=(M // tm, N // tn),
        in_specs=[
            pl.BlockSpec((tm, D), lambda i, j: (i, 0)),
            pl.BlockSpec((1, D), lambda i, j: (0, 0)),
            pl.BlockSpec((1, D), lambda i, j: (0, 0)),
            pl.BlockSpec((D, tn), lambda i, j: (0, j)),
            pl.BlockSpec((1, tn), lambda i, j: (0, j)),
        ],
        out_specs=pl.BlockSpec((tm, tn), lambda i, j: (i, j)),
        out_shape=jax.ShapeDtypeStruct((M, N), out_dtype),
        scratch_shapes=[pltpu.VMEM((tm, D), jnp.bfloat16)],
        compiler_params=pltpu.CompilerParams(
            dimension_semantics=("parallel", "arbitrary"),
            vmem_limit_bytes=VMEM_LIMIT,
        ),
    )(
        xm,
        ln_w.reshape(1, D).astype(jnp.float32),
        ln_b.reshape(1, D).astype(jnp.float32),
        _as_bf16(w),
        bias.reshape(1, N).astype(jnp.float32),
    )
    return out.reshape(*lead, N)


def _attn_oproj_kernel(q_ref, k_ref, v_ref, wo_ref, res_ref, o_ref, *,
                       scale, n_heads, n_kv, head_dim):
    # All heads of one batch element per grid step. Per-head static lane slices of
    # the packed Q/K/V blocks (GQA dedup, no repeat); o-projection and the residual
    # add are fused into the epilogue so the output is lane-dense (S, hidden) bf16.
    # Prefill causal mask is identically zero -> no additive mask is loaded.
    rep = n_heads // n_kv
    acc = jnp.zeros(o_ref.shape, jnp.float32)
    for h in range(n_heads):
        g = h // rep
        qh = q_ref[:, h * head_dim:(h + 1) * head_dim]
        kh = k_ref[:, g * head_dim:(g + 1) * head_dim]
        vh = v_ref[:, g * head_dim:(g + 1) * head_dim]
        s = jnp.dot(qh, kh.T, preferred_element_type=jnp.float32) * scale
        m = jnp.max(s, axis=-1, keepdims=True)
        p = jnp.exp(s - m)
        p = p / jnp.sum(p, axis=-1, keepdims=True)      # exact f32 division
        oh = jnp.dot(p.astype(jnp.bfloat16), vh, preferred_element_type=jnp.float32)
        acc = acc + jnp.dot(oh.astype(jnp.bfloat16),
                            wo_ref[h * head_dim:(h + 1) * head_dim, :],
                            preferred_element_type=jnp.float32)
    o_ref[...] = (res_ref[...].astype(jnp.float32) + acc).astype(o_ref.dtype)
    # TODO(synk): switch to KV-blocked online-softmax (flash) grid for real seq lengths.


def _attn_oproj_bias_kernel(q_ref, k_ref, v_ref, wo_ref, ob_ref, res_ref, o_ref, *,
                            scale, n_heads, n_kv, head_dim):
    rep = n_heads // n_kv
    acc = jnp.zeros(o_ref.shape, jnp.float32)
    for h in range(n_heads):
        g = h // rep
        qh = q_ref[:, h * head_dim:(h + 1) * head_dim]
        kh = k_ref[:, g * head_dim:(g + 1) * head_dim]
        vh = v_ref[:, g * head_dim:(g + 1) * head_dim]
        s = jnp.dot(qh, kh.T, preferred_element_type=jnp.float32) * scale
        m = jnp.max(s, axis=-1, keepdims=True)
        p = jnp.exp(s - m)
        p = p / jnp.sum(p, axis=-1, keepdims=True)
        oh = jnp.dot(p.astype(jnp.bfloat16), vh, preferred_element_type=jnp.float32)
        acc = acc + jnp.dot(oh.astype(jnp.bfloat16),
                            wo_ref[h * head_dim:(h + 1) * head_dim, :],
                            preferred_element_type=jnp.float32)
    o_ref[...] = (res_ref[...].astype(jnp.float32) + acc + ob_ref[...]).astype(o_ref.dtype)


def attention_oproj(q, k, v, wo, residual, *, scale, n_heads, n_kv, head_dim, o_bias=None):
    """Fused multi-head attention + o-projection + residual add.

    q: (B, S, H*hd), k/v: (B, S, KV*hd), wo: (H*hd, D), residual: (B, S, D).
    Returns (B, S, D) bf16 written lane-dense (no (B,H,S,hd) intermediate).
    """
    B, S, QD = q.shape
    Skv, KVD = k.shape[1], k.shape[2]
    D = wo.shape[-1]
    q, k, v = _as_bf16(q), _as_bf16(k), _as_bf16(v)
    res = _as_bf16(residual)

    in_specs = [
        pl.BlockSpec((None, S, QD), lambda b: (b, 0, 0)),
        pl.BlockSpec((None, Skv, KVD), lambda b: (b, 0, 0)),
        pl.BlockSpec((None, Skv, KVD), lambda b: (b, 0, 0)),
        pl.BlockSpec((QD, D), lambda b: (0, 0)),
    ]
    args = [q, k, v, _as_bf16(wo)]
    if o_bias is None:
        kern = functools.partial(_attn_oproj_kernel, scale=scale, n_heads=n_heads,
                                 n_kv=n_kv, head_dim=head_dim)
    else:
        kern = functools.partial(_attn_oproj_bias_kernel, scale=scale, n_heads=n_heads,
                                 n_kv=n_kv, head_dim=head_dim)
        in_specs.append(pl.BlockSpec((1, D), lambda b: (0, 0)))
        args.append(o_bias.reshape(1, D).astype(jnp.float32))
    in_specs.append(pl.BlockSpec((None, S, D), lambda b: (b, 0, 0)))
    args.append(res)

    return pl.pallas_call(
        kern,
        grid=(B,),
        in_specs=in_specs,
        out_specs=pl.BlockSpec((None, S, D), lambda b: (b, 0, 0)),
        out_shape=jax.ShapeDtypeStruct((B, S, D), jnp.bfloat16),
        compiler_params=pltpu.CompilerParams(
            dimension_semantics=("parallel",),
            vmem_limit_bytes=VMEM_LIMIT,
        ),
    )(*args)


def _gemma_mlp_kernel(x_ref, g_ref, wg_ref, wu_ref, wd_ref, o_ref, nx_ref, acc_ref, *, eps):
    t = pl.program_id(1)

    @pl.when(t == 0)
    def _():
        x = x_ref[...].astype(jnp.float32)
        var = jnp.mean(x * x, axis=-1, keepdims=True)
        nx_ref[...] = ((x * jax.lax.rsqrt(var + eps)) * (1.0 + g_ref[...])).astype(jnp.bfloat16)
        acc_ref[...] = jnp.zeros_like(acc_ref)

    nx = nx_ref[...]
    g = jnp.dot(nx, wg_ref[...], preferred_element_type=jnp.float32)
    u = jnp.dot(nx, wu_ref[...], preferred_element_type=jnp.float32)
    h = (jax.nn.gelu(g, approximate=True) * u).astype(jnp.bfloat16)   # gelu_pytorch_tanh, f32 math
    acc_ref[...] += jnp.dot(h, wd_ref[...], preferred_element_type=jnp.float32)

    @pl.when(t == pl.num_programs(1) - 1)
    def _():
        # residual add fused: out = x + mlp(rmsnorm(x))
        o_ref[...] = (x_ref[...].astype(jnp.float32) + acc_ref[...]).astype(o_ref.dtype)


def gemma_mlp(x, norm_w, wg, wu, wd, *, eps=RMS_EPS):
    """Fused post-attn RMSNorm + gate/up/gelu/down + residual, inter dim as reduction."""
    lead = x.shape[:-1]
    D = x.shape[-1]
    I = wg.shape[-1]
    xm = _as_bf16(x.reshape(-1, D))
    M = xm.shape[0]
    tm = _tile(M, 256, 8)
    ti = _tile(I, 512, 128)
    out = pl.pallas_call(
        functools.partial(_gemma_mlp_kernel, eps=eps),
        grid=(M // tm, I // ti),
        in_specs=[
            pl.BlockSpec((tm, D), lambda i, t: (i, 0)),
            pl.BlockSpec((1, D), lambda i, t: (0, 0)),
            pl.BlockSpec((D, ti), lambda i, t: (0, t)),
            pl.BlockSpec((D, ti), lambda i, t: (0, t)),
            pl.BlockSpec((ti, D), lambda i, t: (t, 0)),
        ],
        out_specs=pl.BlockSpec((tm, D), lambda i, t: (i, 0)),
        out_shape=jax.ShapeDtypeStruct((M, D), jnp.bfloat16),
        scratch_shapes=[pltpu.VMEM((tm, D), jnp.bfloat16),
                        pltpu.VMEM((tm, D), jnp.float32)],
        compiler_params=pltpu.CompilerParams(
            dimension_semantics=("parallel", "arbitrary"),
            vmem_limit_bytes=VMEM_LIMIT,
        ),
        cost_estimate=pl.CostEstimate(
            flops=6 * M * D * I,
            transcendentals=M * I,
            bytes_accessed=M * D * 2 + 3 * D * I * 2 + M * D * 2,
        ),
    )(
        xm,
        norm_w.reshape(1, D).astype(jnp.float32),
        _as_bf16(wg), _as_bf16(wu), _as_bf16(wd),
    )
    return out.reshape(*lead, D)


def _siglip_mlp_kernel(x_ref, g_ref, b_ref, w1_ref, b1_ref, w2_ref, b2_ref,
                       o_ref, nx_ref, acc_ref, *, eps):
    t = pl.program_id(1)

    @pl.when(t == 0)
    def _():
        x = x_ref[...].astype(jnp.float32)
        mu = jnp.mean(x, axis=-1, keepdims=True)
        var = jnp.mean((x - mu) * (x - mu), axis=-1, keepdims=True)
        nx_ref[...] = ((x - mu) * jax.lax.rsqrt(var + eps) * g_ref[...] + b_ref[...]
                       ).astype(jnp.bfloat16)
        acc_ref[...] = jnp.zeros_like(acc_ref)

    h = jnp.dot(nx_ref[...], w1_ref[...], preferred_element_type=jnp.float32) + b1_ref[...]
    h = jax.nn.gelu(h, approximate=True).astype(jnp.bfloat16)          # gelu_pytorch_tanh
    acc_ref[...] += jnp.dot(h, w2_ref[...], preferred_element_type=jnp.float32)

    @pl.when(t == pl.num_programs(1) - 1)
    def _():
        o_ref[...] = (x_ref[...].astype(jnp.float32) + acc_ref[...] + b2_ref[...]
                      ).astype(o_ref.dtype)


def siglip_mlp(x, ln_w, ln_b, w1, b1, w2, b2, *, eps=LN_EPS):
    """Fused LayerNorm + fc1/gelu/fc2 + residual, inter dim tiled as a reduction."""
    lead = x.shape[:-1]
    D = x.shape[-1]
    I = w1.shape[-1]
    xm = _as_bf16(x.reshape(-1, D))
    M = xm.shape[0]
    tm = _tile(M, 256, 8)
    ti = _tile(I, 512, 128)
    out = pl.pallas_call(
        functools.partial(_siglip_mlp_kernel, eps=eps),
        grid=(M // tm, I // ti),
        in_specs=[
            pl.BlockSpec((tm, D), lambda i, t: (i, 0)),
            pl.BlockSpec((1, D), lambda i, t: (0, 0)),
            pl.BlockSpec((1, D), lambda i, t: (0, 0)),
            pl.BlockSpec((D, ti), lambda i, t: (0, t)),
            pl.BlockSpec((1, ti), lambda i, t: (0, t)),
            pl.BlockSpec((ti, D), lambda i, t: (t, 0)),
            pl.BlockSpec((1, D), lambda i, t: (0, 0)),
        ],
        out_specs=pl.BlockSpec((tm, D), lambda i, t: (i, 0)),
        out_shape=jax.ShapeDtypeStruct((M, D), jnp.bfloat16),
        scratch_shapes=[pltpu.VMEM((tm, D), jnp.bfloat16),
                        pltpu.VMEM((tm, D), jnp.float32)],
        compiler_params=pltpu.CompilerParams(
            dimension_semantics=("parallel", "arbitrary"),
            vmem_limit_bytes=VMEM_LIMIT,
        ),
    )(
        xm,
        ln_w.reshape(1, D).astype(jnp.float32),
        ln_b.reshape(1, D).astype(jnp.float32),
        _as_bf16(w1),
        b1.reshape(1, I).astype(jnp.float32),
        _as_bf16(w2),
        b2.reshape(1, D).astype(jnp.float32),
    )
    return out.reshape(*lead, D)


# ================================ model (JAX glue) ================================

def rope_cos_sin(position_ids, dim, base):
    inv_freq = 1.0 / (base ** (jnp.arange(0, dim, 2, dtype=jnp.float32) / dim))
    freqs = position_ids[..., None].astype(jnp.float32) * inv_freq[None, None, :]
    emb = jnp.concatenate([freqs, freqs], axis=-1)          # (B, S, dim)
    return jnp.cos(emb), jnp.sin(emb)


def apply_rope_packed(x, cos, sin, n_heads, head_dim):
    # x: (B, S, n_heads*head_dim) lane-dense; cos/sin: (B, S, head_dim).
    # Rotation done per head without ever transposing to (B, H, S, hd).
    B, S, _ = x.shape
    x4 = x.reshape(B, S, n_heads, head_dim).astype(jnp.float32)
    d = head_dim // 2
    x1, x2 = x4[..., :d], x4[..., d:]
    rot = jnp.concatenate([-x2, x1], axis=-1)
    out = x4 * cos[:, :, None, :] + rot * sin[:, :, None, :]
    return out.reshape(B, S, n_heads * head_dim).astype(jnp.bfloat16)


def siglip_layer(lp, x):
    # attention sub-block: layernorm fused into the concatenated QKV projection,
    # o-projection + residual fused into the attention kernel (lane-dense output).
    qkv = ln_matmul(x, lp["ln1_w"], lp["ln1_b"], lp["qkv_w"], lp["qkv_b"])
    q, k, v = jnp.split(qkv, 3, axis=-1)
    x = attention_oproj(q, k, v, lp["o_w"], residual=x, scale=V_HEAD_DIM ** -0.5,
                        n_heads=V_HEADS, n_kv=V_HEADS, head_dim=V_HEAD_DIM,
                        o_bias=lp["o_b"])
    # MLP sub-block: layernorm + residual fused into the MLP kernel
    x = siglip_mlp(x, lp["ln2_w"], lp["ln2_b"],
                   lp["fc1_w"], lp["fc1_b"], lp["fc2_w"], lp["fc2_b"])
    return x


def vision_tower(vp, pixel_values):
    # pixel_values: NCHW (B, C, H, W); non-overlapping patch conv == patch-extract + matmul
    B, C, H, W = pixel_values.shape
    nh, nw = H // PATCH, W // PATCH
    patches = pixel_values.reshape(B, C, nh, PATCH, nw, PATCH)
    patches = patches.transpose(0, 2, 4, 1, 3, 5).reshape(B, nh * nw, C * PATCH * PATCH)
    x = linear(patches, vp["patch_w"], vp["patch_b"])        # (B, num_patches, V_HIDDEN) bf16
    x = (x.astype(jnp.float32) + vp["pos_emb"][None]).astype(jnp.bfloat16)
    for lp in vp["layers"]:
        x = siglip_layer(lp, x)
    # NOTE: post_layernorm is fused into the multi-modal projector (see paligemma_forward)
    return x


def gemma_decoder_layer(lp, x, cos, sin):
    # --- attention sub-block (input RMSNorm fused into the QKV projection) ---
    qkv = rms_matmul(x, lp["input_norm_w"], lp["qkv_w"])
    dq = N_HEADS * HEAD_DIM
    dkv = N_KV * HEAD_DIM
    q, k, v = jnp.split(qkv, [dq, dq + dkv], axis=-1)
    q = apply_rope_packed(q, cos, sin, N_HEADS, HEAD_DIM)
    k = apply_rope_packed(k, cos, sin, N_KV, HEAD_DIM)
    # GQA dedup + o_proj + residual fused into the attention kernel.
    x = attention_oproj(q, k, v, lp["o_w"], residual=x,
                        scale=1.0 / math.sqrt(HEAD_DIM),
                        n_heads=N_HEADS, n_kv=N_KV, head_dim=HEAD_DIM)
    # --- MLP sub-block (post-attn RMSNorm + residual fused into the MLP kernel) ---
    x = gemma_mlp(x, lp["post_norm_w"], lp["gate_w"], lp["up_w"], lp["down_w"])
    return x


def merge_image_features(image_features, inputs_embeds, input_ids):
    # Semantics of _merge_input_ids_with_image_features (masked_scatter with exactly
    # NUM_PATCHES image tokens per row).
    scaled = image_features.astype(jnp.float32) / (HIDDEN ** 0.5)
    text_mask = (input_ids != IMAGE_TOKEN_INDEX) & (input_ids != PAD_TOKEN_ID)
    image_mask = input_ids == IMAGE_TOKEN_INDEX
    pad_mask = input_ids == PAD_TOKEN_ID
    final = jnp.where(text_mask[..., None], inputs_embeds, 0.0)
    idx = jnp.cumsum(image_mask.astype(jnp.int32), axis=-1) - 1
    idx = jnp.clip(idx, 0, scaled.shape[1] - 1)
    gathered = jnp.take_along_axis(scaled, idx[..., None], axis=1)
    final = jnp.where(image_mask[..., None], gathered, final)
    final = jnp.where(pad_mask[..., None], 0.0, final)
    return final


def paligemma_forward(params, input_ids, pixel_values, attention_mask):
    # token embeddings
    inputs_embeds = jnp.take(params["embed_tokens"], input_ids, axis=0)
    # vision tower; SigLIP post-LN fused into the multi-modal projector matmul
    selected = vision_tower(params["vision"], pixel_values)
    image_features = ln_matmul(selected, params["vision"]["post_ln_w"],
                               params["vision"]["post_ln_b"],
                               params["mm_proj_w"], params["mm_proj_b"])
    # merge text / image tokens
    hidden = merge_image_features(image_features, inputs_embeds, input_ids)
    # prefill causal mask is all-zeros (full attention) -> no mask tensor is built.
    # TODO(synk): KV-cache decode path (q_len == 1) and non-zero masks not implemented.
    position_ids = jnp.cumsum(attention_mask, axis=-1)
    position_ids = jnp.where(attention_mask == 0, 1, position_ids)
    cos, sin = rope_cos_sin(position_ids, HEAD_DIM, ROPE_THETA)
    # Gemma language model (bf16 residual stream end-to-end)
    hidden = (hidden * (HIDDEN ** 0.5)).astype(jnp.bfloat16)
    for lp in params["text_layers"]:
        hidden = gemma_decoder_layer(lp, hidden, cos, sin)
    # final RMSNorm fused into lm_head; logits kept in f32
    logits = rms_matmul(hidden, params["final_norm_w"], params["lm_head_w"],
                        out_dtype=jnp.float32)
    return {"logits": logits}


# ================================ deterministic init ================================

def init_params(key):
    keys = iter(jax.random.split(key, 256))
    BF = jnp.bfloat16

    def nrm(shape, scale=0.02, dtype=jnp.float32):
        return (jax.random.normal(next(keys), shape, jnp.float32) * scale).astype(dtype)

    vision_layers = []
    for _ in range(V_LAYERS):
        q_w, k_w, v_w = nrm((V_HIDDEN, V_HIDDEN)), nrm((V_HIDDEN, V_HIDDEN)), nrm((V_HIDDEN, V_HIDDEN))
        q_b, k_b, v_b = nrm((V_HIDDEN,)), nrm((V_HIDDEN,)), nrm((V_HIDDEN,))
        vision_layers.append(dict(
            ln1_w=1.0 + nrm((V_HIDDEN,)), ln1_b=nrm((V_HIDDEN,)),
            qkv_w=jnp.concatenate([q_w, k_w, v_w], axis=1).astype(BF),
            qkv_b=jnp.concatenate([q_b, k_b, v_b], axis=0),
            o_w=nrm((V_HIDDEN, V_HIDDEN), dtype=BF), o_b=nrm((V_HIDDEN,)),
            ln2_w=1.0 + nrm((V_HIDDEN,)), ln2_b=nrm((V_HIDDEN,)),
            fc1_w=nrm((V_HIDDEN, V_INTER), dtype=BF), fc1_b=nrm((V_INTER,)),
            fc2_w=nrm((V_INTER, V_HIDDEN), dtype=BF), fc2_b=nrm((V_HIDDEN,)),
        ))
    vision = dict(
        patch_w=nrm((CHANNELS * PATCH * PATCH, V_HIDDEN), dtype=BF),  # conv as matmul
        patch_b=nrm((V_HIDDEN,)),
        pos_emb=nrm((NUM_PATCHES, V_HIDDEN)),
        layers=vision_layers,
        post_ln_w=1.0 + nrm((V_HIDDEN,)), post_ln_b=nrm((V_HIDDEN,)),
    )

    text_layers = []
    for _ in range(LAYERS):
        q_w = nrm((HIDDEN, N_HEADS * HEAD_DIM))
        k_w = nrm((HIDDEN, N_KV * HEAD_DIM))
        v_w = nrm((HIDDEN, N_KV * HEAD_DIM))
        text_layers.append(dict(
            input_norm_w=nrm((HIDDEN,)),
            qkv_w=jnp.concatenate([q_w, k_w, v_w], axis=1).astype(BF),
            o_w=nrm((N_HEADS * HEAD_DIM, HIDDEN), dtype=BF),
            post_norm_w=nrm((HIDDEN,)),
            gate_w=nrm((HIDDEN, INTER), dtype=BF),
            up_w=nrm((HIDDEN, INTER), dtype=BF),
            down_w=nrm((INTER, HIDDEN), dtype=BF),
        ))

    return dict(
        vision=vision,
        mm_proj_w=nrm((V_HIDDEN, HIDDEN), dtype=BF),
        mm_proj_b=nrm((HIDDEN,)),
        embed_tokens=nrm((VOCAB, HIDDEN)),
        text_layers=text_layers,
        final_norm_w=nrm((HIDDEN,)),
        lm_head_w=nrm((HIDDEN, VOCAB), dtype=BF),
    )


# ===================================== main =====================================

if __name__ == "__main__":
    key = jax.random.PRNGKey(0)
    k_param, k_pix = jax.random.split(key)

    params = init_params(k_param)

    pixel_values = jax.random.normal(
        k_pix, (BATCH, CHANNELS, IMAGE_SIZE, IMAGE_SIZE), jnp.float32
    )
    input_ids = jnp.array(
        [
            [IMAGE_TOKEN_INDEX] * NUM_PATCHES + [5, 6, 7, 2],
            [IMAGE_TOKEN_INDEX] * NUM_PATCHES + [10, 11, 12, 3],
        ],
        dtype=jnp.int32,
    )
    attention_mask = jnp.ones((BATCH, SEQ), dtype=jnp.int32)

    fwd = jax.jit(paligemma_forward)
    out = fwd(params, input_ids, pixel_values, attention_mask)
    logits = jax.block_until_ready(out["logits"])
    assert logits.shape == (BATCH, SEQ, VOCAB)
    assert bool(jnp.all(jnp.isfinite(logits)))
    print("KERNEL_OK")
</pallas_src>

<mosaic_0001>
module attributes {stable_mosaic.version = 11 : i64} {
  func.func @_matmul_bias_kernel(%arg0: i32, %arg1: i32, %arg2: i32, %arg3: memref<8x192xbf16, #tpu.memory_space<vmem>>, %arg4: memref<192x32xbf16, #tpu.memory_space<vmem>>, %arg5: memref<1x32xf32, #tpu.memory_space<vmem>>, %arg6: memref<8x32xbf16, #tpu.memory_space<vmem>>, %arg7: memref<8x32xf32, #tpu.memory_space<vmem>>) attributes {dimension_semantics = [#tpu.dimension_semantics<parallel>, #tpu.dimension_semantics<parallel>, #tpu.dimension_semantics<arbitrary>], iteration_bounds = array<i64: 1, 1, 1>, scalar_prefetch = 0 : i64, scratch_operands = 1 : i64, tpu.core_type = #tpu.core_type<tc>, window_params = [{transform_indices = @transform_0, window_bounds = array<i64: 8, 192>}, {transform_indices = @transform_1, window_bounds = array<i64: 192, 32>}, {transform_indices = @transform_2, window_bounds = array<i64: 1, 32>}, {transform_indices = @transform_3, window_bounds = array<i64: 8, 32>}]} {
    %c0_i32 = arith.constant 0 : i32
    %0 = arith.cmpi eq, %arg2, %c0_i32 : i32
    %1 = arith.extui %0 : i1 to i32
    %c0_i32_0 = arith.constant 0 : i32
    %2 = arith.cmpi ne, %1, %c0_i32_0 : i32
    scf.if %2 {
      %cst_10 = arith.constant 0.000000e+00 : f32
      %12 = vector.broadcast %cst_10 : f32 to vector<8x32xf32>
      %c0_11 = arith.constant 0 : index
      %c0_12 = arith.constant 0 : index
      %13 = vector.load %arg7[%c0_11, %c0_12] : memref<8x32xf32, #tpu.memory_space<vmem>>, vector<8x32xf32>
      tpu.vector_store %arg7[%c0_11, %c0_12], %12 {strides = array<i32>} : memref<8x32xf32, #tpu.memory_space<vmem>>, vector<8x32xf32>,
    } else {
    }
    %c0 = arith.constant 0 : index
    %c0_1 = arith.constant 0 : index
    %3 = vector.load %arg7[%c0, %c0_1] : memref<8x32xf32, #tpu.memory_space<vmem>>, vector<8x32xf32>
    %c0_2 = arith.constant 0 : index
    %c0_3 = arith.constant 0 : index
    %4 = vector.load %arg3[%c0_2, %c0_3] : memref<8x192xbf16, #tpu.memory_space<vmem>>, vector<8x192xbf16>
    %c0_4 = arith.constant 0 : index
    %c0_5 = arith.constant 0 : index
    %5 = vector.load %arg4[%c0_4, %c0_5] : memref<192x32xbf16, #tpu.memory_space<vmem>>, vector<192x32xbf16>
    %cst = arith.constant dense<0.000000e+00> : vector<8x32xf32>
    %6 = tpu.matmul %4, %5, %cst {dimension_numbers = #tpu.dot_dimension_numbers<[1], [0], [0], [1], [0, 0, 1, 1], [], []>} : vector<8x192xbf16>, vector<192x32xbf16>, vector<8x32xf32> -> vector<8x32xf32>
    %7 = arith.addf %3, %6 : vector<8x32xf32>
    %c0_6 = arith.constant 0 : index
    %c0_7 = arith.constant 0 : index
    %8 = vector.load %arg7[%c0_6, %c0_7] : memref<8x32xf32, #tpu.memory_space<vmem>>, vector<8x32xf32>
    tpu.vector_store %arg7[%c0_6, %c0_7], %7 {strides = array<i32>} : memref<8x32xf32, #tpu.memory_space<vmem>>, vector<8x32xf32>,
    %c0_i32_8 = arith.constant 0 : i32
    %9 = arith.cmpi eq, %arg2, %c0_i32_8 : i32
    %10 = arith.extui %9 : i1 to i32
    %c0_i32_9 = arith.constant 0 : i32
    %11 = arith.cmpi ne, %10, %c0_i32_9 : i32
    scf.if %11 {
      %c0_10 = arith.constant 0 : index
      %c0_11 = arith.constant 0 : index
      %12 = vector.load %arg7[%c0_10, %c0_11] : memref<8x32xf32, #tpu.memory_space<vmem>>, vector<8x32xf32>
      %c0_12 = arith.constant 0 : index
      %c0_13 = arith.constant 0 : index
      %13 = vector.load %arg5[%c0_12, %c0_13] : memref<1x32xf32, #tpu.memory_space<vmem>>, vector<1x32xf32>
      %14 = vector.broadcast %13 : vector<1x32xf32> to vector<8x32xf32>
      %15 = arith.addf %12, %14 : vector<8x32xf32>
      %16 = arith.truncf %15 : vector<8x32xf32> to vector<8x32xbf16>
      %c0_14 = arith.constant 0 : index
      %c0_15 = arith.constant 0 : index
      %17 = vector.load %arg6[%c0_14, %c0_15] : memref<8x32xbf16, #tpu.memory_space<vmem>>, vector<8x32xbf16>
      tpu.vector_store %arg6[%c0_14, %c0_15], %16 {strides = array<i32>} : memref<8x32xbf16, #tpu.memory_space<vmem>>, vector<8x32xbf16>,
    } else {
    }
    return
  }
  func.func @transform_0(%arg0: i32, %arg1: i32, %arg2: i32) -> (i32, i32) {
    %c0_i32 = arith.constant 0 : i32
    return %arg0, %arg2 : i32, i32
  }
  func.func @transform_1(%arg0: i32, %arg1: i32, %arg2: i32) -> (i32, i32) {
    %c0_i32 = arith.constant 0 : i32
    return %arg2, %arg1 : i32, i32
  }
  func.func @transform_2(%arg0: i32, %arg1: i32, %arg2: i32) -> (i32, i32) {
    %c0_i32 = arith.constant 0 : i32
    %c0_i32_0 = arith.constant 0 : i32
    return %c0_i32, %arg1 : i32, i32
  }
  func.func @transform_3(%arg0: i32, %arg1: i32, %arg2: i32) -> (i32, i32) {
    %c0_i32 = arith.constant 0 : i32
    return %arg0, %arg1 : i32, i32
  }
}

module attributes {stable_mosaic.version = 11 : i64} {
  func.func @_ln_matmul_kernel(%arg0: i32, %arg1: i32, %arg2: memref<8x32xbf16, #tpu.memory_space<vmem>>, %arg3: memref<1x32xf32, #tpu.memory_space<vmem>>, %arg4: memref<1x32xf32, #tpu.memory_space<vmem>>, %arg5: memref<32x96xbf16, #tpu.memory_space<vmem>>, %arg6: memref<1x96xf32, #tpu.memory_space<vmem>>, %arg7: memref<8x96xbf16, #tpu.memory_space<vmem>>, %arg8: memref<8x32xbf16, #tpu.memory_space<vmem>>) attributes {dimension_semantics = [#tpu.dimension_semantics<parallel>, #tpu.dimension_semantics<arbitrary>], iteration_bounds = array<i64: 1, 1>, scalar_prefetch = 0 : i64, scratch_operands = 1 : i64, tpu.core_type = #tpu.core_type<tc>, window_params = [{transform_indices = @transform_0, window_bounds = array<i64: 8, 32>}, {pipeline_mode = #tpu.pipeline_mode<synchronous>, transform_indices = @transform_1, window_bounds = array<i64: 1, 32>}, {pipeline_mode = #tpu.pipeline_mode<synchronous>, transform_indices = @transform_2, window_bounds = array<i64: 1, 32>}, {transform_indices = @transform_3, window_bounds = array<i64: 32, 96>}, {transform_indices = @transform_4, window_bounds = array<i64: 1, 96>}, {transform_indices = @transform_5, window_bounds = array<i64: 8, 96>}]} {
    %c0_i32 = arith.constant 0 : i32
    %0 = arith.cmpi eq, %arg1, %c0_i32 : i32
    %1 = arith.extui %0 : i1 to i32
    %c0_i32_0 = arith.constant 0 : i32
    %2 = arith.cmpi ne, %1, %c0_i32_0 : i32
    scf.if %2 {
      %c0_8 = arith.constant 0 : index
      %c0_9 = arith.constant 0 : index
      %11 = vector.load %arg2[%c0_8, %c0_9] : memref<8x32xbf16, #tpu.memory_space<vmem>>, vector<8x32xbf16>
      %12 = arith.extf %11 : vector<8x32xbf16> to vector<8x32xf32>
      %cst_10 = arith.constant dense<0.000000e+00> : vector<8xf32>
      %13 = vector.multi_reduction <add>, %12, %cst_10 [1] : vector<8x32xf32> to vector<8xf32>
      %14 = vector.shape_cast %13 : vector<8xf32> to vector<8x1xf32>
      %cst_11 = arith.constant 3.200000e+01 : f32
      %15 = vector.broadcast %cst_11 : f32 to vector<8x1xf32>
      %16 = arith.divf %14, %15 : vector<8x1xf32>
      %17 = vector.broadcast %16 : vector<8x1xf32> to vector<8x32xf32>
      %18 = arith.subf %12, %17 : vector<8x32xf32>
      %19 = vector.broadcast %16 : vector<8x1xf32> to vector<8x32xf32>
      %20 = arith.subf %12, %19 : vector<8x32xf32>
      %21 = arith.mulf %18, %20 : vector<8x32xf32>
      %cst_12 = arith.constant dense<0.000000e+00> : vector<8xf32>
      %22 = vector.multi_reduction <add>, %21, %cst_12 [1] : vector<8x32xf32> to vector<8xf32>
      %23 = vector.shape_cast %22 : vector<8xf32> to vector<8x1xf32>
      %cst_13 = arith.constant 3.200000e+01 : f32
      %24 = vector.broadcast %cst_13 : f32 to vector<8x1xf32>
      %25 = arith.divf %23, %24 : vector<8x1xf32>
      %26 = vector.broadcast %16 : vector<8x1xf32> to vector<8x32xf32>
      %27 = arith.subf %12, %26 : vector<8x32xf32>
      %cst_14 = arith.constant 9.99999997E-7 : f32
      %28 = vector.broadcast %cst_14 : f32 to vector<8x1xf32>
      %29 = arith.addf %25, %28 : vector<8x1xf32>
      %30 = math.rsqrt %29 : vector<8x1xf32>
      %31 = vector.broadcast %30 : vector<8x1xf32> to vector<8x32xf32>
      %32 = arith.mulf %27, %31 : vector<8x32xf32>
      %c0_15 = arith.constant 0 : index
      %c0_16 = arith.constant 0 : index
      %33 = vector.load %arg3[%c0_15, %c0_16] : memref<1x32xf32, #tpu.memory_space<vmem>>, vector<1x32xf32>
      %34 = vector.broadcast %33 : vector<1x32xf32> to vector<8x32xf32>
      %35 = arith.mulf %32, %34 : vector<8x32xf32>
      %c0_17 = arith.constant 0 : index
      %c0_18 = arith.constant 0 : index
      %36 = vector.load %arg4[%c0_17, %c0_18] : memref<1x32xf32, #tpu.memory_space<vmem>>, vector<1x32xf32>
      %37 = vector.broadcast %36 : vector<1x32xf32> to vector<8x32xf32>
      %38 = arith.addf %35, %37 : vector<8x32xf32>
      %39 = arith.truncf %38 : vector<8x32xf32> to vector<8x32xbf16>
      %c0_19 = arith.constant 0 : index
      %c0_20 = arith.constant 0 : index
      %40 = vector.load %arg8[%c0_19, %c0_20] : memref<8x32xbf16, #tpu.memory_space<vmem>>, vector<8x32xbf16>
      tpu.vector_store %arg8[%c0_19, %c0_20], %39 {strides = array<i32>} : memref<8x32xbf16, #tpu.memory_space<vmem>>, vector<8x32xbf16>,
    } else {
    }
    %c0 = arith.constant 0 : index
    %c0_1 = arith.constant 0 : index
    %3 = vector.load %arg8[%c0, %c0_1] : memref<8x32xbf16, #tpu.memory_space<vmem>>, vector<8x32xbf16>
    %c0_2 = arith.constant 0 : index
    %c0_3 = arith.constant 0 : index
    %4 = vector.load %arg5[%c0_2, %c0_3] : memref<32x96xbf16, #tpu.memory_space<vmem>>, vector<32x96xbf16>
    %cst = arith.constant dense<0.000000e+00> : vector<8x96xf32>
    %5 = tpu.matmul %3, %4, %cst {dimension_numbers = #tpu.dot_dimension_numbers<[1], [0], [0], [1], [0, 0, 1, 1], [], []>} : vector<8x32xbf16>, vector<32x96xbf16>, vector<8x96xf32> -> vector<8x96xf32>
    %c0_4 = arith.constant 0 : index
    %c0_5 = arith.constant 0 : index
    %6 = vector.load %arg6[%c0_4, %c0_5] : memref<1x96xf32, #tpu.memory_space<vmem>>, vector<1x96xf32>
    %7 = vector.broadcast %6 : vector<1x96xf32> to vector<8x96xf32>
    %8 = arith.addf %5, %7 : vector<8x96xf32>
    %9 = arith.truncf %8 : vector<8x96xf32> to vector<8x96xbf16>
    %c0_6 = arith.constant 0 : index
    %c0_7 = arith.constant 0 : index
    %10 = vector.load %arg7[%c0_6, %c0_7] : memref<8x96xbf16, #tpu.memory_space<vmem>>, vector<8x96xbf16>
    tpu.vector_store %arg7[%c0_6, %c0_7], %9 {strides = array<i32>} : memref<8x96xbf16, #tpu.memory_space<vmem>>, vector<8x96xbf16>,
    return
  }
  func.func @transform_0(%arg0: i32, %arg1: i32) -> (i32, i32) {
    %c0_i32 = arith.constant 0 : i32
    %c0_i32_0 = arith.constant 0 : i32
    return %arg0, %c0_i32 : i32, i32
  }
  func.func @transform_1(%arg0: i32, %arg1: i32) -> (i32, i32) {
    %c0_i32 = arith.constant 0 : i32
    %c0_i32_0 = arith.constant 0 : i32
    %c0_i32_1 = arith.constant 0 : i32
    return %c0_i32, %c0_i32_0 : i32, i32
  }
  func.func @transform_2(%arg0: i32, %arg1: i32) -> (i32, i32) {
    %c0_i32 = arith.constant 0 : i32
    %c0_i32_0 = arith.constant 0 : i32
    %c0_i32_1 = arith.constant 0 : i32
    return %c0_i32, %c0_i32_0 : i32, i32
  }
  func.func @transform_3(%arg0: i32, %arg1: i32) -> (i32, i32) {
    %c0_i32 = arith.constant 0 : i32
    %c0_i32_0 = arith.constant 0 : i32
    return %c0_i32, %arg1 : i32, i32
  }
  func.func @transform_4(%arg0: i32, %arg1: i32) -> (i32, i32) {
    %c0_i32 = arith.constant 0 : i32
    %c0_i32_0 = arith.constant 0 : i32
    return %c0_i32, %arg1 : i32, i32
  }
  func.func @transform_5(%arg0: i32, %arg1: i32) -> (i32, i32) {
    %c0_i32 = arith.constant 0 : i32
    return %arg0, %arg1 : i32, i32
  }
}

module attributes {stable_mosaic.version = 11 : i64} {
  func.func @_attn_oproj_bias_kernel(%arg0: i32, %arg1: memref<1x4x32xbf16, #tpu.memory_space<vmem>>, %arg2: memref<1x4x32xbf16, #tpu.memory_space<vmem>>, %arg3: memref<1x4x32xbf16, #tpu.memory_space<vmem>>, %arg4: memref<32x32xbf16, #tpu.memory_space<vmem>>, %arg5: memref<1x32xf32, #tpu.memory_space<vmem>>, %arg6: memref<1x4x32xbf16, #tpu.memory_space<vmem>>, %arg7: memref<1x4x32xbf16, #tpu.memory_space<vmem>>) attributes {dimension_semantics = [#tpu.dimension_semantics<parallel>], iteration_bounds = array<i64: 2>, scalar_prefetch = 0 : i64, scratch_operands = 0 : i64, tpu.core_type = #tpu.core_type<tc>, window_params = [{transform_indices = @transform_0, window_bounds = array<i64: 1, 4, 32>}, {transform_indices = @transform_1, window_bounds = array<i64: 1, 4, 32>}, {transform_indices = @transform_2, window_bounds = array<i64: 1, 4, 32>}, {pipeline_mode = #tpu.pipeline_mode<synchronous>, transform_indices = @transform_3, window_bounds = array<i64: 32, 32>}, {pipeline_mode = #tpu.pipeline_mode<synchronous>, transform_indices = @transform_4, window_bounds = array<i64: 1, 32>}, {transform_indices = @transform_5, window_bounds = array<i64: 1, 4, 32>}, {transform_indices = @transform_6, window_bounds = array<i64: 1, 4, 32>}]} {
    %cst = arith.constant 0.000000e+00 : f32
    %0 = vector.broadcast %cst : f32 to vector<4x32xf32>
    %c0 = arith.constant 0 : index
    %c0_0 = arith.constant 0 : index
    %c0_1 = arith.constant 0 : index
    %1 = vector.load %arg1[%c0, %c0_0, %c0_1] : memref<1x4x32xbf16, #tpu.memory_space<vmem>>, vector<1x4x8xbf16>
    %2 = vector.shape_cast %1 : vector<1x4x8xbf16> to vector<4x8xbf16>
    %c0_2 = arith.constant 0 : index
    %c0_3 = arith.constant 0 : index
    %c0_4 = arith.constant 0 : index
    %3 = vector.load %arg2[%c0_2, %c0_3, %c0_4] : memref<1x4x32xbf16, #tpu.memory_space<vmem>>, vector<1x4x8xbf16>
    %4 = vector.shape_cast %3 : vector<1x4x8xbf16> to vector<4x8xbf16>
    %c0_5 = arith.constant 0 : index
    %c0_6 = arith.constant 0 : index
    %c0_7 = arith.constant 0 : index
    %5 = vector.load %arg3[%c0_5, %c0_6, %c0_7] : memref<1x4x32xbf16, #tpu.memory_space<vmem>>, vector<1x4x8xbf16>
    %6 = vector.shape_cast %5 : vector<1x4x8xbf16> to vector<4x8xbf16>
    %7 = tpu.transpose %4, [1, 0] : vector<4x8xbf16> -> vector<8x4xbf16>
    %cst_8 = arith.constant dense<0.000000e+00> : vector<4x4xf32>
    %8 = tpu.matmul %2, %7, %cst_8 {dimension_numbers = #tpu.dot_dimension_numbers<[1], [0], [0], [1], [0, 0, 1, 1], [], []>} : vector<4x8xbf16>, vector<8x4xbf16>, vector<4x4xf32> -> vector<4x4xf32>
    %cst_9 = arith.constant 0.353553385 : f32
    %9 = vector.broadcast %cst_9 : f32 to vector<4x4xf32>
    %10 = arith.mulf %8, %9 : vector<4x4xf32>
    %cst_10 = arith.constant dense<0xFF800000> : vector<4xf32>
    %11 = vector.multi_reduction <maximumf>, %10, %cst_10 [1] : vector<4x4xf32> to vector<4xf32>
    %12 = vector.shape_cast %11 : vector<4xf32> to vector<4x1xf32>
    %13 = vector.broadcast %12 : vector<4x1xf32> to vector<4x4xf32>
    %14 = arith.subf %10, %13 : vector<4x4xf32>
    %15 = math.exp %14 : vector<4x4xf32>
    %cst_11 = arith.constant dense<0.000000e+00> : vector<4xf32>
    %16 = vector.multi_reduction <add>, %15, %cst_11 [1] : vector<4x4xf32> to vector<4xf32>
    %17 = vector.shape_cast %16 : vector<4xf32> to vector<4x1xf32>
    %18 = vector.broadcast %17 : vector<4x1xf32> to vector<4x4xf32>
    %19 = arith.divf %15, %18 : vector<4x4xf32>
    %20 = arith.truncf %19 : vector<4x4xf32> to vector<4x4xbf16>
    %cst_12 = arith.constant dense<0.000000e+00> : vector<4x8xf32>
    %21 = tpu.matmul %20, %6, %cst_12 {dimension_numbers = #tpu.dot_dimension_numbers<[1], [0], [0], [1], [0, 0, 1, 1], [], []>} : vector<4x4xbf16>, vector<4x8xbf16>, vector<4x8xf32> -> vector<4x8xf32>
    %22 = arith.truncf %21 : vector<4x8xf32> to vector<4x8xbf16>
    %c0_13 = arith.constant 0 : index
    %c0_14 = arith.constant 0 : index
    %23 = vector.load %arg4[%c0_13, %c0_14] : memref<32x32xbf16, #tpu.memory_space<vmem>>, vector<8x32xbf16>
    %cst_15 = arith.constant dense<0.000000e+00> : vector<4x32xf32>
    %24 = tpu.matmul %22, %23, %cst_15 {dimension_numbers = #tpu.dot_dimension_numbers<[1], [0], [0], [1], [0, 0, 1, 1], [], []>} : vector<4x8xbf16>, vector<8x32xbf16>, vector<4x32xf32> -> vector<4x32xf32>
    %25 = arith.addf %0, %24 : vector<4x32xf32>
    %c0_16 = arith.constant 0 : index
    %c0_17 = arith.constant 0 : index
    %c8 = arith.constant 8 : index
    %26 = vector.load %arg1[%c0_16, %c0_17, %c8] : memref<1x4x32xbf16, #tpu.memory_space<vmem>>, vector<1x4x8xbf16>
    %27 = vector.shape_cast %26 : vector<1x4x8xbf16> to vector<4x8xbf16>
    %c0_18 = arith.constant 0 : index
    %c0_19 = arith.constant 0 : index
    %c8_20 = arith.constant 8 : index
    %28 = vector.load %arg2[%c0_18, %c0_19, %c8_20] : memref<1x4x32xbf16, #tpu.memory_space<vmem>>, vector<1x4x8xbf16>
    %29 = vector.shape_cast %28 : vector<1x4x8xbf16> to vector<4x8xbf16>
    %c0_21 = arith.constant 0 : index
    %c0_22 = arith.constant 0 : index
    %c8_23 = arith.constant 8 : index
    %30 = vector.load %arg3[%c0_21, %c0_22, %c8_23] : memref<1x4x32xbf16, #tpu.memory_space<vmem>>, vector<1x4x8xbf16>
    %31 = vector.shape_cast %30 : vector<1x4x8xbf16> to vector<4x8xbf16>
    %32 = tpu.transpose %29, [1, 0] : vector<4x8xbf16> -> vector<8x4xbf16>
    %cst_24 = arith.constant dense<0.000000e+00> : vector<4x4xf32>
    %33 = tpu.matmul %27, %32, %cst_24 {dimension_numbers = #tpu.dot_dimension_numbers<[1], [0], [0], [1], [0, 0, 1, 1], [], []>} : vector<4x8xbf16>, vector<8x4xbf16>, vector<4x4xf32> -> vector<4x4xf32>
    %cst_25 = arith.constant 0.353553385 : f32
    %34 = vector.broadcast %cst_25 : f32 to vector<4x4xf32>
    %35 = arith.mulf %33, %34 : vector<4x4xf32>
    %cst_26 = arith.constant dense<0xFF800000> : vector<4xf32>
    %36 = vector.multi_reduction <maximumf>, %35, %cst_26 [1] : vector<4x4xf32> to vector<4xf32>
    %37 = vector.shape_cast %36 : vector<4xf32> to vector<4x1xf32>
    %38 = vector.broadcast %37 : vector<4x1xf32> to vector<4x4xf32>
    %39 = arith.subf %35, %38 : vector<4x4xf32>
    %40 = math.exp %39 : vector<4x4xf32>
    %cst_27 = arith.constant dense<0.000000e+00> : vector<4xf32>
    %41 = vector.multi_reduction <add>, %40, %cst_27 [1] : vector<4x4xf32> to vector<4xf32>
    %42 = vector.shape_cast %41 : vector<4xf32> to vector<4x1xf32>
    %43 = vector.broadcast %42 : vector<4x1xf32> to vector<4x4xf32>
    %44 = arith.divf %40, %43 : vector<4x4xf32>
    %45 = arith.truncf %44 : vector<4x4xf32> to vector<4x4xbf16>
    %cst_28 = arith.constant dense<0.000000e+00> : vector<4x8xf32>
    %46 = tpu.matmul %45, %31, %cst_28 {dimension_numbers = #tpu.dot_dimension_numbers<[1], [0], [0], [1], [0, 0, 1, 1], [], []>} : vector<4x4xbf16>, vector<4x8xbf16>, vector<4x8xf32> -> vector<4x8xf32>
    %47 = arith.truncf %46 : vector<4x8xf32> to vector<4x8xbf16>
    %c8_29 = arith.constant 8 : index
    %c0_30 = arith.constant 0 : index
    %48 = vector.load %arg4[%c8_29, %c0_30] : memref<32x32xbf16, #tpu.memory_space<vmem>>, vector<8x32xbf16>
    %cst_31 = arith.constant dense<0.000000e+00> : vector<4x32xf32>
    %49 = tpu.matmul %47, %48, %cst_31 {dimension_numbers = #tpu.dot_dimension_numbers<[1], [0], [0], [1], [0, 0, 1, 1], [], []>} : vector<4x8xbf16>, vector<8x32xbf16>, vector<4x32xf32> -> vector<4x32xf32>
    %50 = arith.addf %25, %49 : vector<4x32xf32>
    %c0_32 = arith.constant 0 : index
    %c0_33 = arith.constant 0 : index
    %c16 = arith.constant 16 : index
    %51 = vector.load %arg1[%c0_32, %c0_33, %c16] : memref<1x4x32xbf16, #tpu.memory_space<vmem>>, vector<1x4x8xbf16>
    %52 = vector.shape_cast %51 : vector<1x4x8xbf16> to vector<4x8xbf16>
    %c0_34 = arith.constant 0 : index
    %c0_35 = arith.constant 0 : index
    %c16_36 = arith.constant 16 : index
    %53 = vector.load %arg2[%c0_34, %c0_35, %c16_36] : memref<1x4x32xbf16, #tpu.memory_space<vmem>>, vector<1x4x8xbf16>
    %54 = vector.shape_cast %53 : vector<1x4x8xbf16> to vector<4x8xbf16>
    %c0_37 = arith.constant 0 : index
    %c0_38 = arith.constant 0 : index
    %c16_39 = arith.constant 16 : index
    %55 = vector.load %arg3[%c0_37, %c0_38, %c16_39] : memref<1x4x32xbf16, #tpu.memory_space<vmem>>, vector<1x4x8xbf16>
    %56 = vector.shape_cast %55 : vector<1x4x8xbf16> to vector<4x8xbf16>
    %57 = tpu.transpose %54, [1, 0] : vector<4x8xbf16> -> vector<8x4xbf16>
    %cst_40 = arith.constant dense<0.000000e+00> : vector<4x4xf32>
    %58 = tpu.matmul %52, %57, %cst_40 {dimension_numbers = #tpu.dot_dimension_numbers<[1], [0], [0], [1], [0, 0, 1, 1], [], []>} : vector<4x8xbf16>, vector<8x4xbf16>, vector<4x4xf32> -> vector<4x4xf32>
    %cst_41 = arith.constant 0.353553385 : f32
    %59 = vector.broadcast %cst_41 : f32 to vector<4x4xf32>
    %60 = arith.mulf %58, %59 : vector<4x4xf32>
    %cst_42 = arith.constant dense<0xFF800000> : vector<4xf32>
    %61 = vector.multi_reduction <maximumf>, %60, %cst_42 [1] : vector<4x4xf32> to vector<4xf32>
    %62 = vector.shape_cast %61 : vector<4xf32> to vector<4x1xf32>
    %63 = vector.broadcast %62 : vector<4x1xf32> to vector<4x4xf32>
    %64 = arith.subf %60, %63 : vector<4x4xf32>
    %65 = math.exp %64 : vector<4x4xf32>
    %cst_43 = arith.constant dense<0.000000e+00> : vector<4xf32>
    %66 = vector.multi_reduction <add>, %65, %cst_43 [1] : vector<4x4xf32> to vector<4xf32>
    %67 = vector.shape_cast %66 : vector<4xf32> to vector<4x1xf32>
    %68 = vector.broadcast %67 : vector<4x1xf32> to vector<4x4xf32>
    %69 = arith.divf %65, %68 : vector<4x4xf32>
    %70 = arith.truncf %69 : vector<4x4xf32> to vector<4x4xbf16>
    %cst_44 = arith.constant dense<0.000000e+00> : vector<4x8xf32>
    %71 = tpu.matmul %70, %56, %cst_44 {dimension_numbers = #tpu.dot_dimension_numbers<[1], [0], [0], [1], [0, 0, 1, 1], [], []>} : vector<4x4xbf16>, vector<4x8xbf16>, vector<4x8xf32> -> vector<4x8xf32>
    %72 = arith.truncf %71 : vector<4x8xf32> to vector<4x8xbf16>
    %c16_45 = arith.constant 16 : index
    %c0_46 = arith.constant 0 : index
    %73 = vector.load %arg4[%c16_45, %c0_46] : memref<32x32xbf16, #tpu.memory_space<vmem>>, vector<8x32xbf16>
    %cst_47 = arith.constant dense<0.000000e+00> : vector<4x32xf32>
    %74 = tpu.matmul %72, %73, %cst_47 {dimension_numbers = #tpu.dot_dimension_numbers<[1], [0], [0], [1], [0, 0, 1, 1], [], []>} : vector<4x8xbf16>, vector<8x32xbf16>, vector<4x32xf32> -> vector<4x32xf32>
    %75 = arith.addf %50, %74 : vector<4x32xf32>
    %c0_48 = arith.constant 0 : index
    %c0_49 = arith.constant 0 : index
    %c24 = arith.constant 24 : index
    %76 = vector.load %arg1[%c0_48, %c0_49, %c24] : memref<1x4x32xbf16, #tpu.memory_space<vmem>>, vector<1x4x8xbf16>
    %77 = vector.shape_cast %76 : vector<1x4x8xbf16> to vector<4x8xbf16>
    %c0_50 = arith.constant 0 : index
    %c0_51 = arith.constant 0 : index
    %c24_52 = arith.constant 24 : index
    %78 = vector.load %arg2[%c0_50, %c0_51, %c24_52] : memref<1x4x32xbf16, #tpu.memory_space<vmem>>, vector<1x4x8xbf16>
    %79 = vector.shape_cast %78 : vector<1x4x8xbf16> to vector<4x8xbf16>
    %c0_53 = arith.constant 0 : index
    %c0_54 = arith.constant 0 : index
    %c24_55 = arith.constant 24 : index
    %80 = vector.load %arg3[%c0_53, %c0_54, %c24_55] : memref<1x4x32xbf16, #tpu.memory_space<vmem>>, vector<1x4x8xbf16>
    %81 = vector.shape_cast %80 : vector<1x4x8xbf16> to vector<4x8xbf16>
    %82 = tpu.transpose %79, [1, 0] : vector<4x8xbf16> -> vector<8x4xbf16>
    %cst_56 = arith.constant dense<0.000000e+00> : vector<4x4xf32>
    %83 = tpu.matmul %77, %82, %cst_56 {dimension_numbers = #tpu.dot_dimension_numbers<[1], [0], [0], [1], [0, 0, 1, 1], [], []>} : vector<4x8xbf16>, vector<8x4xbf16>, vector<4x4xf32> -> vector<4x4xf32>
    %cst_57 = arith.constant 0.353553385 : f32
    %84 = vector.broadcast %cst_57 : f32 to vector<4x4xf32>
    %85 = arith.mulf %83, %84 : vector<4x4xf32>
    %cst_58 = arith.constant dense<0xFF800000> : vector<4xf32>
    %86 = vector.multi_reduction <maximumf>, %85, %cst_58 [1] : vector<4x4xf32> to vector<4xf32>
    %87 = vector.shape_cast %86 : vector<4xf32> to vector<4x1xf32>
    %88 = vector.broadcast %87 : vector<4x1xf32> to vector<4x4xf32>
    %89 = arith.subf %85, %88 : vector<4x4xf32>
    %90 = math.exp %89 : vector<4x4xf32>
    %cst_59 = arith.constant dense<0.000000e+00> : vector<4xf32>
    %91 = vector.multi_reduction <add>, %90, %cst_59 [1] : vector<4x4xf32> to vector<4xf32>
    %92 = vector.shape_cast %91 : vector<4xf32> to vector<4x1xf32>
    %93 = vector.broadcast %92 : vector<4x1xf32> to vector<4x4xf32>
    %94 = arith.divf %90, %93 : vector<4x4xf32>
    %95 = arith.truncf %94 : vector<4x4xf32> to vector<4x4xbf16>
    %cst_60 = arith.constant dense<0.000000e+00> : vector<4x8xf32>
    %96 = tpu.matmul %95, %81, %cst_60 {dimension_numbers = #tpu.dot_dimension_numbers<[1], [0], [0], [1], [0, 0, 1, 1], [], []>} : vector<4x4xbf16>, vector<4x8xbf16>, vector<4x8xf32> -> vector<4x8xf32>
    %97 = arith.truncf %96 : vector<4x8xf32> to vector<4x8xbf16>
    %c24_61 = arith.constant 24 : index
    %c0_62 = arith.constant 0 : index
    %98 = vector.load %arg4[%c24_61, %c0_62] : memref<32x32xbf16, #tpu.memory_space<vmem>>, vector<8x32xbf16>
    %cst_63 = arith.constant dense<0.000000e+00> : vector<4x32xf32>
    %99 = tpu.matmul %97, %98, %cst_63 {dimension_numbers = #tpu.dot_dimension_numbers<[1], [0], [0], [1], [0, 0, 1, 1], [], []>} : vector<4x8xbf16>, vector<8x32xbf16>, vector<4x32xf32> -> vector<4x32xf32>
    %100 = arith.addf %75, %99 : vector<4x32xf32>
    %c0_64 = arith.constant 0 : index
    %c0_65 = arith.constant 0 : index
    %c0_66 = arith.constant 0 : index
    %101 = vector.load %arg6[%c0_64, %c0_65, %c0_66] : memref<1x4x32xbf16, #tpu.memory_space<vmem>>, vector<1x4x32xbf16>
    %102 = vector.shape_cast %101 : vector<1x4x32xbf16> to vector<4x32xbf16>
    %103 = arith.extf %102 : vector<4x32xbf16> to vector<4x32xf32>
    %104 = arith.addf %103, %100 : vector<4x32xf32>
    %c0_67 = arith.constant 0 : index
    %c0_68 = arith.constant 0 : index
    %105 = vector.load %arg5[%c0_67, %c0_68] : memref<1x32xf32, #tpu.memory_space<vmem>>, vector<1x32xf32>
    %106 = vector.broadcast %105 : vector<1x32xf32> to vector<4x32xf32>
    %107 = arith.addf %104, %106 : vector<4x32xf32>
    %108 = arith.truncf %107 : vector<4x32xf32> to vector<4x32xbf16>
    %c0_69 = arith.constant 0 : index
    %c0_70 = arith.constant 0 : index
    %c0_71 = arith.constant 0 : index
    %109 = vector.load %arg7[%c0_69, %c0_70, %c0_71] : memref<1x4x32xbf16, #tpu.memory_space<vmem>>, vector<1x4x32xbf16>
    %110 = vector.shape_cast %109 : vector<1x4x32xbf16> to vector<4x32xbf16>
    %111 = vector.shape_cast %108 : vector<4x32xbf16> to vector<1x4x32xbf16>
    tpu.vector_store %arg7[%c0_69, %c0_70, %c0_71], %111 {strides = array<i32>} : memref<1x4x32xbf16, #tpu.memory_space<vmem>>, vector<1x4x32xbf16>,
    return
  }
  func.func @transform_0(%arg0: i32) -> (i32, i32, i32) {
    %c0_i32 = arith.constant 0 : i32
    %c0_i32_0 = arith.constant 0 : i32
    %c0_i32_1 = arith.constant 0 : i32
    return %arg0, %c0_i32, %c0_i32_0 : i32, i32, i32
  }
  func.func @transform_1(%arg0: i32) -> (i32, i32, i32) {
    %c0_i32 = arith.constant 0 : i32
    %c0_i32_0 = arith.constant 0 : i32
    %c0_i32_1 = arith.constant 0 : i32
    return %arg0, %c0_i32, %c0_i32_0 : i32, i32, i32
  }
  func.func @transform_2(%arg0: i32) -> (i32, i32, i32) {
    %c0_i32 = arith.constant 0 : i32
    %c0_i32_0 = arith.constant 0 : i32
    %c0_i32_1 = arith.constant 0 : i32
    return %arg0, %c0_i32, %c0_i32_0 : i32, i32, i32
  }
  func.func @transform_3(%arg0: i32) -> (i32, i32) {
    %c0_i32 = arith.constant 0 : i32
    %c0_i32_0 = arith.constant 0 : i32
    %c0_i32_1 = arith.constant 0 : i32
    return %c0_i32, %c0_i32_0 : i32, i32
  }
  func.func @transform_4(%arg0: i32) -> (i32, i32) {
    %c0_i32 = arith.constant 0 : i32
    %c0_i32_0 = arith.constant 0 : i32
    %c0_i32_1 = arith.constant 0 : i32
    return %c0_i32, %c0_i32_0 : i32, i32
  }
  func.func @transform_5(%arg0: i32) -> (i32, i32, i32) {
    %c0_i32 = arith.constant 0 : i32
    %c0_i32_0 = arith.constant 0 : i32
    %c0_i32_1 = arith.constant 0 : i32
    return %arg0, %c0_i32, %c0_i32_0 : i32, i32, i32
  }
  func.func @transform_6(%arg0: i32) -> (i32, i32, i32) {
    %c0_i32 = arith.constant 0 : i32
    %c0_i32_0 = arith.constant 0 : i32
    %c0_i32_1 = arith.constant 0 : i32
    return %arg0, %c0_i32, %c0_i32_0 : i32, i32, i32
  }
}

module attributes {stable_mosaic.version = 11 : i64} {
  func.func @_siglip_mlp_kernel(%arg0: i32, %arg1: i32, %arg2: memref<8x32xbf16, #tpu.memory_space<vmem>>, %arg3: memref<1x32xf32, #tpu.memory_space<vmem>>, %arg4: memref<1x32xf32, #tpu.memory_space<vmem>>, %arg5: memref<32x64xbf16, #tpu.memory_space<vmem>>, %arg6: memref<1x64xf32, #tpu.memory_space<vmem>>, %arg7: memref<64x32xbf16, #tpu.memory_space<vmem>>, %arg8: memref<1x32xf32, #tpu.memory_space<vmem>>, %arg9: memref<8x32xbf16, #tpu.memory_space<vmem>>, %arg10: memref<8x32xbf16, #tpu.memory_space<vmem>>, %arg11: memref<8x32xf32, #tpu.memory_space<vmem>>) attributes {dimension_semantics = [#tpu.dimension_semantics<parallel>, #tpu.dimension_semantics<arbitrary>], iteration_bounds = array<i64: 1, 1>, scalar_prefetch = 0 : i64, scratch_operands = 2 : i64, tpu.core_type = #tpu.core_type<tc>, window_params = [{transform_indices = @transform_0, window_bounds = array<i64: 8, 32>}, {pipeline_mode = #tpu.pipeline_mode<synchronous>, transform_indices = @transform_1, window_bounds = array<i64: 1, 32>}, {pipeline_mode = #tpu.pipeline_mode<synchronous>, transform_indices = @transform_2, window_bounds = array<i64: 1, 32>}, {transform_indices = @transform_3, window_bounds = array<i64: 32, 64>}, {transform_indices = @transform_4, window_bounds = array<i64: 1, 64>}, {transform_indices = @transform_5, window_bounds = array<i64: 64, 32>}, {pipeline_mode = #tpu.pipeline_mode<synchronous>, transform_indices = @transform_6, window_bounds = array<i64: 1, 32>}, {transform_indices = @transform_7, window_bounds = array<i64: 8, 32>}]} {
    %c0_i32 = arith.constant 0 : i32
    %0 = arith.cmpi eq, %arg1, %c0_i32 : i32
    %1 = arith.extui %0 : i1 to i32
    %c0_i32_0 = arith.constant 0 : i32
    %2 = arith.cmpi ne, %1, %c0_i32_0 : i32
    scf.if %2 {
      %c0_19 = arith.constant 0 : index
      %c0_20 = arith.constant 0 : index
      %31 = vector.load %arg2[%c0_19, %c0_20] : memref<8x32xbf16, #tpu.memory_space<vmem>>, vector<8x32xbf16>
      %32 = arith.extf %31 : vector<8x32xbf16> to vector<8x32xf32>
      %cst_21 = arith.constant dense<0.000000e+00> : vector<8xf32>
      %33 = vector.multi_reduction <add>, %32, %cst_21 [1] : vector<8x32xf32> to vector<8xf32>
      %34 = vector.shape_cast %33 : vector<8xf32> to vector<8x1xf32>
      %cst_22 = arith.constant 3.200000e+01 : f32
      %35 = vector.broadcast %cst_22 : f32 to vector<8x1xf32>
      %36 = arith.divf %34, %35 : vector<8x1xf32>
      %37 = vector.broadcast %36 : vector<8x1xf32> to vector<8x32xf32>
      %38 = arith.subf %32, %37 : vector<8x32xf32>
      %39 = vector.broadcast %36 : vector<8x1xf32> to vector<8x32xf32>
      %40 = arith.subf %32, %39 : vector<8x32xf32>
      %41 = arith.mulf %38, %40 : vector<8x32xf32>
      %cst_23 = arith.constant dense<0.000000e+00> : vector<8xf32>
      %42 = vector.multi_reduction <add>, %41, %cst_23 [1] : vector<8x32xf32> to vector<8xf32>
      %43 = vector.shape_cast %42 : vector<8xf32> to vector<8x1xf32>
      %cst_24 = arith.constant 3.200000e+01 : f32
      %44 = vector.broadcast %cst_24 : f32 to vector<8x1xf32>
      %45 = arith.divf %43, %44 : vector<8x1xf32>
      %46 = vector.broadcast %36 : vector<8x1xf32> to vector<8x32xf32>
      %47 = arith.subf %32, %46 : vector<8x32xf32>
      %cst_25 = arith.constant 9.99999997E-7 : f32
      %48 = vector.broadcast %cst_25 : f32 to vector<8x1xf32>
      %49 = arith.addf %45, %48 : vector<8x1xf32>
      %50 = math.rsqrt %49 : vector<8x1xf32>
      %51 = vector.broadcast %50 : vector<8x1xf32> to vector<8x32xf32>
      %52 = arith.mulf %47, %51 : vector<8x32xf32>
      %c0_26 = arith.constant 0 : index
      %c0_27 = arith.constant 0 : index
      %53 = vector.load %arg3[%c0_26, %c0_27] : memref<1x32xf32, #tpu.memory_space<vmem>>, vector<1x32xf32>
      %54 = vector.broadcast %53 : vector<1x32xf32> to vector<8x32xf32>
      %55 = arith.mulf %52, %54 : vector<8x32xf32>
      %c0_28 = arith.constant 0 : index
      %c0_29 = arith.constant 0 : index
      %56 = vector.load %arg4[%c0_28, %c0_29] : memref<1x32xf32, #tpu.memory_space<vmem>>, vector<1x32xf32>
      %57 = vector.broadcast %56 : vector<1x32xf32> to vector<8x32xf32>
      %58 = arith.addf %55, %57 : vector<8x32xf32>
      %59 = arith.truncf %58 : vector<8x32xf32> to vector<8x32xbf16>
      %c0_30 = arith.constant 0 : index
      %c0_31 = arith.constant 0 : index
      %60 = vector.load %arg10[%c0_30, %c0_31] : memref<8x32xbf16, #tpu.memory_space<vmem>>, vector<8x32xbf16>
      tpu.vector_store %arg10[%c0_30, %c0_31], %59 {strides = array<i32>} : memref<8x32xbf16, #tpu.memory_space<vmem>>, vector<8x32xbf16>,
      %cst_32 = arith.constant 0.000000e+00 : f32
      %61 = vector.broadcast %cst_32 : f32 to vector<8x32xf32>
      %c0_33 = arith.constant 0 : index
      %c0_34 = arith.constant 0 : index
      %62 = vector.load %arg11[%c0_33, %c0_34] : memref<8x32xf32, #tpu.memory_space<vmem>>, vector<8x32xf32>
      tpu.vector_store %arg11[%c0_33, %c0_34], %61 {strides = array<i32>} : memref<8x32xf32, #tpu.memory_space<vmem>>, vector<8x32xf32>,
    } else {
    }
    %c0 = arith.constant 0 : index
    %c0_1 = arith.constant 0 : index
    %3 = vector.load %arg10[%c0, %c0_1] : memref<8x32xbf16, #tpu.memory_space<vmem>>, vector<8x32xbf16>
    %c0_2 = arith.constant 0 : index
    %c0_3 = arith.constant 0 : index
    %4 = vector.load %arg5[%c0_2, %c0_3] : memref<32x64xbf16, #tpu.memory_space<vmem>>, vector<32x64xbf16>
    %cst = arith.constant dense<0.000000e+00> : vector<8x64xf32>
    %5 = tpu.matmul %3, %4, %cst {dimension_numbers = #tpu.dot_dimension_numbers<[1], [0], [0], [1], [0, 0, 1, 1], [], []>} : vector<8x32xbf16>, vector<32x64xbf16>, vector<8x64xf32> -> vector<8x64xf32>
    %c0_4 = arith.constant 0 : index
    %c0_5 = arith.constant 0 : index
    %6 = vector.load %arg6[%c0_4, %c0_5] : memref<1x64xf32, #tpu.memory_space<vmem>>, vector<1x64xf32>
    %7 = vector.broadcast %6 : vector<1x64xf32> to vector<8x64xf32>
    %8 = arith.addf %5, %7 : vector<8x64xf32>
    %9 = arith.mulf %8, %8 : vector<8x64xf32>
    %10 = arith.mulf %8, %9 : vector<8x64xf32>
    %cst_6 = arith.constant 4.471500e-02 : f32
    %11 = vector.broadcast %cst_6 : f32 to vector<8x64xf32>
    %12 = arith.mulf %11, %10 : vector<8x64xf32>
    %13 = arith.addf %8, %12 : vector<8x64xf32>
    %cst_7 = arith.constant 0.797884583 : f32
    %14 = vector.broadcast %cst_7 : f32 to vector<8x64xf32>
    %15 = arith.mulf %14, %13 : vector<8x64xf32>
    %16 = math.tanh %15 : vector<8x64xf32>
    %cst_8 = arith.constant 1.000000e+00 : f32
    %17 = vector.broadcast %cst_8 : f32 to vector<8x64xf32>
    %18 = arith.addf %17, %16 : vector<8x64xf32>
    %cst_9 = arith.constant 5.000000e-01 : f32
    %19 = vector.broadcast %cst_9 : f32 to vector<8x64xf32>
    %20 = arith.mulf %19, %18 : vector<8x64xf32>
    %21 = arith.mulf %8, %20 : vector<8x64xf32>
    %22 = arith.truncf %21 : vector<8x64xf32> to vector<8x64xbf16>
    %c0_10 = arith.constant 0 : index
    %c0_11 = arith.constant 0 : index
    %23 = vector.load %arg11[%c0_10, %c0_11] : memref<8x32xf32, #tpu.memory_space<vmem>>, vector<8x32xf32>
    %c0_12 = arith.constant 0 : index
    %c0_13 = arith.constant 0 : index
    %24 = vector.load %arg7[%c0_12, %c0_13] : memref<64x32xbf16, #tpu.memory_space<vmem>>, vector<64x32xbf16>
    %cst_14 = arith.constant dense<0.000000e+00> : vector<8x32xf32>
    %25 = tpu.matmul %22, %24, %cst_14 {dimension_numbers = #tpu.dot_dimension_numbers<[1], [0], [0], [1], [0, 0, 1, 1], [], []>} : vector<8x64xbf16>, vector<64x32xbf16>, vector<8x32xf32> -> vector<8x32xf32>
    %26 = arith.addf %23, %25 : vector<8x32xf32>
    %c0_15 = arith.constant 0 : index
    %c0_16 = arith.constant 0 : index
    %27 = vector.load %arg11[%c0_15, %c0_16] : memref<8x32xf32, #tpu.memory_space<vmem>>, vector<8x32xf32>
    tpu.vector_store %arg11[%c0_15, %c0_16], %26 {strides = array<i32>} : memref<8x32xf32, #tpu.memory_space<vmem>>, vector<8x32xf32>,
    %c0_i32_17 = arith.constant 0 : i32
    %28 = arith.cmpi eq, %arg1, %c0_i32_17 : i32
    %29 = arith.extui %28 : i1 to i32
    %c0_i32_18 = arith.constant 0 : i32
    %30 = arith.cmpi ne, %29, %c0_i32_18 : i32
    scf.if %30 {
      %c0_19 = arith.constant 0 : index
      %c0_20 = arith.constant 0 : index
      %31 = vector.load %arg2[%c0_19, %c0_20] : memref<8x32xbf16, #tpu.memory_space<vmem>>, vector<8x32xbf16>
      %32 = arith.extf %31 : vector<8x32xbf16> to vector<8x32xf32>
      %c0_21 = arith.constant 0 : index
      %c0_22 = arith.constant 0 : index
      %33 = vector.load %arg11[%c0_21, %c0_22] : memref<8x32xf32, #tpu.memory_space<vmem>>, vector<8x32xf32>
      %34 = arith.addf %32, %33 : vector<8x32xf32>
      %c0_23 = arith.constant 0 : index
      %c0_24 = arith.constant 0 : index
      %35 = vector.load %arg8[%c0_23, %c0_24] : memref<1x32xf32, #tpu.memory_space<vmem>>, vector<1x32xf32>
      %36 = vector.broadcast %35 : vector<1x32xf32> to vector<8x32xf32>
      %37 = arith.addf %34, %36 : vector<8x32xf32>
      %38 = arith.truncf %37 : vector<8x32xf32> to vector<8x32xbf16>
      %c0_25 = arith.constant 0 : index
      %c0_26 = arith.constant 0 : index
      %39 = vector.load %arg9[%c0_25, %c0_26] : memref<8x32xbf16, #tpu.memory_space<vmem>>, vector<8x32xbf16>
      tpu.vector_store %arg9[%c0_25, %c0_26], %38 {strides = array<i32>} : memref<8x32xbf16, #tpu.memory_space<vmem>>, vector<8x32xbf16>,
    } else {
    }
    return
  }
  func.func @transform_0(%arg0: i32, %arg1: i32) -> (i32, i32) {
    %c0_i32 = arith.constant 0 : i32
    %c0_i32_0 = arith.constant 0 : i32
    return %arg0, %c0_i32 : i32, i32
  }
  func.func @transform_1(%arg0: i32, %arg1: i32) -> (i32, i32) {
    %c0_i32 = arith.constant 0 : i32
    %c0_i32_0 = arith.constant 0 : i32
    %c0_i32_1 = arith.constant 0 : i32
    return %c0_i32, %c0_i32_0 : i32, i32
  }
  func.func @transform_2(%arg0: i32, %arg1: i32) -> (i32, i32) {
    %c0_i32 = arith.constant 0 : i32
    %c0_i32_0 = arith.constant 0 : i32
    %c0_i32_1 = arith.constant 0 : i32
    return %c0_i32, %c0_i32_0 : i32, i32
  }
  func.func @transform_3(%arg0: i32, %arg1: i32) -> (i32, i32) {
    %c0_i32 = arith.constant 0 : i32
    %c0_i32_0 = arith.constant 0 : i32
    return %c0_i32, %arg1 : i32, i32
  }
  func.func @transform_4(%arg0: i32, %arg1: i32) -> (i32, i32) {
    %c0_i32 = arith.constant 0 : i32
    %c0_i32_0 = arith.constant 0 : i32
    return %c0_i32, %arg1 : i32, i32
  }
  func.func @transform_5(%arg0: i32, %arg1: i32) -> (i32, i32) {
    %c0_i32 = arith.constant 0 : i32
    %c0_i32_0 = arith.constant 0 : i32
    return %arg1, %c0_i32 : i32, i32
  }
  func.func @transform_6(%arg0: i32, %arg1: i32) -> (i32, i32) {
    %c0_i32 = arith.constant 0 : i32
    %c0_i32_0 = arith.constant 0 : i32
    %c0_i32_1 = arith.constant 0 : i32
    return %c0_i32, %c0_i32_0 : i32, i32
  }
  func.func @transform_7(%arg0: i32, %arg1: i32) -> (i32, i32) {
    %c0_i32 = arith.constant 0 : i32
    %c0_i32_0 = arith.constant 0 : i32
    return %arg0, %c0_i32 : i32, i32
  }
}

module attributes {stable_mosaic.version = 11 : i64} {
  func.func @_ln_matmul_kernel(%arg0: i32, %arg1: i32, %arg2: memref<8x32xbf16, #tpu.memory_space<vmem>>, %arg3: memref<1x32xf32, #tpu.memory_space<vmem>>, %arg4: memref<1x32xf32, #tpu.memory_space<vmem>>, %arg5: memref<32x32xbf16, #tpu.memory_space<vmem>>, %arg6: memref<1x32xf32, #tpu.memory_space<vmem>>, %arg7: memref<8x32xbf16, #tpu.memory_space<vmem>>, %arg8: memref<8x32xbf16, #tpu.memory_space<vmem>>) attributes {dimension_semantics = [#tpu.dimension_semantics<parallel>, #tpu.dimension_semantics<arbitrary>], iteration_bounds = array<i64: 1, 1>, scalar_prefetch = 0 : i64, scratch_operands = 1 : i64, tpu.core_type = #tpu.core_type<tc>, window_params = [{transform_indices = @transform_0, window_bounds = array<i64: 8, 32>}, {pipeline_mode = #tpu.pipeline_mode<synchronous>, transform_indices = @transform_1, window_bounds = array<i64: 1, 32>}, {pipeline_mode = #tpu.pipeline_mode<synchronous>, transform_indices = @transform_2, window_bounds = array<i64: 1, 32>}, {transform_indices = @transform_3, window_bounds = array<i64: 32, 32>}, {transform_indices = @transform_4, window_bounds = array<i64: 1, 32>}, {transform_indices = @transform_5, window_bounds = array<i64: 8, 32>}]} {
    %c0_i32 = arith.constant 0 : i32
    %0 = arith.cmpi eq, %arg1, %c0_i32 : i32
    %1 = arith.extui %0 : i1 to i32
    %c0_i32_0 = arith.constant 0 : i32
    %2 = arith.cmpi ne, %1, %c0_i32_0 : i32
    scf.if %2 {
      %c0_8 = arith.constant 0 : index
      %c0_9 = arith.constant 0 : index
      %11 = vector.load %arg2[%c0_8, %c0_9] : memref<8x32xbf16, #tpu.memory_space<vmem>>, vector<8x32xbf16>
      %12 = arith.extf %11 : vector<8x32xbf16> to vector<8x32xf32>
      %cst_10 = arith.constant dense<0.000000e+00> : vector<8xf32>
      %13 = vector.multi_reduction <add>, %12, %cst_10 [1] : vector<8x32xf32> to vector<8xf32>
      %14 = vector.shape_cast %13 : vector<8xf32> to vector<8x1xf32>
      %cst_11 = arith.constant 3.200000e+01 : f32
      %15 = vector.broadcast %cst_11 : f32 to vector<8x1xf32>
      %16 = arith.divf %14, %15 : vector<8x1xf32>
      %17 = vector.broadcast %16 : vector<8x1xf32> to vector<8x32xf32>
      %18 = arith.subf %12, %17 : vector<8x32xf32>
      %19 = vector.broadcast %16 : vector<8x1xf32> to vector<8x32xf32>
      %20 = arith.subf %12, %19 : vector<8x32xf32>
      %21 = arith.mulf %18, %20 : vector<8x32xf32>
      %cst_12 = arith.constant dense<0.000000e+00> : vector<8xf32>
      %22 = vector.multi_reduction <add>, %21, %cst_12 [1] : vector<8x32xf32> to vector<8xf32>
      %23 = vector.shape_cast %22 : vector<8xf32> to vector<8x1xf32>
      %cst_13 = arith.constant 3.200000e+01 : f32
      %24 = vector.broadcast %cst_13 : f32 to vector<8x1xf32>
      %25 = arith.divf %23, %24 : vector<8x1xf32>
      %26 = vector.broadcast %16 : vector<8x1xf32> to vector<8x32xf32>
      %27 = arith.subf %12, %26 : vector<8x32xf32>
      %cst_14 = arith.constant 9.99999997E-7 : f32
      %28 = vector.broadcast %cst_14 : f32 to vector<8x1xf32>
      %29 = arith.addf %25, %28 : vector<8x1xf32>
      %30 = math.rsqrt %29 : vector<8x1xf32>
      %31 = vector.broadcast %30 : vector<8x1xf32> to vector<8x32xf32>
      %32 = arith.mulf %27, %31 : vector<8x32xf32>
      %c0_15 = arith.constant 0 : index
      %c0_16 = arith.constant 0 : index
      %33 = vector.load %arg3[%c0_15, %c0_16] : memref<1x32xf32, #tpu.memory_space<vmem>>, vector<1x32xf32>
      %34 = vector.broadcast %33 : vector<1x32xf32> to vector<8x32xf32>
      %35 = arith.mulf %32, %34 : vector<8x32xf32>
      %c0_17 = arith.constant 0 : index
      %c0_18 = arith.constant 0 : index
      %36 = vector.load %arg4[%c0_17, %c0_18] : memref<1x32xf32, #tpu.memory_space<vmem>>, vector<1x32xf32>
      %37 = vector.broadcast %36 : vector<1x32xf32> to vector<8x32xf32>
      %38 = arith.addf %35, %37 : vector<8x32xf32>
      %39 = arith.truncf %38 : vector<8x32xf32> to vector<8x32xbf16>
      %c0_19 = arith.constant 0 : index
      %c0_20 = arith.constant 0 : index
      %40 = vector.load %arg8[%c0_19, %c0_20] : memref<8x32xbf16, #tpu.memory_space<vmem>>, vector<8x32xbf16>
      tpu.vector_store %arg8[%c0_19, %c0_20], %39 {strides = array<i32>} : memref<8x32xbf16, #tpu.memory_space<vmem>>, vector<8x32xbf16>,
    } else {
    }
    %c0 = arith.constant 0 : index
    %c0_1 = arith.constant 0 : index
    %3 = vector.load %arg8[%c0, %c0_1] : memref<8x32xbf16, #tpu.memory_space<vmem>>, vector<8x32xbf16>
    %c0_2 = arith.constant 0 : index
    %c0_3 = arith.constant 0 : index
    %4 = vector.load %arg5[%c0_2, %c0_3] : memref<32x32xbf16, #tpu.memory_space<vmem>>, vector<32x32xbf16>
    %cst = arith.constant dense<0.000000e+00> : vector<8x32xf32>
    %5 = tpu.matmul %3, %4, %cst {dimension_numbers = #tpu.dot_dimension_numbers<[1], [0], [0], [1], [0, 0, 1, 1], [], []>} : vector<8x32xbf16>, vector<32x32xbf16>, vector<8x32xf32> -> vector<8x32xf32>
    %c0_4 = arith.constant 0 : index
    %c0_5 = arith.constant 0 : index
    %6 = vector.load %arg6[%c0_4, %c0_5] : memref<1x32xf32, #tpu.memory_space<vmem>>, vector<1x32xf32>
    %7 = vector.broadcast %6 : vector<1x32xf32> to vector<8x32xf32>
    %8 = arith.addf %5, %7 : vector<8x32xf32>
    %9 = arith.truncf %8 : vector<8x32xf32> to vector<8x32xbf16>
    %c0_6 = arith.constant 0 : index
    %c0_7 = arith.constant 0 : index
    %10 = vector.load %arg7[%c0_6, %c0_7] : memref<8x32xbf16, #tpu.memory_space<vmem>>, vector<8x32xbf16>
    tpu.vector_store %arg7[%c0_6, %c0_7], %9 {strides = array<i32>} : memref<8x32xbf16, #tpu.memory_space<vmem>>, vector<8x32xbf16>,
    return
  }
  func.func @transform_0(%arg0: i32, %arg1: i32) -> (i32, i32) {
    %c0_i32 = arith.constant 0 : i32
    %c0_i32_0 = arith.constant 0 : i32
    return %arg0, %c0_i32 : i32, i32
  }
  func.func @transform_1(%arg0: i32, %arg1: i32) -> (i32, i32) {
    %c0_i32 = arith.constant 0 : i32
    %c0_i32_0 = arith.constant 0 : i32
    %c0_i32_1 = arith.constant 0 : i32
    return %c0_i32, %c0_i32_0 : i32, i32
  }
  func.func @transform_2(%arg0: i32, %arg1: i32) -> (i32, i32) {
    %c0_i32 = arith.constant 0 : i32
    %c0_i32_0 = arith.constant 0 : i32
    %c0_i32_1 = arith.constant 0 : i32
    return %c0_i32, %c0_i32_0 : i32, i32
  }
  func.func @transform_3(%arg0: i32, %arg1: i32) -> (i32, i32) {
    %c0_i32 = arith.constant 0 : i32
    %c0_i32_0 = arith.constant 0 : i32
    return %c0_i32, %arg1 : i32, i32
  }
  func.func @transform_4(%arg0: i32, %arg1: i32) -> (i32, i32) {
    %c0_i32 = arith.constant 0 : i32
    %c0_i32_0 = arith.constant 0 : i32
    return %c0_i32, %arg1 : i32, i32
  }
  func.func @transform_5(%arg0: i32, %arg1: i32) -> (i32, i32) {
    %c0_i32 = arith.constant 0 : i32
    return %arg0, %arg1 : i32, i32
  }
}

module attributes {stable_mosaic.version = 11 : i64} {
  func.func @_rms_matmul_kernel(%arg0: i32, %arg1: i32, %arg2: memref<16x32xbf16, #tpu.memory_space<vmem>>, %arg3: memref<1x32xf32, #tpu.memory_space<vmem>>, %arg4: memref<32x64xbf16, #tpu.memory_space<vmem>>, %arg5: memref<16x64xbf16, #tpu.memory_space<vmem>>, %arg6: memref<16x32xbf16, #tpu.memory_space<vmem>>) attributes {dimension_semantics = [#tpu.dimension_semantics<parallel>, #tpu.dimension_semantics<arbitrary>], iteration_bounds = array<i64: 1, 1>, scalar_prefetch = 0 : i64, scratch_operands = 1 : i64, tpu.core_type = #tpu.core_type<tc>, window_params = [{transform_indices = @transform_0, window_bounds = array<i64: 16, 32>}, {pipeline_mode = #tpu.pipeline_mode<synchronous>, transform_indices = @transform_1, window_bounds = array<i64: 1, 32>}, {transform_indices = @transform_2, window_bounds = array<i64: 32, 64>}, {transform_indices = @transform_3, window_bounds = array<i64: 16, 64>}]} {
    %c0_i32 = arith.constant 0 : i32
    %0 = arith.cmpi eq, %arg1, %c0_i32 : i32
    %1 = arith.extui %0 : i1 to i32
    %c0_i32_0 = arith.constant 0 : i32
    %2 = arith.cmpi ne, %1, %c0_i32_0 : i32
    scf.if %2 {
      %c0_6 = arith.constant 0 : index
      %c0_7 = arith.constant 0 : index
      %8 = vector.load %arg2[%c0_6, %c0_7] : memref<16x32xbf16, #tpu.memory_space<vmem>>, vector<16x32xbf16>
      %9 = arith.extf %8 : vector<16x32xbf16> to vector<16x32xf32>
      %10 = arith.mulf %9, %9 : vector<16x32xf32>
      %cst_8 = arith.constant dense<0.000000e+00> : vector<16xf32>
      %11 = vector.multi_reduction <add>, %10, %cst_8 [1] : vector<16x32xf32> to vector<16xf32>
      %12 = vector.shape_cast %11 : vector<16xf32> to vector<16x1xf32>
      %cst_9 = arith.constant 3.200000e+01 : f32
      %13 = vector.broadcast %cst_9 : f32 to vector<16x1xf32>
      %14 = arith.divf %12, %13 : vector<16x1xf32>
      %cst_10 = arith.constant 9.99999997E-7 : f32
      %15 = vector.broadcast %cst_10 : f32 to vector<16x1xf32>
      %16 = arith.addf %14, %15 : vector<16x1xf32>
      %17 = math.rsqrt %16 : vector<16x1xf32>
      %18 = vector.broadcast %17 : vector<16x1xf32> to vector<16x32xf32>
      %19 = arith.mulf %9, %18 : vector<16x32xf32>
      %c0_11 = arith.constant 0 : index
      %c0_12 = arith.constant 0 : index
      %20 = vector.load %arg3[%c0_11, %c0_12] : memref<1x32xf32, #tpu.memory_space<vmem>>, vector<1x32xf32>
      %cst_13 = arith.constant 1.000000e+00 : f32
      %21 = vector.broadcast %cst_13 : f32 to vector<1x32xf32>
      %22 = arith.addf %21, %20 : vector<1x32xf32>
      %23 = vector.broadcast %22 : vector<1x32xf32> to vector<16x32xf32>
      %24 = arith.mulf %19, %23 : vector<16x32xf32>
      %25 = arith.truncf %24 : vector<16x32xf32> to vector<16x32xbf16>
      %c0_14 = arith.constant 0 : index
      %c0_15 = arith.constant 0 : index
      %26 = vector.load %arg6[%c0_14, %c0_15] : memref<16x32xbf16, #tpu.memory_space<vmem>>, vector<16x32xbf16>
      tpu.vector_store %arg6[%c0_14, %c0_15], %25 {strides = array<i32>} : memref<16x32xbf16, #tpu.memory_space<vmem>>, vector<16x32xbf16>,
    } else {
    }
    %c0 = arith.constant 0 : index
    %c0_1 = arith.constant 0 : index
    %3 = vector.load %arg6[%c0, %c0_1] : memref<16x32xbf16, #tpu.memory_space<vmem>>, vector<16x32xbf16>
    %c0_2 = arith.constant 0 : index
    %c0_3 = arith.constant 0 : index
    %4 = vector.load %arg4[%c0_2, %c0_3] : memref<32x64xbf16, #tpu.memory_space<vmem>>, vector<32x64xbf16>
    %cst = arith.constant dense<0.000000e+00> : vector<16x64xf32>
    %5 = tpu.matmul %3, %4, %cst {dimension_numbers = #tpu.dot_dimension_numbers<[1], [0], [0], [1], [0, 0, 1, 1], [], []>} : vector<16x32xbf16>, vector<32x64xbf16>, vector<16x64xf32> -> vector<16x64xf32>
    %6 = arith.truncf %5 : vector<16x64xf32> to vector<16x64xbf16>
    %c0_4 = arith.constant 0 : index
    %c0_5 = arith.constant 0 : index
    %7 = vector.load %arg5[%c0_4, %c0_5] : memref<16x64xbf16, #tpu.memory_space<vmem>>, vector<16x64xbf16>
    tpu.vector_store %arg5[%c0_4, %c0_5], %6 {strides = array<i32>} : memref<16x64xbf16, #tpu.memory_space<vmem>>, vector<16x64xbf16>,
    return
  }
  func.func @transform_0(%arg0: i32, %arg1: i32) -> (i32, i32) {
    %c0_i32 = arith.constant 0 : i32
    %c0_i32_0 = arith.constant 0 : i32
    return %arg0, %c0_i32 : i32, i32
  }
  func.func @transform_1(%arg0: i32, %arg1: i32) -> (i32, i32) {
    %c0_i32 = arith.constant 0 : i32
    %c0_i32_0 = arith.constant 0 : i32
    %c0_i32_1 = arith.constant 0 : i32
    return %c0_i32, %c0_i32_0 : i32, i32
  }
  func.func @transform_2(%arg0: i32, %arg1: i32) -> (i32, i32) {
    %c0_i32 = arith.constant 0 : i32
    %c0_i32_0 = arith.constant 0 : i32
    return %c0_i32, %arg1 : i32, i32
  }
  func.func @transform_3(%arg0: i32, %arg1: i32) -> (i32, i32) {
    %c0_i32 = arith.constant 0 : i32
    return %arg0, %arg1 : i32, i32
  }
}

module attributes {stable_mosaic.version = 11 : i64} {
  func.func @_attn_oproj_kernel(%arg0: i32, %arg1: memref<1x8x32xbf16, #tpu.memory_space<vmem>>, %arg2: memref<1x8x16xbf16, #tpu.memory_space<vmem>>, %arg3: memref<1x8x16xbf16, #tpu.memory_space<vmem>>, %arg4: memref<32x32xbf16, #tpu.memory_space<vmem>>, %arg5: memref<1x8x32xbf16, #tpu.memory_space<vmem>>, %arg6: memref<1x8x32xbf16, #tpu.memory_space<vmem>>) attributes {dimension_semantics = [#tpu.dimension_semantics<parallel>], iteration_bounds = array<i64: 2>, scalar_prefetch = 0 : i64, scratch_operands = 0 : i64, tpu.core_type = #tpu.core_type<tc>, window_params = [{transform_indices = @transform_0, window_bounds = array<i64: 1, 8, 32>}, {transform_indices = @transform_1, window_bounds = array<i64: 1, 8, 16>}, {transform_indices = @transform_2, window_bounds = array<i64: 1, 8, 16>}, {pipeline_mode = #tpu.pipeline_mode<synchronous>, transform_indices = @transform_3, window_bounds = array<i64: 32, 32>}, {transform_indices = @transform_4, window_bounds = array<i64: 1, 8, 32>}, {transform_indices = @transform_5, window_bounds = array<i64: 1, 8, 32>}]} {
    %cst = arith.constant 0.000000e+00 : f32
    %0 = vector.broadcast %cst : f32 to vector<8x32xf32>
    %c0 = arith.constant 0 : index
    %c0_0 = arith.constant 0 : index
    %c0_1 = arith.constant 0 : index
    %1 = vector.load %arg1[%c0, %c0_0, %c0_1] : memref<1x8x32xbf16, #tpu.memory_space<vmem>>, vector<1x8x8xbf16>
    %2 = vector.shape_cast %1 : vector<1x8x8xbf16> to vector<8x8xbf16>
    %c0_2 = arith.constant 0 : index
    %c0_3 = arith.constant 0 : index
    %c0_4 = arith.constant 0 : index
    %3 = vector.load %arg2[%c0_2, %c0_3, %c0_4] : memref<1x8x16xbf16, #tpu.memory_space<vmem>>, vector<1x8x8xbf16>
    %4 = vector.shape_cast %3 : vector<1x8x8xbf16> to vector<8x8xbf16>
    %c0_5 = arith.constant 0 : index
    %c0_6 = arith.constant 0 : index
    %c0_7 = arith.constant 0 : index
    %5 = vector.load %arg3[%c0_5, %c0_6, %c0_7] : memref<1x8x16xbf16, #tpu.memory_space<vmem>>, vector<1x8x8xbf16>
    %6 = vector.shape_cast %5 : vector<1x8x8xbf16> to vector<8x8xbf16>
    %7 = tpu.transpose %4, [1, 0] : vector<8x8xbf16> -> vector<8x8xbf16>
    %cst_8 = arith.constant dense<0.000000e+00> : vector<8x8xf32>
    %8 = tpu.matmul %2, %7, %cst_8 {dimension_numbers = #tpu.dot_dimension_numbers<[1], [0], [0], [1], [0, 0, 1, 1], [], []>} : vector<8x8xbf16>, vector<8x8xbf16>, vector<8x8xf32> -> vector<8x8xf32>
    %cst_9 = arith.constant 0.353553385 : f32
    %9 = vector.broadcast %cst_9 : f32 to vector<8x8xf32>
    %10 = arith.mulf %8, %9 : vector<8x8xf32>
    %cst_10 = arith.constant dense<0xFF800000> : vector<8xf32>
    %11 = vector.multi_reduction <maximumf>, %10, %cst_10 [1] : vector<8x8xf32> to vector<8xf32>
    %12 = vector.shape_cast %11 : vector<8xf32> to vector<8x1xf32>
    %13 = vector.broadcast %12 : vector<8x1xf32> to vector<8x8xf32>
    %14 = arith.subf %10, %13 : vector<8x8xf32>
    %15 = math.exp %14 : vector<8x8xf32>
    %cst_11 = arith.constant dense<0.000000e+00> : vector<8xf32>
    %16 = vector.multi_reduction <add>, %15, %cst_11 [1] : vector<8x8xf32> to vector<8xf32>
    %17 = vector.shape_cast %16 : vector<8xf32> to vector<8x1xf32>
    %18 = vector.broadcast %17 : vector<8x1xf32> to vector<8x8xf32>
    %19 = arith.divf %15, %18 : vector<8x8xf32>
    %20 = arith.truncf %19 : vector<8x8xf32> to vector<8x8xbf16>
    %cst_12 = arith.constant dense<0.000000e+00> : vector<8x8xf32>
    %21 = tpu.matmul %20, %6, %cst_12 {dimension_numbers = #tpu.dot_dimension_numbers<[1], [0], [0], [1], [0, 0, 1, 1], [], []>} : vector<8x8xbf16>, vector<8x8xbf16>, vector<8x8xf32> -> vector<8x8xf32>
    %22 = arith.truncf %21 : vector<8x8xf32> to vector<8x8xbf16>
    %c0_13 = arith.constant 0 : index
    %c0_14 = arith.constant 0 : index
    %23 = vector.load %arg4[%c0_13, %c0_14] : memref<32x32xbf16, #tpu.memory_space<vmem>>, vector<8x32xbf16>
    %cst_15 = arith.constant dense<0.000000e+00> : vector<8x32xf32>
    %24 = tpu.matmul %22, %23, %cst_15 {dimension_numbers = #tpu.dot_dimension_numbers<[1], [0], [0], [1], [0, 0, 1, 1], [], []>} : vector<8x8xbf16>, vector<8x32xbf16>, vector<8x32xf32> -> vector<8x32xf32>
    %25 = arith.addf %0, %24 : vector<8x32xf32>
    %c0_16 = arith.constant 0 : index
    %c0_17 = arith.constant 0 : index
    %c8 = arith.constant 8 : index
    %26 = vector.load %arg1[%c0_16, %c0_17, %c8] : memref<1x8x32xbf16, #tpu.memory_space<vmem>>, vector<1x8x8xbf16>
    %27 = vector.shape_cast %26 : vector<1x8x8xbf16> to vector<8x8xbf16>
    %c0_18 = arith.constant 0 : index
    %c0_19 = arith.constant 0 : index
    %c0_20 = arith.constant 0 : index
    %28 = vector.load %arg2[%c0_18, %c0_19, %c0_20] : memref<1x8x16xbf16, #tpu.memory_space<vmem>>, vector<1x8x8xbf16>
    %29 = vector.shape_cast %28 : vector<1x8x8xbf16> to vector<8x8xbf16>
    %c0_21 = arith.constant 0 : index
    %c0_22 = arith.constant 0 : index
    %c0_23 = arith.constant 0 : index
    %30 = vector.load %arg3[%c0_21, %c0_22, %c0_23] : memref<1x8x16xbf16, #tpu.memory_space<vmem>>, vector<1x8x8xbf16>
    %31 = vector.shape_cast %30 : vector<1x8x8xbf16> to vector<8x8xbf16>
    %32 = tpu.transpose %29, [1, 0] : vector<8x8xbf16> -> vector<8x8xbf16>
    %cst_24 = arith.constant dense<0.000000e+00> : vector<8x8xf32>
    %33 = tpu.matmul %27, %32, %cst_24 {dimension_numbers = #tpu.dot_dimension_numbers<[1], [0], [0], [1], [0, 0, 1, 1], [], []>} : vector<8x8xbf16>, vector<8x8xbf16>, vector<8x8xf32> -> vector<8x8xf32>
    %cst_25 = arith.constant 0.353553385 : f32
    %34 = vector.broadcast %cst_25 : f32 to vector<8x8xf32>
    %35 = arith.mulf %33, %34 : vector<8x8xf32>
    %cst_26 = arith.constant dense<0xFF800000> : vector<8xf32>
    %36 = vector.multi_reduction <maximumf>, %35, %cst_26 [1] : vector<8x8xf32> to vector<8xf32>
    %37 = vector.shape_cast %36 : vector<8xf32> to vector<8x1xf32>
    %38 = vector.broadcast %37 : vector<8x1xf32> to vector<8x8xf32>
    %39 = arith.subf %35, %38 : vector<8x8xf32>
    %40 = math.exp %39 : vector<8x8xf32>
    %cst_27 = arith.constant dense<0.000000e+00> : vector<8xf32>
    %41 = vector.multi_reduction <add>, %40, %cst_27 [1] : vector<8x8xf32> to vector<8xf32>
    %42 = vector.shape_cast %41 : vector<8xf32> to vector<8x1xf32>
    %43 = vector.broadcast %42 : vector<8x1xf32> to vector<8x8xf32>
    %44 = arith.divf %40, %43 : vector<8x8xf32>
    %45 = arith.truncf %44 : vector<8x8xf32> to vector<8x8xbf16>
    %cst_28 = arith.constant dense<0.000000e+00> : vector<8x8xf32>
    %46 = tpu.matmul %45, %31, %cst_28 {dimension_numbers = #tpu.dot_dimension_numbers<[1], [0], [0], [1], [0, 0, 1, 1], [], []>} : vector<8x8xbf16>, vector<8x8xbf16>, vector<8x8xf32> -> vector<8x8xf32>
    %47 = arith.truncf %46 : vector<8x8xf32> to vector<8x8xbf16>
    %c8_29 = arith.constant 8 : index
    %c0_30 = arith.constant 0 : index
    %48 = vector.load %arg4[%c8_29, %c0_30] : memref<32x32xbf16, #tpu.memory_space<vmem>>, vector<8x32xbf16>
    %cst_31 = arith.constant dense<0.000000e+00> : vector<8x32xf32>
    %49 = tpu.matmul %47, %48, %cst_31 {dimension_numbers = #tpu.dot_dimension_numbers<[1], [0], [0], [1], [0, 0, 1, 1], [], []>} : vector<8x8xbf16>, vector<8x32xbf16>, vector<8x32xf32> -> vector<8x32xf32>
    %50 = arith.addf %25, %49 : vector<8x32xf32>
    %c0_32 = arith.constant 0 : index
    %c0_33 = arith.constant 0 : index
    %c16 = arith.constant 16 : index
    %51 = vector.load %arg1[%c0_32, %c0_33, %c16] : memref<1x8x32xbf16, #tpu.memory_space<vmem>>, vector<1x8x8xbf16>
    %52 = vector.shape_cast %51 : vector<1x8x8xbf16> to vector<8x8xbf16>
    %c0_34 = arith.constant 0 : index
    %c0_35 = arith.constant 0 : index
    %c8_36 = arith.constant 8 : index
    %53 = vector.load %arg2[%c0_34, %c0_35, %c8_36] : memref<1x8x16xbf16, #tpu.memory_space<vmem>>, vector<1x8x8xbf16>
    %54 = vector.shape_cast %53 : vector<1x8x8xbf16> to vector<8x8xbf16>
    %c0_37 = arith.constant 0 : index
    %c0_38 = arith.constant 0 : index
    %c8_39 = arith.constant 8 : index
    %55 = vector.load %arg3[%c0_37, %c0_38, %c8_39] : memref<1x8x16xbf16, #tpu.memory_space<vmem>>, vector<1x8x8xbf16>
    %56 = vector.shape_cast %55 : vector<1x8x8xbf16> to vector<8x8xbf16>
    %57 = tpu.transpose %54, [1, 0] : vector<8x8xbf16> -> vector<8x8xbf16>
    %cst_40 = arith.constant dense<0.000000e+00> : vector<8x8xf32>
    %58 = tpu.matmul %52, %57, %cst_40 {dimension_numbers = #tpu.dot_dimension_numbers<[1], [0], [0], [1], [0, 0, 1, 1], [], []>} : vector<8x8xbf16>, vector<8x8xbf16>, vector<8x8xf32> -> vector<8x8xf32>
    %cst_41 = arith.constant 0.353553385 : f32
    %59 = vector.broadcast %cst_41 : f32 to vector<8x8xf32>
    %60 = arith.mulf %58, %59 : vector<8x8xf32>
    %cst_42 = arith.constant dense<0xFF800000> : vector<8xf32>
    %61 = vector.multi_reduction <maximumf>, %60, %cst_42 [1] : vector<8x8xf32> to vector<8xf32>
    %62 = vector.shape_cast %61 : vector<8xf32> to vector<8x1xf32>
    %63 = vector.broadcast %62 : vector<8x1xf32> to vector<8x8xf32>
    %64 = arith.subf %60, %63 : vector<8x8xf32>
    %65 = math.exp %64 : vector<8x8xf32>
    %cst_43 = arith.constant dense<0.000000e+00> : vector<8xf32>
    %66 = vector.multi_reduction <add>, %65, %cst_43 [1] : vector<8x8xf32> to vector<8xf32>
    %67 = vector.shape_cast %66 : vector<8xf32> to vector<8x1xf32>
    %68 = vector.broadcast %67 : vector<8x1xf32> to vector<8x8xf32>
    %69 = arith.divf %65, %68 : vector<8x8xf32>
    %70 = arith.truncf %69 : vector<8x8xf32> to vector<8x8xbf16>
    %cst_44 = arith.constant dense<0.000000e+00> : vector<8x8xf32>
    %71 = tpu.matmul %70, %56, %cst_44 {dimension_numbers = #tpu.dot_dimension_numbers<[1], [0], [0], [1], [0, 0, 1, 1], [], []>} : vector<8x8xbf16>, vector<8x8xbf16>, vector<8x8xf32> -> vector<8x8xf32>
    %72 = arith.truncf %71 : vector<8x8xf32> to vector<8x8xbf16>
    %c16_45 = arith.constant 16 : index
    %c0_46 = arith.constant 0 : index
    %73 = vector.load %arg4[%c16_45, %c0_46] : memref<32x32xbf16, #tpu.memory_space<vmem>>, vector<8x32xbf16>
    %cst_47 = arith.constant dense<0.000000e+00> : vector<8x32xf32>
    %74 = tpu.matmul %72, %73, %cst_47 {dimension_numbers = #tpu.dot_dimension_numbers<[1], [0], [0], [1], [0, 0, 1, 1], [], []>} : vector<8x8xbf16>, vector<8x32xbf16>, vector<8x32xf32> -> vector<8x32xf32>
    %75 = arith.addf %50, %74 : vector<8x32xf32>
    %c0_48 = arith.constant 0 : index
    %c0_49 = arith.constant 0 : index
    %c24 = arith.constant 24 : index
    %76 = vector.load %arg1[%c0_48, %c0_49, %c24] : memref<1x8x32xbf16, #tpu.memory_space<vmem>>, vector<1x8x8xbf16>
    %77 = vector.shape_cast %76 : vector<1x8x8xbf16> to vector<8x8xbf16>
    %c0_50 = arith.constant 0 : index
    %c0_51 = arith.constant 0 : index
    %c8_52 = arith.constant 8 : index
    %78 = vector.load %arg2[%c0_50, %c0_51, %c8_52] : memref<1x8x16xbf16, #tpu.memory_space<vmem>>, vector<1x8x8xbf16>
    %79 = vector.shape_cast %78 : vector<1x8x8xbf16> to vector<8x8xbf16>
    %c0_53 = arith.constant 0 : index
    %c0_54 = arith.constant 0 : index
    %c8_55 = arith.constant 8 : index
    %80 = vector.load %arg3[%c0_53, %c0_54, %c8_55] : memref<1x8x16xbf16, #tpu.memory_space<vmem>>, vector<1x8x8xbf16>
    %81 = vector.shape_cast %80 : vector<1x8x8xbf16> to vector<8x8xbf16>
    %82 = tpu.transpose %79, [1, 0] : vector<8x8xbf16> -> vector<8x8xbf16>
    %cst_56 = arith.constant dense<0.000000e+00> : vector<8x8xf32>
    %83 = tpu.matmul %77, %82, %cst_56 {dimension_numbers = #tpu.dot_dimension_numbers<[1], [0], [0], [1], [0, 0, 1, 1], [], []>} : vector<8x8xbf16>, vector<8x8xbf16>, vector<8x8xf32> -> vector<8x8xf32>
    %cst_57 = arith.constant 0.353553385 : f32
    %84 = vector.broadcast %cst_57 : f32 to vector<8x8xf32>
    %85 = arith.mulf %83, %84 : vector<8x8xf32>
    %cst_58 = arith.constant dense<0xFF800000> : vector<8xf32>
    %86 = vector.multi_reduction <maximumf>, %85, %cst_58 [1] : vector<8x8xf32> to vector<8xf32>
    %87 = vector.shape_cast %86 : vector<8xf32> to vector<8x1xf32>
    %88 = vector.broadcast %87 : vector<8x1xf32> to vector<8x8xf32>
    %89 = arith.subf %85, %88 : vector<8x8xf32>
    %90 = math.exp %89 : vector<8x8xf32>
    %cst_59 = arith.constant dense<0.000000e+00> : vector<8xf32>
    %91 = vector.multi_reduction <add>, %90, %cst_59 [1] : vector<8x8xf32> to vector<8xf32>
    %92 = vector.shape_cast %91 : vector<8xf32> to vector<8x1xf32>
    %93 = vector.broadcast %92 : vector<8x1xf32> to vector<8x8xf32>
    %94 = arith.divf %90, %93 : vector<8x8xf32>
    %95 = arith.truncf %94 : vector<8x8xf32> to vector<8x8xbf16>
    %cst_60 = arith.constant dense<0.000000e+00> : vector<8x8xf32>
    %96 = tpu.matmul %95, %81, %cst_60 {dimension_numbers = #tpu.dot_dimension_numbers<[1], [0], [0], [1], [0, 0, 1, 1], [], []>} : vector<8x8xbf16>, vector<8x8xbf16>, vector<8x8xf32> -> vector<8x8xf32>
    %97 = arith.truncf %96 : vector<8x8xf32> to vector<8x8xbf16>
    %c24_61 = arith.constant 24 : index
    %c0_62 = arith.constant 0 : index
    %98 = vector.load %arg4[%c24_61, %c0_62] : memref<32x32xbf16, #tpu.memory_space<vmem>>, vector<8x32xbf16>
    %cst_63 = arith.constant dense<0.000000e+00> : vector<8x32xf32>
    %99 = tpu.matmul %97, %98, %cst_63 {dimension_numbers = #tpu.dot_dimension_numbers<[1], [0], [0], [1], [0, 0, 1, 1], [], []>} : vector<8x8xbf16>, vector<8x32xbf16>, vector<8x32xf32> -> vector<8x32xf32>
    %100 = arith.addf %75, %99 : vector<8x32xf32>
    %c0_64 = arith.constant 0 : index
    %c0_65 = arith.constant 0 : index
    %c0_66 = arith.constant 0 : index
    %101 = vector.load %arg5[%c0_64, %c0_65, %c0_66] : memref<1x8x32xbf16, #tpu.memory_space<vmem>>, vector<1x8x32xbf16>
    %102 = vector.shape_cast %101 : vector<1x8x32xbf16> to vector<8x32xbf16>
    %103 = arith.extf %102 : vector<8x32xbf16> to vector<8x32xf32>
    %104 = arith.addf %103, %100 : vector<8x32xf32>
    %105 = arith.truncf %104 : vector<8x32xf32> to vector<8x32xbf16>
    %c0_67 = arith.constant 0 : index
    %c0_68 = arith.constant 0 : index
    %c0_69 = arith.constant 0 : index
    %106 = vector.load %arg6[%c0_67, %c0_68, %c0_69] : memref<1x8x32xbf16, #tpu.memory_space<vmem>>, vector<1x8x32xbf16>
    %107 = vector.shape_cast %106 : vector<1x8x32xbf16> to vector<8x32xbf16>
    %108 = vector.shape_cast %105 : vector<8x32xbf16> to vector<1x8x32xbf16>
    tpu.vector_store %arg6[%c0_67, %c0_68, %c0_69], %108 {strides = array<i32>} : memref<1x8x32xbf16, #tpu.memory_space<vmem>>, vector<1x8x32xbf16>,
    return
  }
  func.func @transform_0(%arg0: i32) -> (i32, i32, i32) {
    %c0_i32 = arith.constant 0 : i32
    %c0_i32_0 = arith.constant 0 : i32
    %c0_i32_1 = arith.constant 0 : i32
    return %arg0, %c0_i32, %c0_i32_0 : i32, i32, i32
  }
  func.func @transform_1(%arg0: i32) -> (i32, i32, i32) {
    %c0_i32 = arith.constant 0 : i32
    %c0_i32_0 = arith.constant 0 : i32
    %c0_i32_1 = arith.constant 0 : i32
    return %arg0, %c0_i32, %c0_i32_0 : i32, i32, i32
  }
  func.func @transform_2(%arg0: i32) -> (i32, i32, i32) {
    %c0_i32 = arith.constant 0 : i32
    %c0_i32_0 = arith.constant 0 : i32
    %c0_i32_1 = arith.constant 0 : i32
    return %arg0, %c0_i32, %c0_i32_0 : i32, i32, i32
  }
  func.func @transform_3(%arg0: i32) -> (i32, i32) {
    %c0_i32 = arith.constant 0 : i32
    %c0_i32_0 = arith.constant 0 : i32
    %c0_i32_1 = arith.constant 0 : i32
    return %c0_i32, %c0_i32_0 : i32, i32
  }
  func.func @transform_4(%arg0: i32) -> (i32, i32, i32) {
    %c0_i32 = arith.constant 0 : i32
    %c0_i32_0 = arith.constant 0 : i32
    %c0_i32_1 = arith.constant 0 : i32
    return %arg0, %c0_i32, %c0_i32_0 : i32, i32, i32
  }
  func.func @transform_5(%arg0: i32) -> (i32, i32, i32) {
    %c0_i32 = arith.constant 0 : i32
    %c0_i32_0 = arith.constant 0 : i32
    %c0_i32_1 = arith.constant 0 : i32
    return %arg0, %c0_i32, %c0_i32_0 : i32, i32, i32
  }
}

module attributes {stable_mosaic.version = 11 : i64} {
  func.func @_rms_matmul_kernel(%arg0: i32, %arg1: i32, %arg2: memref<16x32xbf16, #tpu.memory_space<vmem>>, %arg3: memref<1x32xf32, #tpu.memory_space<vmem>>, %arg4: memref<32x128xbf16, #tpu.memory_space<vmem>>, %arg5: memref<16x128xf32, #tpu.memory_space<vmem>>, %arg6: memref<16x32xbf16, #tpu.memory_space<vmem>>) attributes {dimension_semantics = [#tpu.dimension_semantics<parallel>, #tpu.dimension_semantics<arbitrary>], iteration_bounds = array<i64: 1, 1>, scalar_prefetch = 0 : i64, scratch_operands = 1 : i64, tpu.core_type = #tpu.core_type<tc>, window_params = [{transform_indices = @transform_0, window_bounds = array<i64: 16, 32>}, {pipeline_mode = #tpu.pipeline_mode<synchronous>, transform_indices = @transform_1, window_bounds = array<i64: 1, 32>}, {transform_indices = @transform_2, window_bounds = array<i64: 32, 128>}, {transform_indices = @transform_3, window_bounds = array<i64: 16, 128>}]} {
    %c0_i32 = arith.constant 0 : i32
    %0 = arith.cmpi eq, %arg1, %c0_i32 : i32
    %1 = arith.extui %0 : i1 to i32
    %c0_i32_0 = arith.constant 0 : i32
    %2 = arith.cmpi ne, %1, %c0_i32_0 : i32
    scf.if %2 {
      %c0_6 = arith.constant 0 : index
      %c0_7 = arith.constant 0 : index
      %7 = vector.load %arg2[%c0_6, %c0_7] : memref<16x32xbf16, #tpu.memory_space<vmem>>, vector<16x32xbf16>
      %8 = arith.extf %7 : vector<16x32xbf16> to vector<16x32xf32>
      %9 = arith.mulf %8, %8 : vector<16x32xf32>
      %cst_8 = arith.constant dense<0.000000e+00> : vector<16xf32>
      %10 = vector.multi_reduction <add>, %9, %cst_8 [1] : vector<16x32xf32> to vector<16xf32>
      %11 = vector.shape_cast %10 : vector<16xf32> to vector<16x1xf32>
      %cst_9 = arith.constant 3.200000e+01 : f32
      %12 = vector.broadcast %cst_9 : f32 to vector<16x1xf32>
      %13 = arith.divf %11, %12 : vector<16x1xf32>
      %cst_10 = arith.constant 9.99999997E-7 : f32
      %14 = vector.broadcast %cst_10 : f32 to vector<16x1xf32>
      %15 = arith.addf %13, %14 : vector<16x1xf32>
      %16 = math.rsqrt %15 : vector<16x1xf32>
      %17 = vector.broadcast %16 : vector<16x1xf32> to vector<16x32xf32>
      %18 = arith.mulf %8, %17 : vector<16x32xf32>
      %c0_11 = arith.constant 0 : index
      %c0_12 = arith.constant 0 : index
      %19 = vector.load %arg3[%c0_11, %c0_12] : memref<1x32xf32, #tpu.memory_space<vmem>>, vector<1x32xf32>
      %cst_13 = arith.constant 1.000000e+00 : f32
      %20 = vector.broadcast %cst_13 : f32 to vector<1x32xf32>
      %21 = arith.addf %20, %19 : vector<1x32xf32>
      %22 = vector.broadcast %21 : vector<1x32xf32> to vector<16x32xf32>
      %23 = arith.mulf %18, %22 : vector<16x32xf32>
      %24 = arith.truncf %23 : vector<16x32xf32> to vector<16x32xbf16>
      %c0_14 = arith.constant 0 : index
      %c0_15 = arith.constant 0 : index
      %25 = vector.load %arg6[%c0_14, %c0_15] : memref<16x32xbf16, #tpu.memory_space<vmem>>, vector<16x32xbf16>
      tpu.vector_store %arg6[%c0_14, %c0_15], %24 {strides = array<i32>} : memref<16x32xbf16, #tpu.memory_space<vmem>>, vector<16x32xbf16>,
    } else {
    }
    %c0 = arith.constant 0 : index
    %c0_1 = arith.constant 0 : index
    %3 = vector.load %arg6[%c0, %c0_1] : memref<16x32xbf16, #tpu.memory_space<vmem>>, vector<16x32xbf16>
    %c0_2 = arith.constant 0 : index
    %c0_3 = arith.constant 0 : index
    %4 = vector.load %arg4[%c0_2, %c0_3] : memref<32x128xbf16, #tpu.memory_space<vmem>>, vector<32x128xbf16>
    %cst = arith.constant dense<0.000000e+00> : vector<16x128xf32>
    %5 = tpu.matmul %3, %4, %cst {dimension_numbers = #tpu.dot_dimension_numbers<[1], [0], [0], [1], [0, 0, 1, 1], [], []>} : vector<16x32xbf16>, vector<32x128xbf16>, vector<16x128xf32> -> vector<16x128xf32>
    %c0_4 = arith.constant 0 : index
    %c0_5 = arith.constant 0 : index
    %6 = vector.load %arg5[%c0_4, %c0_5] : memref<16x128xf32, #tpu.memory_space<vmem>>, vector<16x128xf32>
    tpu.vector_store %arg5[%c0_4, %c0_5], %5 {strides = array<i32>} : memref<16x128xf32, #tpu.memory_space<vmem>>, vector<16x128xf32>,
    return
  }
  func.func @transform_0(%arg0: i32, %arg1: i32) -> (i32, i32) {
    %c0_i32 = arith.constant 0 : i32
    %c0_i32_0 = arith.constant 0 : i32
    return %arg0, %c0_i32 : i32, i32
  }
  func.func @transform_1(%arg0: i32, %arg1: i32) -> (i32, i32) {
    %c0_i32 = arith.constant 0 : i32
    %c0_i32_0 = arith.constant 0 : i32
    %c0_i32_1 = arith.constant 0 : i32
    return %c0_i32, %c0_i32_0 : i32, i32
  }
  func.func @transform_2(%arg0: i32, %arg1: i32) -> (i32, i32) {
    %c0_i32 = arith.constant 0 : i32
    %c0_i32_0 = arith.constant 0 : i32
    return %c0_i32, %arg1 : i32, i32
  }
  func.func @transform_3(%arg0: i32, %arg1: i32) -> (i32, i32) {
    %c0_i32 = arith.constant 0 : i32
    return %arg0, %arg1 : i32, i32
  }
}

module attributes {stable_mosaic.version = 11 : i64} {
  func.func @_gemma_mlp_kernel(%arg0: i32, %arg1: i32, %arg2: memref<16x32xbf16, #tpu.memory_space<vmem>>, %arg3: memref<1x32xf32, #tpu.memory_space<vmem>>, %arg4: memref<32x64xbf16, #tpu.memory_space<vmem>>, %arg5: memref<32x64xbf16, #tpu.memory_space<vmem>>, %arg6: memref<64x32xbf16, #tpu.memory_space<vmem>>, %arg7: memref<16x32xbf16, #tpu.memory_space<vmem>>, %arg8: memref<16x32xbf16, #tpu.memory_space<vmem>>, %arg9: memref<16x32xf32, #tpu.memory_space<vmem>>) attributes {dimension_semantics = [#tpu.dimension_semantics<parallel>, #tpu.dimension_semantics<arbitrary>], iteration_bounds = array<i64: 1, 1>, scalar_prefetch = 0 : i64, scratch_operands = 2 : i64, tpu.core_type = #tpu.core_type<tc>, window_params = [{transform_indices = @transform_0, window_bounds = array<i64: 16, 32>}, {pipeline_mode = #tpu.pipeline_mode<synchronous>, transform_indices = @transform_1, window_bounds = array<i64: 1, 32>}, {transform_indices = @transform_2, window_bounds = array<i64: 32, 64>}, {transform_indices = @transform_3, window_bounds = array<i64: 32, 64>}, {transform_indices = @transform_4, window_bounds = array<i64: 64, 32>}, {transform_indices = @transform_5, window_bounds = array<i64: 16, 32>}]} {
    %c0_i32 = arith.constant 0 : i32
    %0 = arith.cmpi eq, %arg1, %c0_i32 : i32
    %1 = arith.extui %0 : i1 to i32
    %c0_i32_0 = arith.constant 0 : i32
    %2 = arith.cmpi ne, %1, %c0_i32_0 : i32
    scf.if %2 {
      %c0_20 = arith.constant 0 : index
      %c0_21 = arith.constant 0 : index
      %31 = vector.load %arg2[%c0_20, %c0_21] : memref<16x32xbf16, #tpu.memory_space<vmem>>, vector<16x32xbf16>
      %32 = arith.extf %31 : vector<16x32xbf16> to vector<16x32xf32>
      %33 = arith.mulf %32, %32 : vector<16x32xf32>
      %cst_22 = arith.constant dense<0.000000e+00> : vector<16xf32>
      %34 = vector.multi_reduction <add>, %33, %cst_22 [1] : vector<16x32xf32> to vector<16xf32>
      %35 = vector.shape_cast %34 : vector<16xf32> to vector<16x1xf32>
      %cst_23 = arith.constant 3.200000e+01 : f32
      %36 = vector.broadcast %cst_23 : f32 to vector<16x1xf32>
      %37 = arith.divf %35, %36 : vector<16x1xf32>
      %cst_24 = arith.constant 9.99999997E-7 : f32
      %38 = vector.broadcast %cst_24 : f32 to vector<16x1xf32>
      %39 = arith.addf %37, %38 : vector<16x1xf32>
      %40 = math.rsqrt %39 : vector<16x1xf32>
      %41 = vector.broadcast %40 : vector<16x1xf32> to vector<16x32xf32>
      %42 = arith.mulf %32, %41 : vector<16x32xf32>
      %c0_25 = arith.constant 0 : index
      %c0_26 = arith.constant 0 : index
      %43 = vector.load %arg3[%c0_25, %c0_26] : memref<1x32xf32, #tpu.memory_space<vmem>>, vector<1x32xf32>
      %cst_27 = arith.constant 1.000000e+00 : f32
      %44 = vector.broadcast %cst_27 : f32 to vector<1x32xf32>
      %45 = arith.addf %44, %43 : vector<1x32xf32>
      %46 = vector.broadcast %45 : vector<1x32xf32> to vector<16x32xf32>
      %47 = arith.mulf %42, %46 : vector<16x32xf32>
      %48 = arith.truncf %47 : vector<16x32xf32> to vector<16x32xbf16>
      %c0_28 = arith.constant 0 : index
      %c0_29 = arith.constant 0 : index
      %49 = vector.load %arg8[%c0_28, %c0_29] : memref<16x32xbf16, #tpu.memory_space<vmem>>, vector<16x32xbf16>
      tpu.vector_store %arg8[%c0_28, %c0_29], %48 {strides = array<i32>} : memref<16x32xbf16, #tpu.memory_space<vmem>>, vector<16x32xbf16>,
      %cst_30 = arith.constant 0.000000e+00 : f32
      %50 = vector.broadcast %cst_30 : f32 to vector<16x32xf32>
      %c0_31 = arith.constant 0 : index
      %c0_32 = arith.constant 0 : index
      %51 = vector.load %arg9[%c0_31, %c0_32] : memref<16x32xf32, #tpu.memory_space<vmem>>, vector<16x32xf32>
      tpu.vector_store %arg9[%c0_31, %c0_32], %50 {strides = array<i32>} : memref<16x32xf32, #tpu.memory_space<vmem>>, vector<16x32xf32>,
    } else {
    }
    %c0 = arith.constant 0 : index
    %c0_1 = arith.constant 0 : index
    %3 = vector.load %arg8[%c0, %c0_1] : memref<16x32xbf16, #tpu.memory_space<vmem>>, vector<16x32xbf16>
    %c0_2 = arith.constant 0 : index
    %c0_3 = arith.constant 0 : index
    %4 = vector.load %arg4[%c0_2, %c0_3] : memref<32x64xbf16, #tpu.memory_space<vmem>>, vector<32x64xbf16>
    %cst = arith.constant dense<0.000000e+00> : vector<16x64xf32>
    %5 = tpu.matmul %3, %4, %cst {dimension_numbers = #tpu.dot_dimension_numbers<[1], [0], [0], [1], [0, 0, 1, 1], [], []>} : vector<16x32xbf16>, vector<32x64xbf16>, vector<16x64xf32> -> vector<16x64xf32>
    %c0_4 = arith.constant 0 : index
    %c0_5 = arith.constant 0 : index
    %6 = vector.load %arg5[%c0_4, %c0_5] : memref<32x64xbf16, #tpu.memory_space<vmem>>, vector<32x64xbf16>
    %cst_6 = arith.constant dense<0.000000e+00> : vector<16x64xf32>
    %7 = tpu.matmul %3, %6, %cst_6 {dimension_numbers = #tpu.dot_dimension_numbers<[1], [0], [0], [1], [0, 0, 1, 1], [], []>} : vector<16x32xbf16>, vector<32x64xbf16>, vector<16x64xf32> -> vector<16x64xf32>
    %8 = arith.mulf %5, %5 : vector<16x64xf32>
    %9 = arith.mulf %5, %8 : vector<16x64xf32>
    %cst_7 = arith.constant 4.471500e-02 : f32
    %10 = vector.broadcast %cst_7 : f32 to vector<16x64xf32>
    %11 = arith.mulf %10, %9 : vector<16x64xf32>
    %12 = arith.addf %5, %11 : vector<16x64xf32>
    %cst_8 = arith.constant 0.797884583 : f32
    %13 = vector.broadcast %cst_8 : f32 to vector<16x64xf32>
    %14 = arith.mulf %13, %12 : vector<16x64xf32>
    %15 = math.tanh %14 : vector<16x64xf32>
    %cst_9 = arith.constant 1.000000e+00 : f32
    %16 = vector.broadcast %cst_9 : f32 to vector<16x64xf32>
    %17 = arith.addf %16, %15 : vector<16x64xf32>
    %cst_10 = arith.constant 5.000000e-01 : f32
    %18 = vector.broadcast %cst_10 : f32 to vector<16x64xf32>
    %19 = arith.mulf %18, %17 : vector<16x64xf32>
    %20 = arith.mulf %5, %19 : vector<16x64xf32>
    %21 = arith.mulf %20, %7 : vector<16x64xf32>
    %22 = arith.truncf %21 : vector<16x64xf32> to vector<16x64xbf16>
    %c0_11 = arith.constant 0 : index
    %c0_12 = arith.constant 0 : index
    %23 = vector.load %arg9[%c0_11, %c0_12] : memref<16x32xf32, #tpu.memory_space<vmem>>, vector<16x32xf32>
    %c0_13 = arith.constant 0 : index
    %c0_14 = arith.constant 0 : index
    %24 = vector.load %arg6[%c0_13, %c0_14] : memref<64x32xbf16, #tpu.memory_space<vmem>>, vector<64x32xbf16>
    %cst_15 = arith.constant dense<0.000000e+00> : vector<16x32xf32>
    %25 = tpu.matmul %22, %24, %cst_15 {dimension_numbers = #tpu.dot_dimension_numbers<[1], [0], [0], [1], [0, 0, 1, 1], [], []>} : vector<16x64xbf16>, vector<64x32xbf16>, vector<16x32xf32> -> vector<16x32xf32>
    %26 = arith.addf %23, %25 : vector<16x32xf32>
    %c0_16 = arith.constant 0 : index
    %c0_17 = arith.constant 0 : index
    %27 = vector.load %arg9[%c0_16, %c0_17] : memref<16x32xf32, #tpu.memory_space<vmem>>, vector<16x32xf32>
    tpu.vector_store %arg9[%c0_16, %c0_17], %26 {strides = array<i32>} : memref<16x32xf32, #tpu.memory_space<vmem>>, vector<16x32xf32>,
    %c0_i32_18 = arith.constant 0 : i32
    %28 = arith.cmpi eq, %arg1, %c0_i32_18 : i32
    %29 = arith.extui %28 : i1 to i32
    %c0_i32_19 = arith.constant 0 : i32
    %30 = arith.cmpi ne, %29, %c0_i32_19 : i32
    scf.if %30 {
      %c0_20 = arith.constant 0 : index
      %c0_21 = arith.constant 0 : index
      %31 = vector.load %arg2[%c0_20, %c0_21] : memref<16x32xbf16, #tpu.memory_space<vmem>>, vector<16x32xbf16>
      %32 = arith.extf %31 : vector<16x32xbf16> to vector<16x32xf32>
      %c0_22 = arith.constant 0 : index
      %c0_23 = arith.constant 0 : index
      %33 = vector.load %arg9[%c0_22, %c0_23] : memref<16x32xf32, #tpu.memory_space<vmem>>, vector<16x32xf32>
      %34 = arith.addf %32, %33 : vector<16x32xf32>
      %35 = arith.truncf %34 : vector<16x32xf32> to vector<16x32xbf16>
      %c0_24 = arith.constant 0 : index
      %c0_25 = arith.constant 0 : index
      %36 = vector.load %arg7[%c0_24, %c0_25] : memref<16x32xbf16, #tpu.memory_space<vmem>>, vector<16x32xbf16>
      tpu.vector_store %arg7[%c0_24, %c0_25], %35 {strides = array<i32>} : memref<16x32xbf16, #tpu.memory_space<vmem>>, vector<16x32xbf16>,
    } else {
    }
    return
  }
  func.func @transform_0(%arg0: i32, %arg1: i32) -> (i32, i32) {
    %c0_i32 = arith.constant 0 : i32
    %c0_i32_0 = arith.constant 0 : i32
    return %arg0, %c0_i32 : i32, i32
  }
  func.func @transform_1(%arg0: i32, %arg1: i32) -> (i32, i32) {
    %c0_i32 = arith.constant 0 : i32
    %c0_i32_0 = arith.constant 0 : i32
    %c0_i32_1 = arith.constant 0 : i32
    return %c0_i32, %c0_i32_0 : i32, i32
  }
  func.func @transform_2(%arg0: i32, %arg1: i32) -> (i32, i32) {
    %c0_i32 = arith.constant 0 : i32
    %c0_i32_0 = arith.constant 0 : i32
    return %c0_i32, %arg1 : i32, i32
  }
  func.func @transform_3(%arg0: i32, %arg1: i32) -> (i32, i32) {
    %c0_i32 = arith.constant 0 : i32
    %c0_i32_0 = arith.constant 0 : i32
    return %c0_i32, %arg1 : i32, i32
  }
  func.func @transform_4(%arg0: i32, %arg1: i32) -> (i32, i32) {
    %c0_i32 = arith.constant 0 : i32
    %c0_i32_0 = arith.constant 0 : i32
    return %arg1, %c0_i32 : i32, i32
  }
  func.func @transform_5(%arg0: i32, %arg1: i32) -> (i32, i32) {
    %c0_i32 = arith.constant 0 : i32
    %c0_i32_0 = arith.constant 0 : i32
    return %arg0, %c0_i32 : i32, i32
  }
}

</mosaic_0001>

<bundles_post_ra>
// kernel: paligemma_forward.15
= control target key start
LH: loop header
LB: loop body
LE: loop exit
PB: predicated region body
PF: predicated region fallthrough
CT: control target
= control target key end

     0   :  { %vm125_vm0 = vcmask 523264   ;;  %vm19_vm1 = vcmask 261120   ;;  %v237_v17 = vmov 0.0   ;;  %vm168_vm2 = vcmask 257024   ;;  %s303_s1 = inlined_call_operand.vmem [shape: bf16[192,32], index: 1, kind: input, shape index: {}]   ;;  %s304_s0 = inlined_call_operand.vmem [shape: bf16[8,192], index: 0, kind: input, shape index: {}]   ;;  %s305_s2 = inlined_call_operand.vmem [shape: f32[1,32], index: 2, kind: input, shape index: {}]   ;;  %s306_s3 = inlined_call_operand.vmem [shape: bf16[8,32], index: 3, kind: output, shape index: {}]  }
   0x1   :  { %v230_v0 = vld [vmem:[%s303_s1 + $0x38] sm:$0xff]  ;;  %v229_v2 = vld [vmem:[%s303_s1 + $0x30] sm:$0xff]  ;;  %v228_v4 = vld [vmem:[%s303_s1 + $0x28] sm:$0xff]  ;;  %20 = vst.msk [vmem:[#allocation2] sm:$0xff] %vm19_vm1, %v237_v17 }
   0x2   :  { %v234_v1 = vld [vmem:[%s303_s1 + $0x58] sm:$0xff]  ;;  %129 = vmatpush.bf16.msra.mxu0 %v230_v0  ;;  %v233_v3 = vld [vmem:[%s303_s1 + $0x50] sm:$0xff]  ;;  %v232_v5 = vld [vmem:[%s303_s1 + $0x48] sm:$0xff] }
   0x3   :  { %146 = vmatpush.bf16.msra.mxu1 %v234_v1  ;;  %v22_v6 = vld [vmem:[%s304_s0] sm:$0xff]  ;;  %v226_v10 = vld [vmem:[%s303_s1 + $0x18] sm:$0xff]  ;;  %v225_v12 = vld [vmem:[%s303_s1 + $0x10] sm:$0xff] }
   0x4   :  { %v227_v7 = vld [vmem:[%s303_s1 + $0x20] sm:$0xff]  ;;  %v49_v8 = vunpack.c.h.b16 %v22_v6  ;;  %v224_v13 = vld [vmem:[%s303_s1 + $0x8] sm:$0xff]  ;;  %v48_v14 = vunpack.c.l.b16 %v22_v6 }
   0x5   :  { %v231_v9 = vld [vmem:[%s303_s1 + $0x40] sm:$0xff] }
   0x6   :  { %130 = vmatpush.bf16.msra.mxu0 %v229_v2  ;;  %v51_v11 = vpack.c.b16 %v49_v8, %v49_v8  ;;  %v223_v15 = vld [vmem:[%s303_s1] sm:$0xff]  ;;  %v50_v16 = vpack.c.b16 %v48_v14, %v48_v14 }
   0x7   :  { %147 = vmatpush.bf16.msra.mxu1 %v233_v3  ;;  %v236_v25 = vld [vmem:[%s305_s2] ss:$0 sm:$0xff] }
   0x8   :  { %v21_v20 = vld [vmem:[#allocation2] sm:$0xff] }
   0xa   :  { %131 = vmatpush.bf16.msra.mxu0 %v228_v4 }
   0xb   :  { %148 = vmatpush.bf16.msra.mxu1 %v232_v5 }
   0xe   :  { %132 = vmatpush.bf16.msra.mxu0 %v227_v7 }
   0xf   :  { %149 = vmatpush.bf16.msra.mxu1 %v231_v9 }
  0x12   :  { %133 = vmatpush.bf16.msra.mxu0 %v226_v10  ;;  %222 = vmatmul.msk.bf16.vlgmr.msra.gmra.mxu1 %vm125_vm0, %v51_v11 }
  0x16   :  { %134 = vmatpush.bf16.msra.mxu0 %v225_v12 }
  0x1a   :  { %135 = vmatpush.bf16.msra.mxu0 %v224_v13 }
  0x1e   :  { %136 = vmatpush.bf16.msra.mxu0 %v223_v15 }
  0x21   :  { %137 = vmatmul.bf16.vlgmr.msra.gmra.mxu0 %v50_v16 }
  0x8f   :  { %v151_v18 = vpop.f32.mrf.mxu1 }
  0x97   :  { %v153_v19 = vpop.f32.mrf.mxu1 }
  0x9e   :  { %v138_v21 = vpop.f32.mrf.mxu0 }
  0x9f   :  { %v152_v22 = vadd.f32 %v151_v18, %v138_v21 }
  0xa1   :  { %v155_v23 = vadd.f32 %v152_v22, %v21_v20 }
  0xa3   :  { %157 = vst.msk [vmem:[#allocation2] sm:$0xff] %vm19_vm1, %v155_v23 }
  0xa6   :  { %v140_v24 = vpop.f32.mrf.mxu0 }
  0xaa   :  { %v161_v26 = vld [vmem:[#allocation2] sm:$0xff] }
  0xab   :  { %v166_v27 = vadd.f32 %v236_v25, %v161_v26 }
  0xad   :  { %v167_v28 = vpack.c.bf16 %v166_v27, %v166_v27 }
  0xaf   :  { %169 = vst.msk [vmem:[%s306_s3] sm:$0xf] %vm168_vm2, %v167_v28 }

// kernel: paligemma_forward.16
= control target key start
LH: loop header
LB: loop body
LE: loop exit
PB: predicated region body
PF: predicated region fallthrough
CT: control target
= control target key end

     0   :  { %vm27_vm0 = vcmask 261120   ;;  %v134_v3 = vmov 32.0   ;;  %vm68_vm5 = vcmask 257024   ;;  %vm109_vm6 = vcmask 781312   ;;  %s189_s0 = inlined_call_operand.vmem [shape: bf16[8,32], index: 0, kind: input, shape index: {}]   ;;  %s190_s1 = inlined_call_operand.vmem [shape: f32[1,32], index: 1, kind: input, shape index: {}]   ;;  %s191_s2 = inlined_call_operand.vmem [shape: f32[1,32], index: 2, kind: input, shape index: {}]   ;;  %s192_s4 = inlined_call_operand.vmem [shape: f32[1,96], index: 4, kind: input, shape index: {}]   ;;  %s193_s3 = inlined_call_operand.vmem [shape: bf16[32,96], index: 3, kind: input, shape index: {}]   ;;  %s194_s5 = inlined_call_operand.vmem [shape: bf16[8,96], index: 5, kind: output, shape index: {}]  }
   0x1   :  { %v25_v0 = vld [vmem:[%s189_s0] sm:$0xf]  ;;  %130 = vrcp.f32 %v134_v3  ;;  %v125_v15 = vld [vmem:[%s193_s3 + $0x8] sm:$0xff] }
   0x2   :  { %v26_v1 = vunpack.c.l.bf16 %v25_v0  ;;  %101 = vmatpush.bf16.msra.mxu0 %v125_v15  ;;  %v124_v17 = vld [vmem:[%s193_s3] sm:$0xff] }
   0x3   :  { %v127_v26 = vld [vmem:[%s190_s1] ss:$0 sm:$0xff] }
   0x4   :  { %v28_v2 = vsel %vm27_vm0, %v26_v1, 0.0  ;;  %v128_v28 = vld [vmem:[%s191_s2] ss:$0 sm:$0xff] }
   0x5   :  { %29 = vadd.xlane.f32.xlu0 %v28_v2  ;;  %v129_v34 = vld [vmem:[%s192_s4] ss:$0 sm:$0xff] }
   0x6   :  { %102 = vmatpush.bf16.msra.mxu0 %v124_v17 }
   0x7   :  { %v131_v4 = vpop.eup %130 }
   0x8   :  { %v32_v5 = vmul.f32 32.0, %v131_v4  ;;  %vm36_vm1 = vweird.f32 %v131_v4 }
   0xa   :  { %v33_v6 = vsub.f32 1.0, %v32_v5 }
   0xc   :  { %v34_v7 = vmul.f32 %v131_v4, %v33_v6 }
   0xe   :  { %v35_v8 = vadd.f32 %v131_v4, %v34_v7 }
  0x10   :  { %v37_v9 = vsel %vm36_vm1, %v131_v4, %v35_v8 }
  0x78   :  { %v30_v10 = vpop.xlane.xlu0 %29 }
  0x79   :  { %v38_v11 = vmul.f32 %v37_v9, %v30_v10 }
  0x7b   :  { %v39_v12 = vsub.f32 %v26_v1, %v38_v11 }
  0x7d   :  { %v40_v13 = vmul.f32 %v39_v12, %v39_v12 }
  0x7f   :  { %v41_v14 = vsel %vm27_vm0, %v40_v13, 0.0 }
  0x80   :  { %42 = vadd.xlane.f32.xlu0 %v41_v14 }
  0xf3   :  { %v43_v16 = vpop.xlane.xlu0 %42 }
  0xf4   :  { %v44_v18 = vmul.f32 %v43_v16, %v37_v9 }
  0xf6   :  { %v45_v19 = vadd.f32 1e-06, %v44_v18 }
  0xf8   :  { %132 = vrsqrt.f32 %v45_v19  ;;  %vm52_vm3 = vweird.f32 %v45_v19 }
  0xfe   :  { %v133_v20 = vpop.eup %132 }
  0xff   :  { %v47_v21 = vmul.f32 %v133_v20, %v45_v19  ;;  %vm53_vm2 = vweird.f32 %v133_v20 }
 0x100   :  { %vm54_vm4 = vmor %vm52_vm3, %vm53_vm2 }
 0x101   :  { %v48_v22 = vmul.f32 %v133_v20, %v47_v21 }
 0x103   :  { %v49_v23 = vmul.f32 0.5, %v48_v22 }
 0x105   :  { %v50_v24 = vsub.f32 1.5, %v49_v23 }
 0x107   :  { %v51_v25 = vmul.f32 %v133_v20, %v50_v24 }
 0x109   :  { %v55_v27 = vsel %vm54_vm4, %v133_v20, %v51_v25 }
 0x10a   :  { %v56_v29 = vmul.f32 %v55_v27, %v39_v12 }
 0x10c   :  { %v61_v30 = vmul.f32 %v127_v26, %v56_v29 }
 0x10e   :  { %v66_v31 = vadd.f32 %v128_v28, %v61_v30 }
 0x110   :  { %v67_v32 = vpack.c.bf16 %v66_v31, %v66_v31 }
 0x112   :  { %69 = vst.msk [vmem:[#allocation2] sm:$0xf] %vm68_vm5, %v67_v32 }
 0x119   :  { %v70_v33 = vld [vmem:[#allocation2] sm:$0xf] }
 0x11a   :  { %123 = vmatmul.msk.bf16.vlgmr.msra.gmra.mxu0 %vm27_vm0, %v70_v33 }
 0x197   :  { %v104_v35 = vpop.f32.mrf.mxu0 }
 0x198   :  { %v105_v36 = vadd.f32 %v129_v34, %v104_v35 }
 0x19a   :  { %v108_v37 = vpack.c.bf16 %v105_v36, %v105_v36 }
 0x19c   :  { %110 = vst.msk [vmem:[%s194_s5] sm:$0xf] %vm109_vm6, %v108_v37 }
 0x19f   :  { %v106_v38 = vpop.f32.mrf.mxu0 }

// kernel: paligemma_forward.18
= control target key start
LH: loop header
LB: loop body
LE: loop exit
PB: predicated region body
PF: predicated region fallthrough
CT: control target
= control target key end

     0   :  { %vm33_vm0 = vcmask 261120   ;;  %v240_v3 = vmov 32.0   ;;  %vm74_vm5 = vcmask 257024   ;;  %v241_v39 = vmov 0.0   ;;  %s328_s0 = inlined_call_operand.vmem [shape: bf16[8,32], index: 0, kind: input, shape index: {}]   ;;  %s329_s1 = inlined_call_operand.vmem [shape: f32[1,32], index: 1, kind: input, shape index: {}]   ;;  %s330_s2 = inlined_call_operand.vmem [shape: f32[1,32], index: 2, kind: input, shape index: {}]   ;;  %s331_s4 = inlined_call_operand.vmem [shape: f32[1,64], index: 4, kind: input, shape index: {}]   ;;  %s332_s3 = inlined_call_operand.vmem [shape: bf16[32,64], index: 3, kind: input, shape index: {}]   ;;  %s333_s6 = inlined_call_operand.vmem [shape: f32[1,32], index: 6, kind: input, shape index: {}]   ;;  %s334_s5 = inlined_call_operand.vmem [shape: bf16[64,32], index: 5, kind: input, shape index: {}]   ;;  %s335_s7 = inlined_call_operand.vmem [shape: bf16[8,32], index: 7, kind: output, shape index: {}]  }
   0x1   :  { %v31_v0 = vld [vmem:[%s328_s0] sm:$0xf]  ;;  %234 = vrcp.f32 %v240_v3  ;;  %v223_v15 = vld [vmem:[%s332_s3 + $0x8] sm:$0xff]  ;;  %v227_v34 = vld [vmem:[%s334_s5 + $0x18] sm:$0xff]  ;;  %76 = vst.msk [vmem:[#allocation3] sm:$0xff] %vm33_vm0, %v241_v39  ;;  %vm158_vm6 = vcmask 523264  }
   0x2   :  { %v32_v1 = vunpack.c.l.bf16 %v31_v0  ;;  %108 = vmatpush.bf16.msra.mxu0 %v223_v15  ;;  %v222_v17 = vld [vmem:[%s332_s3] sm:$0xff]  ;;  %166 = vmatpush.bf16.msra.mxu1 %v227_v34  ;;  %v226_v35 = vld [vmem:[%s334_s5 + $0x10] sm:$0xff]  ;;  %v225_v36 = vld [vmem:[%s334_s5 + $0x8] sm:$0xff] }
   0x3   :  { %v230_v26 = vld [vmem:[%s329_s1] ss:$0 sm:$0xff] }
   0x4   :  { %v34_v2 = vsel %vm33_vm0, %v32_v1, 0.0  ;;  %v231_v28 = vld [vmem:[%s330_s2] ss:$0 sm:$0xff] }
   0x5   :  { %35 = vadd.xlane.f32.xlu0 %v34_v2  ;;  %v224_v37 = vld [vmem:[%s334_s5] sm:$0xff] }
   0x6   :  { %109 = vmatpush.bf16.msra.mxu0 %v222_v17  ;;  %167 = vmatpush.bf16.msra.mxu1 %v226_v35  ;;  %v232_v38 = vld [vmem:[%s331_s4] ss:$0 sm:$0xff] }
   0x7   :  { %v235_v4 = vpop.eup %234  ;;  %v180_v56 = vld [vmem:[%s328_s0] sm:$0xf] }
   0x8   :  { %v38_v5 = vmul.f32 32.0, %v235_v4  ;;  %vm42_vm1 = vweird.f32 %v235_v4  ;;  %v125_v53 = vld [vmem:[#allocation3] sm:$0xff]  ;;  %v181_v57 = vunpack.c.l.bf16 %v180_v56  ;;  %v233_v59 = vld [vmem:[%s333_s6] ss:$0 sm:$0xff] }
   0xa   :  { %v39_v6 = vsub.f32 1.0, %v38_v5  ;;  %168 = vmatpush.bf16.msra.mxu1 %v225_v36 }
   0xc   :  { %v40_v7 = vmul.f32 %v235_v4, %v39_v6 }
   0xe   :  { %v41_v8 = vadd.f32 %v235_v4, %v40_v7  ;;  %169 = vmatpush.bf16.msra.mxu1 %v224_v37 }
  0x10   :  { %v43_v9 = vsel %vm42_vm1, %v235_v4, %v41_v8 }
  0x78   :  { %v36_v10 = vpop.xlane.xlu0 %35 }
  0x79   :  { %v44_v11 = vmul.f32 %v43_v9, %v36_v10 }
  0x7b   :  { %v45_v12 = vsub.f32 %v32_v1, %v44_v11 }
  0x7d   :  { %v46_v13 = vmul.f32 %v45_v12, %v45_v12 }
  0x7f   :  { %v47_v14 = vsel %vm33_vm0, %v46_v13, 0.0 }
  0x80   :  { %48 = vadd.xlane.f32.xlu0 %v47_v14 }
  0xf3   :  { %v49_v16 = vpop.xlane.xlu0 %48 }
  0xf4   :  { %v50_v18 = vmul.f32 %v49_v16, %v43_v9 }
  0xf6   :  { %v51_v19 = vadd.f32 1e-06, %v50_v18 }
  0xf8   :  { %236 = vrsqrt.f32 %v51_v19  ;;  %vm58_vm3 = vweird.f32 %v51_v19 }
  0xfe   :  { %v237_v20 = vpop.eup %236 }
  0xff   :  { %v53_v21 = vmul.f32 %v237_v20, %v51_v19  ;;  %vm59_vm2 = vweird.f32 %v237_v20 }
 0x100   :  { %vm60_vm4 = vmor %vm58_vm3, %vm59_vm2 }
 0x101   :  { %v54_v22 = vmul.f32 %v237_v20, %v53_v21 }
 0x103   :  { %v55_v23 = vmul.f32 0.5, %v54_v22 }
 0x105   :  { %v56_v24 = vsub.f32 1.5, %v55_v23 }
 0x107   :  { %v57_v25 = vmul.f32 %v237_v20, %v56_v24 }
 0x109   :  { %v61_v27 = vsel %vm60_vm4, %v237_v20, %v57_v25 }
 0x10a   :  { %v62_v29 = vmul.f32 %v61_v27, %v45_v12 }
 0x10c   :  { %v67_v30 = vmul.f32 %v230_v26, %v62_v29 }
 0x10e   :  { %v72_v31 = vadd.f32 %v231_v28, %v67_v30 }
 0x110   :  { %v73_v32 = vpack.c.bf16 %v72_v31, %v72_v31 }
 0x112   :  { %75 = vst.msk [vmem:[#allocation2] sm:$0xf] %vm74_vm5, %v73_v32 }
 0x119   :  { %v77_v33 = vld [vmem:[#allocation2] sm:$0xf] }
 0x11a   :  { %204 = vmatmul.msk.bf16.vlgmr.msra.gmra.mxu0 %vm33_vm0, %v77_v33 }
 0x197   :  { %v111_v40 = vpop.f32.mrf.mxu0 }
 0x198   :  { %v112_v41 = vadd.f32 %v232_v38, %v111_v40 }
 0x19a   :  { %v115_v42 = vmul.f32 %v112_v41, %v112_v41 }
 0x19c   :  { %v116_v43 = vmul.f32 %v115_v42, %v112_v41 }
 0x19e   :  { %v117_v44 = vmul.f32 0.044715, %v116_v43 }
 0x19f   :  { %v113_v45 = vpop.f32.mrf.mxu0 }
 0x1a0   :  { %v118_v46 = vadd.f32 %v117_v44, %v112_v41 }
 0x1a2   :  { %v119_v47 = vmul.f32 0.7978846, %v118_v46 }
 0x1a4   :  { %238 = vtanh.f32 %v119_v47 }
 0x1aa   :  { %v239_v48 = vpop.eup %238 }
 0x1ab   :  { %v121_v49 = vadd.f32 1.0, %v239_v48 }
 0x1ad   :  { %v122_v50 = vmul.f32 0.5, %v121_v49 }
 0x1af   :  { %v123_v51 = vmul.f32 %v122_v50, %v112_v41 }
 0x1b1   :  { %v124_v52 = vpack.c.bf16 %v123_v51, %v123_v51 }
 0x1b3   :  { %221 = vmatmul.msk.bf16.vlgmr.msra.gmra.mxu1 %vm158_vm6, %v124_v52 }
 0x230   :  { %v171_v54 = vpop.f32.mrf.mxu1 }
 0x231   :  { %v175_v55 = vadd.f32 %v171_v54, %v125_v53 }
 0x233   :  { %176 = vst.msk [vmem:[#allocation3] sm:$0xff] %vm33_vm0, %v175_v55 }
 0x238   :  { %v173_v58 = vpop.f32.mrf.mxu1 }
 0x23a   :  { %v182_v60 = vld [vmem:[#allocation3] sm:$0xff] }
 0x23b   :  { %v183_v61 = vadd.f32 %v182_v60, %v181_v57 }
 0x23d   :  { %v188_v62 = vadd.f32 %v233_v59, %v183_v61 }
 0x23f   :  { %v189_v63 = vpack.c.bf16 %v188_v62, %v188_v62 }
 0x241   :  { %191 = vst.msk [vmem:[%s335_s7] sm:$0xf] %vm74_vm5, %v189_v63 }

// kernel: paligemma_forward.17
= control target key start
LH: loop header
LB: loop body
LE: loop exit
PB: predicated region body
PF: predicated region fallthrough
CT: control target
= control target key end

     0   :  { %s904_s21 = smov 0   ;;  %s1017_s0 = inlined_call_operand.vmem [shape: bf16[2,4,32], index: 0, kind: input, shape index: {}]   ;;  %s1018_s1 = inlined_call_operand.vmem [shape: bf16[2,4,32], index: 1, kind: input, shape index: {}]   ;;  %s1019_s2 = inlined_call_operand.vmem [shape: bf16[2,4,32], index: 2, kind: input, shape index: {}]   ;;  %s1020_s3 = inlined_call_operand.vmem [shape: bf16[32,32], index: 3, kind: input, shape index: {}]   ;;  %s1021_s4 = inlined_call_operand.vmem [shape: f32[1,32], index: 4, kind: input, shape index: {}]   ;;  %s1022_s5 = inlined_call_operand.vmem [shape: bf16[2,4,32], index: 5, kind: input, shape index: {}]   ;;  %s1023_s6 = inlined_call_operand.vmem [shape: bf16[2,4,32], index: 6, kind: output, shape index: {}]  }
   0x1 LB: > { %s806_s22 = sadd.s32 4294967295, %s864_s21   ;;  %p810_p0 = scmp.ge.s32.totalorder %s864_s21, 1  ;;  %s864_s21 = sphi %s904_s21, %s16_s21  }
   0x2   : > { %p238_p1 = scmp.lt.s32.totalorder %s864_s21, 3 }
   0x4   : > { %p239_p2 = pnand %p810_p0, %p238_p1 }
   0x5   : > { %p278_p3 = scmp.lt.s32.totalorder (!%p239_p2), %s806_s22, 1  ;;  %s866_s30 = smov (!%p239_p2), 120  }
   0x6   : > { %242 = sbr.rel (%p239_p2) target bundleno = 1256 (0x4e8), region = 44  ;;  %s867_s10 = smov (!%p239_p2), 104  }
   0x7   : > { %s868_s11 = smov (!%p239_p2), 112  }
   0xb   : > { %s1025_s22 = smov (!%p278_p3, %s806_s22), 1  ;;  %vm302_vm0 = vcmask 64512   ;;  %vm323_vm1 = vcmask 27648   ;;  %vm353_vm2 = vcmask 1041408   ;;  %vm349_vm7 = vcmask 31744  }
   0xc   : > { %s912_s23 = sshll.u32 %s1025_s22, 1  ;;  %v371_v55 = vld [vmem:[%s1020_s3] sm:$0xf]  ;;  %vm456_vm8 = vcmask 1043456  }
   0xd   : > { %s918_s26 = scalar_lea.vmem %s1018_s1, %s912_s23  ;;  %s924_s29 = scalar_lea.vmem %s1017_s0, %s912_s23  ;;  %v477_v56 = vsel %vm456_vm8, %v371_v55, 0 }
   0xe   : > { %v300_v0 = vld [vmem:[%s918_s26] sm:$0x3]  ;;  %s941_s9 = scalar_lea.vmem %s1019_s2, %s912_s23  ;;  %s293_s24 = scalar_lea.vmem %s1022_s5, %s912_s23 }
   0xf   : > { %v307_v1 = vsel %vm302_vm0, %v300_v0, 0  ;;  %v299_v2 = vld [vmem:[%s924_s29] sm:$0x3] }
  0x10   : > { %316 = vmatpush.bf16.xpose.msra.mxu0 %v307_v1  ;;  %372 = vst [vmem:[#allocation1] ss:$4 sm:$0xff] %v299_v2  ;;  %v301_v21 = vld [vmem:[%s941_s9] sm:$0x3] }
  0x11   : > { %v492_v22 = vld [vmem:[%s924_s29] sm:$0x3]  ;;  %v355_v28 = vsel %vm353_vm2, %v301_v21, 0 }
  0x12   : > { %v493_v24 = vld [vmem:[%s918_s26] sm:$0x3]  ;;  %364 = vmatpush.bf16.msra.mxu1 %v355_v28 }
  0x13   : > { %v494_v26 = vld [vmem:[%s941_s9] sm:$0x3] }
  0x14   : > { %v599_v29 = vld [vmem:[%s924_s29] sm:$0x3]  ;;  %s297_s29 = scalar_lea.vmem %s1023_s6, %s912_s23 }
  0x15   : > { %v600_v31 = vld [vmem:[%s918_s26] sm:$0x3] }
  0x16   : > { %v601_v43 = vld [vmem:[%s941_s9] sm:$0x3] }
  0x17   : > { %816 = vmatmul.msk.bf16.vlgmr.msra.gmra.mxu0 %vm302_vm0, %v299_v2  ;;  %v373_v3 = vld.sshfl [vmem:[#allocation1] sm:$0xff pattern:$0x73625140] }
  0x18   : > { %377 = vst [vmem:[#allocation1] ss:$4 sm:$0xff] %v300_v0 }
  0x1f   : > { %v378_v4 = vld.sshfl [vmem:[#allocation1] sm:$0xff pattern:$0x73625140] }
  0x20   : > { %380 = vrot.lane.b32.xlu0 %v378_v4, %s866_s30  ;;  %427 = vst [vmem:[#allocation1] ss:$4 sm:$0xff] %v301_v21 }
  0x27   : > { %v428_v23 = vld.sshfl [vmem:[#allocation1] sm:$0xff pattern:$0x73625140] }
  0x28   : > { %375 = vrot.lane.b32.xlu0 %v373_v3, %s866_s30  ;;  %496 = vst [vmem:[#allocation1] ss:$4 sm:$0xff] %v492_v22 }
  0x2f   : > { %v497_v25 = vld.sshfl [vmem:[#allocation1] sm:$0xff pattern:$0x73625140] }
  0x30   : > { %430 = vrot.lane.b32.xlu0 %v428_v23, %s866_s30  ;;  %502 = vst [vmem:[#allocation1] ss:$4 sm:$0xff] %v493_v24 }
  0x37   : > { %v503_v27 = vld.sshfl [vmem:[#allocation1] sm:$0xff pattern:$0x73625140] }
  0x38   : > { %553 = vst [vmem:[#allocation1] ss:$4 sm:$0xff] %v494_v26 }
  0x3f   : > { %v950_v30 = vld.sshfl [vmem:[#allocation1] sm:$0xff pattern:$0x73625140] }
  0x40   : > { %603 = vst [vmem:[#allocation1] ss:$4 sm:$0xff] %v599_v29 }
  0x47   : > { %v604_v32 = vld.sshfl [vmem:[#allocation1] sm:$0xff pattern:$0x73625140] }
  0x48   : > { %606 = vrot.lane.b32.xlu0 %v604_v32, %s867_s10  ;;  %609 = vst [vmem:[#allocation1] ss:$4 sm:$0xff] %v600_v31 }
  0x4f   : > { %v610_v46 = vld.sshfl [vmem:[#allocation1] sm:$0xff pattern:$0x73625140] }
  0x50   : > { %499 = vrot.lane.b32.xlu0 %v497_v25, %s868_s11  ;;  %660 = vst [vmem:[#allocation1] ss:$4 sm:$0xff] %v601_v43 }
  0x92   : > { %v381_v5 = vpop.permute.xlu0 %380 }
  0x93   : > { %v386_v6 = vsel %vm302_vm0, %v381_v5, 0 }
  0x94   : > { %395 = vmatpush.bf16.xpose.msra.mxu2 %v386_v6  ;;  %v318_v7 = vpop.f32.mrf.mxu0 }
  0x95   : > { %v322_v8 = vmul.f32 0.35355338, %v318_v7 }
  0x97   : > { %v324_v9 = vsel %vm323_vm1, %v322_v8, -inf }
  0x98   : > { %325 = vmax.xlane.f32.xlu1 %v324_v9 }
  0x9a   : > { %v376_v10 = vpop.permute.xlu0 %375 }
  0x9b   : > { %818 = vmatmul.msk.bf16.vlgmr.msra.gmra.mxu2 %vm302_vm0, %v376_v10 }
  0x9c   : > { %v320_v11 = vpop.f32.mrf.mxu0 }
  0xa2   : > { %v431_v53 = vpop.permute.xlu0 %430 }
  0xa3   : > { %v436_v54 = vsel %vm353_vm2, %v431_v53, 0 }
  0xa4   : > { %445 = vmatpush.bf16.msra.mxu3 %v436_v54 }
  0xa8   : > { %486 = vmatpush.bf16.msrb.mxu3 %v477_v56 }
  0xba   : > { %v607_v58 = vpop.permute.xlu0 %606 }
  0xc2   : > { %v500_v4 = vpop.permute.xlu0 %499 }
 0x10b   : > { %v326_v12 = vpop.xlane.xlu1 %325 }
 0x10c   : > { %v327_v13 = vsub.f32 %v322_v8, %v326_v12 }
 0x10e   : > { %v328_v14 = vmul.f32 1.442695, %v327_v13 }
 0x110   : > { %842 = vpow2.f32 %v328_v14 }
 0x116   : > { %v843_v15 = vpop.eup %842 }
 0x117   : > { %v330_v16 = vsel %vm323_vm1, %v843_v15, 0.0 }
 0x118   : > { %331 = vadd.xlane.f32.xlu1 %v330_v16 }
 0x11e   : > { %v397_v17 = vpop.f32.mrf.mxu2 }
 0x11f   : > { %v401_v18 = vmul.f32 0.35355338, %v397_v17 }
 0x121   : > { %v402_v19 = vsel %vm323_vm1, %v401_v18, -inf }
 0x122   : > { %403 = vmax.xlane.f32.xlu2 %v402_v19 }
 0x126   : > { %v399_v20 = vpop.f32.mrf.mxu2 }
 0x131   : > { %612 = vrot.lane.b32.xlu1 %v610_v46, %s867_s10 }
 0x18b   : > { %v332_v33 = vpop.xlane.xlu1 %331 }
 0x18c   : > { %844 = vrcp.f32 %v332_v33  ;;  %v344_v38 = vand.u32 2147483648, %v332_v33  ;;  %v342_v41 = vand.u32 2147483647, %v332_v33  ;;  %vm338_vm4 = vweird.f32 %v332_v33 }
 0x18e   : > { %v345_v45 = vor.u32 1.1754944e-38, %v344_v38  ;;  %vm343_vm6 = vcmp.eq.f32.partialorder %v342_v41, 8.507059e+37 }
 0x192   : > { %v845_v34 = vpop.eup %844 }
 0x193   : > { %v334_v35 = vmul.f32 %v845_v34, %v332_v33  ;;  %vm339_vm3 = vweird.f32 %v845_v34 }
 0x194   : > { %vm340_vm5 = vmor %vm338_vm4, %vm339_vm3 }
 0x195   : > { %v335_v36 = vsub.f32 1.0, %v334_v35  ;;  %v404_v37 = vpop.xlane.xlu2 %403 }
 0x196   : > { %v405_v39 = vsub.f32 %v401_v18, %v404_v37  ;;  %v661_v37 = vld.sshfl [vmem:[#allocation1] sm:$0xff pattern:$0x73625140] }
 0x197   : > { %v336_v40 = vmul.f32 %v845_v34, %v335_v36 }
 0x198   : > { %v406_v42 = vmul.f32 1.442695, %v405_v39 }
 0x199   : > { %v337_v44 = vadd.f32 %v845_v34, %v336_v40 }
 0x19a   : > { %846 = vpow2.f32 %v406_v42 }
 0x19b   : > { %v341_v47 = vsel %vm340_vm5, %v845_v34, %v337_v44 }
 0x19c   : > { %v346_v48 = vsel %vm343_vm6, %v345_v45, %v341_v47 }
 0x19d   : > { %v347_v49 = vmul.f32 %v843_v15, %v346_v48  ;;  %v452_v15 = vld [vmem:[%s1020_s3 + $0x4] sm:$0xf] }
 0x19e   : > { %v458_v16 = vsel %vm456_vm8, %v452_v15, 0 }
 0x19f   : > { %v348_v50 = vpack.c.bf16 %v347_v49, %v347_v49  ;;  %467 = vmatpush.bf16.msrb.mxu1 %v458_v16 }
 0x1a0   : > { %v847_v51 = vpop.eup %846 }
 0x1a1   : > { %v408_v52 = vsel %vm323_vm1, %v847_v51, 0.0  ;;  %817 = vmatmul.msk.bf16.vlgmr.msra.gmra.mxu1 %vm349_vm7, %v348_v50 }
 0x1a2   : > { %409 = vadd.xlane.f32.xlu2 %v408_v52 }
 0x1a3   : > { %v613_v10 = vpop.permute.xlu1 %612 }
 0x1a4   : > { %v618_v13 = vsel %vm302_vm0, %v613_v10, 0 }
 0x1ba   : > { %505 = vrot.lane.b32.xlu2 %v503_v27, %s868_s11 }
 0x215   : > { %v410_v57 = vpop.xlane.xlu2 %409 }
 0x216   : > { %848 = vrcp.f32 %v410_v57  ;;  %v422_v1 = vand.u32 2147483648, %v410_v57  ;;  %v420_v3 = vand.u32 2147483647, %v410_v57  ;;  %vm416_vm10 = vweird.f32 %v410_v57 }
 0x218   : > { %v423_v6 = vor.u32 1.1754944e-38, %v422_v1  ;;  %vm421_vm12 = vcmp.eq.f32.partialorder %v420_v3, 8.507059e+37 }
 0x21c   : > { %v849_v59 = vpop.eup %848 }
 0x21d   : > { %v412_v60 = vmul.f32 %v849_v59, %v410_v57  ;;  %v506_v61 = vpop.permute.xlu2 %505  ;;  %vm417_vm9 = vweird.f32 %v849_v59 }
 0x21e   : > { %v366_v62 = vpop.f32.mrf.mxu1  ;;  %v511_v63 = vsel %vm302_vm0, %v506_v61, 0  ;;  %vm418_vm11 = vmor %vm416_vm10, %vm417_vm9 }
 0x21f   : > { %v413_v0 = vsub.f32 1.0, %v412_v60  ;;  %520 = vmatpush.bf16.xpose.msrb.mxu0 %v511_v63  ;;  %v370_v14 = vpack.c.bf16 %v366_v62, %v366_v62 }
 0x221   : > { %v414_v2 = vmul.f32 %v849_v59, %v413_v0 }
 0x223   : > { %v415_v5 = vadd.f32 %v849_v59, %v414_v2 }
 0x225   : > { %v419_v7 = vsel %vm418_vm11, %v849_v59, %v415_v5 }
 0x226   : > { %822 = vmatmul.msk.bf16.vlgmr.msrb.gmra.mxu0 %vm302_vm0, %v500_v4  ;;  %v368_v8 = vpop.f32.mrf.mxu1  ;;  %v424_v9 = vsel %vm421_vm12, %v423_v6, %v419_v7 }
 0x227   : > { %v425_v11 = vmul.f32 %v847_v51, %v424_v9  ;;  %v578_v9 = vld [vmem:[%s1020_s3 + $0x8] sm:$0xf] }
 0x228   : > { %v583_v10 = vsel %vm456_vm8, %v578_v9, 0 }
 0x229   : > { %v426_v12 = vpack.c.bf16 %v425_v11, %v425_v11  ;;  %592 = vmatpush.bf16.msra.mxu1 %v583_v10  ;;  %v685_v11 = vld [vmem:[%s1020_s3 + $0xc] sm:$0xf] }
 0x22b   : > { %819 = vmatmul.msk.bf16.vlgmr.msra.gmra.mxu3 %vm349_vm7, %v426_v12  ;;  %v690_v12 = vsel %vm456_vm8, %v685_v11, 0 }
 0x22c   : > { %627 = vmatpush.bf16.xpose.msra.mxu3 %v618_v13 }
 0x23b   : > { %821 = vmatmul.msk.bf16.vlgmr.msrb.gmra.mxu3 %vm302_vm0, %v370_v14 }
 0x24b   : > { %825 = vmatmul.msk.bf16.vlgmr.msra.gmra.mxu3 %vm302_vm0, %v607_v58 }
 0x2a3   : > { %v522_v17 = vpop.f32.mrf.mxu0 }
 0x2a4   : > { %v526_v18 = vmul.f32 0.35355338, %v522_v17 }
 0x2a6   : > { %v527_v19 = vsel %vm323_vm1, %v526_v18, -inf }
 0x2a7   : > { %528 = vmax.xlane.f32.xlu0 %v527_v19 }
 0x2ab   : > { %v524_v20 = vpop.f32.mrf.mxu0 }
 0x2ae   : > { %v447_v21 = vpop.f32.mrf.mxu3 }
 0x2af   : > { %v451_v22 = vpack.c.bf16 %v447_v21, %v447_v21  ;;  %v706_v21 = vld [vmem:[%s293_s24] sm:$0x3] }
 0x2b1   : > { %820 = vmatmul.msk.bf16.vlgmr.msrb.gmra.mxu1 %vm302_vm0, %v451_v22 }
 0x2b6   : > { %v449_v23 = vpop.f32.mrf.mxu3 }
 0x2bb   : > { %556 = vrot.lane.b32.xlu0 %v950_v30, %s868_s11 }
 0x2be   : > { %v979_v24 = vpop.f32.mrf.mxu3 }
 0x2c6   : > { %v490_v25 = vpop.f32.mrf.mxu3 }
 0x2c7   : > { %v707_v25 = vunpack.c.l.bf16 %v706_v21 }
 0x2ce   : > { %v629_v26 = vpop.f32.mrf.mxu3 }
 0x2cf   : > { %v633_v27 = vmul.f32 0.35355338, %v629_v26 }
 0x2d1   : > { %v634_v28 = vsel %vm323_vm1, %v633_v27, -inf }
 0x2d2   : > { %635 = vmax.xlane.f32.xlu2 %v634_v28  ;;  %v841_v28 = vld [vmem:[%s1021_s4] ss:$0 sm:$0xff] }
 0x2d6   : > { %v631_v29 = vpop.f32.mrf.mxu3 }
 0x31a   : > { %v529_v31 = vpop.xlane.xlu0 %528 }
 0x31b   : > { %v530_v32 = vsub.f32 %v526_v18, %v529_v31 }
 0x31d   : > { %v531_v33 = vmul.f32 1.442695, %v530_v32 }
 0x31f   : > { %850 = vpow2.f32 %v531_v33 }
 0x325   : > { %v851_v34 = vpop.eup %850 }
 0x326   : > { %v533_v35 = vsel %vm323_vm1, %v851_v34, 0.0 }
 0x327   : > { %534 = vadd.xlane.f32.xlu1 %v533_v35 }
 0x32d   : > { %v557_v43 = vpop.permute.xlu0 %556 }
 0x32e   : > { %v983_v36 = vpop.f32.mrf.mxu1  ;;  %v562_v44 = vsel %vm353_vm2, %v557_v43, 0 }
 0x32f   : > { %571 = vmatpush.bf16.msrb.mxu2 %v562_v44  ;;  %v489_v22 = vadd.f32 %v979_v24, %v983_v36 }
 0x333   : > { %699 = vmatpush.bf16.msra.mxu2 %v690_v12 }
 0x336   : > { %v471_v30 = vpop.f32.mrf.mxu1 }
 0x340   : > { %663 = vrot.lane.b32.xlu1 %v661_v37, %s867_s10 }
 0x345   : > { %v636_v38 = vpop.xlane.xlu2 %635 }
 0x346   : > { %v637_v39 = vsub.f32 %v633_v27, %v636_v38 }
 0x348   : > { %v638_v40 = vmul.f32 1.442695, %v637_v39 }
 0x34a   : > { %852 = vpow2.f32 %v638_v40 }
 0x350   : > { %v853_v41 = vpop.eup %852 }
 0x351   : > { %v640_v42 = vsel %vm323_vm1, %v853_v41, 0.0 }
 0x352   : > { %641 = vadd.xlane.f32.xlu2 %v640_v42 }
 0x39a   : > { %v535_v45 = vpop.xlane.xlu1 %534 }
 0x39b   : > { %854 = vrcp.f32 %v535_v45  ;;  %v547_v49 = vand.u32 2147483648, %v535_v45  ;;  %v545_v51 = vand.u32 2147483647, %v535_v45  ;;  %vm541_vm14 = vweird.f32 %v535_v45 }
 0x39d   : > { %v548_v53 = vor.u32 1.1754944e-38, %v547_v49  ;;  %vm546_vm3 = vcmp.eq.f32.partialorder %v545_v51, 8.507059e+37 }
 0x3a1   : > { %v855_v46 = vpop.eup %854 }
 0x3a2   : > { %v537_v47 = vmul.f32 %v855_v46, %v535_v45  ;;  %vm542_vm13 = vweird.f32 %v855_v46 }
 0x3a3   : > { %vm543_vm15 = vmor %vm541_vm14, %vm542_vm13 }
 0x3a4   : > { %v538_v48 = vsub.f32 1.0, %v537_v47 }
 0x3a6   : > { %v539_v50 = vmul.f32 %v855_v46, %v538_v48 }
 0x3a8   : > { %v540_v52 = vadd.f32 %v855_v46, %v539_v50 }
 0x3aa   : > { %v544_v54 = vsel %vm543_vm15, %v855_v46, %v540_v52 }
 0x3ab   : > { %v549_v55 = vsel %vm546_vm3, %v548_v53, %v544_v54 }
 0x3ac   : > { %v550_v56 = vmul.f32 %v851_v34, %v549_v55 }
 0x3ae   : > { %v551_v57 = vpack.c.bf16 %v550_v56, %v550_v56 }
 0x3b0   : > { %823 = vmatmul.msk.bf16.vlgmr.msrb.gmra.mxu2 %vm349_vm7, %v551_v57 }
 0x3b2   : > { %v664_v58 = vpop.permute.xlu1 %663 }
 0x3b3   : > { %v669_v59 = vsel %vm353_vm2, %v664_v58, 0 }
 0x3b4   : > { %678 = vmatpush.bf16.msra.mxu0 %v669_v59 }
 0x3c5   : > { %v642_v60 = vpop.xlane.xlu2 %641 }
 0x3c6   : > { %856 = vrcp.f32 %v642_v60  ;;  %v654_v0 = vand.u32 2147483648, %v642_v60  ;;  %v652_v2 = vand.u32 2147483647, %v642_v60  ;;  %vm648_vm4 = vweird.f32 %v642_v60 }
 0x3c8   : > { %v655_v4 = vor.u32 1.1754944e-38, %v654_v0  ;;  %vm653_vm6 = vcmp.eq.f32.partialorder %v652_v2, 8.507059e+37 }
 0x3cc   : > { %v857_v61 = vpop.eup %856 }
 0x3cd   : > { %v644_v62 = vmul.f32 %v857_v61, %v642_v60  ;;  %vm649_vm1 = vweird.f32 %v857_v61 }
 0x3ce   : > { %vm650_vm5 = vmor %vm648_vm4, %vm649_vm1 }
 0x3cf   : > { %v645_v63 = vsub.f32 1.0, %v644_v62 }
 0x3d1   : > { %v646_v1 = vmul.f32 %v857_v61, %v645_v63 }
 0x3d3   : > { %v647_v3 = vadd.f32 %v857_v61, %v646_v1 }
 0x3d5   : > { %v651_v5 = vsel %vm650_vm5, %v857_v61, %v647_v3 }
 0x3d6   : > { %v656_v6 = vsel %vm653_vm6, %v655_v4, %v651_v5 }
 0x3d7   : > { %v657_v7 = vmul.f32 %v853_v41, %v656_v6 }
 0x3d9   : > { %v658_v8 = vpack.c.bf16 %v657_v7, %v657_v7 }
 0x3db   : > { %826 = vmatmul.msk.bf16.vlgmr.msra.gmra.mxu0 %vm349_vm7, %v658_v8 }
 0x433   : > { %v573_v13 = vpop.f32.mrf.mxu2 }
 0x434   : > { %v577_v14 = vpack.c.bf16 %v573_v13, %v573_v13 }
 0x436   : > { %824 = vmatmul.msk.bf16.vlgmr.msra.gmra.mxu1 %vm302_vm0, %v577_v14 }
 0x43b   : > { %v575_v15 = vpop.f32.mrf.mxu2 }
 0x458   : > { %v680_v16 = vpop.f32.mrf.mxu0 }
 0x459   : > { %v684_v17 = vpack.c.bf16 %v680_v16, %v680_v16 }
 0x45b   : > { %827 = vmatmul.msk.bf16.vlgmr.msra.gmra.mxu2 %vm302_vm0, %v684_v17  ;;  %vm715_vm0 = vcmask 254976  }
 0x460   : > { %v682_v18 = vpop.f32.mrf.mxu0 }
 0x4b3   : > { %v594_v19 = vpop.f32.mrf.mxu1 }
 0x4b4   : > { %v598_v23 = vadd.f32 %v594_v19, %v489_v22 }
 0x4bb   : > { %v596_v20 = vpop.f32.mrf.mxu1 }
 0x4de   : > { %v701_v26 = vpop.f32.mrf.mxu2 }
 0x4df   : > { %v705_v27 = vadd.f32 %v701_v26, %v598_v23 }
 0x4e1   : > { %v708_v29 = vadd.f32 %v707_v25, %v705_v27 }
 0x4e3   : > { %v713_v31 = vadd.f32 %v841_v28, %v708_v29 }
 0x4e5   : > { %v714_v32 = vpack.c.bf16 %v713_v31, %v713_v31 }
 0x4e6   : > { %v703_v33 = vpop.f32.mrf.mxu2 }
 0x4e7   : > { %716 = vst.msk [vmem:[%s297_s29] sm:$0x3] %vm715_vm0, %v714_v32 }
 0x4e8 PF: > { %s16_s21 = sadd.s32 1, %s864_s21  }
 0x4e9   : > { %p13_p4 = scmp.ge.s32.totalorder %s16_s21, 4  }
 0x4eb   :  { %15 = sbr.rel (!%p13_p4) target bundleno = 1 (0x1), region = 83 }

// kernel: paligemma_forward.22
= control target key start
LH: loop header
LB: loop body
LE: loop exit
PB: predicated region body
PF: predicated region fallthrough
CT: control target
= control target key end

     0   :  { %vm27_vm0 = vcmask 261120   ;;  %v134_v3 = vmov 32.0   ;;  %vm68_vm5 = vcmask 257024   ;;  %s189_s0 = inlined_call_operand.vmem [shape: bf16[8,32], index: 0, kind: input, shape index: {}]   ;;  %s190_s1 = inlined_call_operand.vmem [shape: f32[1,32], index: 1, kind: input, shape index: {}]   ;;  %s191_s2 = inlined_call_operand.vmem [shape: f32[1,32], index: 2, kind: input, shape index: {}]   ;;  %s192_s4 = inlined_call_operand.vmem [shape: f32[1,32], index: 4, kind: input, shape index: {}]   ;;  %s193_s3 = inlined_call_operand.vmem [shape: bf16[32,32], index: 3, kind: input, shape index: {}]   ;;  %s194_s5 = inlined_call_operand.vmem [shape: bf16[8,32], index: 5, kind: output, shape index: {}]  }
   0x1   :  { %v25_v0 = vld [vmem:[%s189_s0] sm:$0xf]  ;;  %130 = vrcp.f32 %v134_v3  ;;  %v125_v15 = vld [vmem:[%s193_s3 + $0x8] sm:$0xff] }
   0x2   :  { %v26_v1 = vunpack.c.l.bf16 %v25_v0  ;;  %101 = vmatpush.bf16.msra.mxu0 %v125_v15  ;;  %v124_v17 = vld [vmem:[%s193_s3] sm:$0xff] }
   0x3   :  { %v127_v26 = vld [vmem:[%s190_s1] ss:$0 sm:$0xff] }
   0x4   :  { %v28_v2 = vsel %vm27_vm0, %v26_v1, 0.0  ;;  %v128_v28 = vld [vmem:[%s191_s2] ss:$0 sm:$0xff] }
   0x5   :  { %29 = vadd.xlane.f32.xlu0 %v28_v2  ;;  %v129_v34 = vld [vmem:[%s192_s4] ss:$0 sm:$0xff] }
   0x6   :  { %102 = vmatpush.bf16.msra.mxu0 %v124_v17 }
   0x7   :  { %v131_v4 = vpop.eup %130 }
   0x8   :  { %v32_v5 = vmul.f32 32.0, %v131_v4  ;;  %vm36_vm1 = vweird.f32 %v131_v4 }
   0xa   :  { %v33_v6 = vsub.f32 1.0, %v32_v5 }
   0xc   :  { %v34_v7 = vmul.f32 %v131_v4, %v33_v6 }
   0xe   :  { %v35_v8 = vadd.f32 %v131_v4, %v34_v7 }
  0x10   :  { %v37_v9 = vsel %vm36_vm1, %v131_v4, %v35_v8 }
  0x78   :  { %v30_v10 = vpop.xlane.xlu0 %29 }
  0x79   :  { %v38_v11 = vmul.f32 %v37_v9, %v30_v10 }
  0x7b   :  { %v39_v12 = vsub.f32 %v26_v1, %v38_v11 }
  0x7d   :  { %v40_v13 = vmul.f32 %v39_v12, %v39_v12 }
  0x7f   :  { %v41_v14 = vsel %vm27_vm0, %v40_v13, 0.0 }
  0x80   :  { %42 = vadd.xlane.f32.xlu0 %v41_v14 }
  0xf3   :  { %v43_v16 = vpop.xlane.xlu0 %42 }
  0xf4   :  { %v44_v18 = vmul.f32 %v43_v16, %v37_v9 }
  0xf6   :  { %v45_v19 = vadd.f32 1e-06, %v44_v18 }
  0xf8   :  { %132 = vrsqrt.f32 %v45_v19  ;;  %vm52_vm3 = vweird.f32 %v45_v19 }
  0xfe   :  { %v133_v20 = vpop.eup %132 }
  0xff   :  { %v47_v21 = vmul.f32 %v133_v20, %v45_v19  ;;  %vm53_vm2 = vweird.f32 %v133_v20 }
 0x100   :  { %vm54_vm4 = vmor %vm52_vm3, %vm53_vm2 }
 0x101   :  { %v48_v22 = vmul.f32 %v133_v20, %v47_v21 }
 0x103   :  { %v49_v23 = vmul.f32 0.5, %v48_v22 }
 0x105   :  { %v50_v24 = vsub.f32 1.5, %v49_v23 }
 0x107   :  { %v51_v25 = vmul.f32 %v133_v20, %v50_v24 }
 0x109   :  { %v55_v27 = vsel %vm54_vm4, %v133_v20, %v51_v25 }
 0x10a   :  { %v56_v29 = vmul.f32 %v55_v27, %v39_v12 }
 0x10c   :  { %v61_v30 = vmul.f32 %v127_v26, %v56_v29 }
 0x10e   :  { %v66_v31 = vadd.f32 %v128_v28, %v61_v30 }
 0x110   :  { %v67_v32 = vpack.c.bf16 %v66_v31, %v66_v31 }
 0x112   :  { %69 = vst.msk [vmem:[#allocation2] sm:$0xf] %vm68_vm5, %v67_v32 }
 0x119   :  { %v70_v33 = vld [vmem:[#allocation2] sm:$0xf] }
 0x11a   :  { %123 = vmatmul.msk.bf16.vlgmr.msra.gmra.mxu0 %vm27_vm0, %v70_v33 }
 0x197   :  { %v104_v35 = vpop.f32.mrf.mxu0 }
 0x198   :  { %v105_v36 = vadd.f32 %v129_v34, %v104_v35 }
 0x19a   :  { %v108_v37 = vpack.c.bf16 %v105_v36, %v105_v36 }
 0x19c   :  { %110 = vst.msk [vmem:[%s194_s5] sm:$0xf] %vm68_vm5, %v108_v37 }
 0x19f   :  { %v106_v38 = vpop.f32.mrf.mxu0 }

// kernel: paligemma_forward.23
= control target key start
LH: loop header
LB: loop body
LE: loop exit
PB: predicated region body
PF: predicated region fallthrough
CT: control target
= control target key end

     0   :  { %vm25_vm0 = vcmask 261120   ;;  %v154_v7 = vmov 32.0   ;;  %vm74_vm5 = vcmask 257024   ;;  %vm120_vm9 = vcmask 519168   ;;  %s196_s0 = inlined_call_operand.vmem [shape: bf16[16,32], index: 0, kind: input, shape index: {}]   ;;  %s197_s2 = inlined_call_operand.vmem [shape: bf16[32,64], index: 2, kind: input, shape index: {}]   ;;  %s198_s1 = inlined_call_operand.vmem [shape: f32[1,32], index: 1, kind: input, shape index: {}]   ;;  %s199_s3 = inlined_call_operand.vmem [shape: bf16[16,64], index: 3, kind: output, shape index: {}]  }
   0x1   :  { %v144_v0 = vld [vmem:[%s196_s0] sm:$0xff]   ;;  %148 = vrcp.f32 %v154_v7  ;;  %v142_v17 = vld [vmem:[%s197_s2 + $0x8] sm:$0xff] }
   0x2   :  { %v145_v1 = vunpack.c.l.bf16 %v144_v0  ;;  %v146_v3 = vunpack.c.h.bf16 %v144_v0  ;;  %110 = vmatpush.bf16.msra.mxu0 %v142_v17  ;;  %v141_v18 = vld [vmem:[%s197_s2] sm:$0xff] }
   0x3   :  { %v65_v24 = vld [vmem:[%s198_s1] sm:$0x1] }
   0x4   :  { %v23_v2 = vmul.f32 %v145_v1, %v145_v1  ;;  %v24_v5 = vmul.f32 %v146_v3, %v146_v3  ;;  %v66_v27 = vadd.f32 1.0, %v65_v24 }
   0x6   :  { %v26_v4 = vsel %vm25_vm0, %v23_v2, 0.0  ;;  %v29_v6 = vsel %vm25_vm0, %v24_v5, 0.0  ;;  %111 = vmatpush.bf16.msra.mxu0 %v141_v18  ;;  %v68_v32 = vperm.slane %v66_v27, 0 }
   0x7   :  { %27 = vadd.xlane.f32.xlu0 %v26_v4  ;;  %v149_v8 = vpop.eup %148 }
   0x8   :  { %v33_v9 = vmul.f32 32.0, %v149_v8  ;;  %vm37_vm1 = vweird.f32 %v149_v8 }
   0xa   :  { %v34_v10 = vsub.f32 1.0, %v33_v9 }
   0xc   :  { %v35_v11 = vmul.f32 %v149_v8, %v34_v10 }
   0xe   :  { %v36_v12 = vadd.f32 %v149_v8, %v35_v11 }
   0xf   :  { %30 = vadd.xlane.f32.xlu0 %v29_v6 }
  0x10   :  { %v38_v13 = vsel %vm37_vm1, %v149_v8, %v36_v12 }
  0x7a   :  { %v28_v14 = vpop.xlane.xlu0 %27 }
  0x7b   :  { %v39_v15 = vmul.f32 %v38_v13, %v28_v14 }
  0x7d   :  { %v41_v16 = vadd.f32 1e-06, %v39_v15 }
  0x7f   :  { %150 = vrsqrt.f32 %v41_v16  ;;  %vm49_vm3 = vweird.f32 %v41_v16 }
  0x82   :  { %v31_v19 = vpop.xlane.xlu0 %30 }
  0x83   :  { %v40_v20 = vmul.f32 %v38_v13, %v31_v19 }
  0x85   :  { %v151_v21 = vpop.eup %150  ;;  %v42_v22 = vadd.f32 1e-06, %v40_v20 }
  0x86   :  { %v44_v23 = vmul.f32 %v151_v21, %v41_v16  ;;  %vm50_vm2 = vweird.f32 %v151_v21 }
  0x87   :  { %152 = vrsqrt.f32 %v42_v22  ;;  %vm51_vm4 = vmor %vm49_vm3, %vm50_vm2  ;;  %vm59_vm7 = vweird.f32 %v42_v22 }
  0x88   :  { %v45_v25 = vmul.f32 %v151_v21, %v44_v23 }
  0x8a   :  { %v46_v26 = vmul.f32 0.5, %v45_v25 }
  0x8c   :  { %v47_v28 = vsub.f32 1.5, %v46_v26 }
  0x8d   :  { %v153_v29 = vpop.eup %152 }
  0x8e   :  { %v48_v30 = vmul.f32 %v151_v21, %v47_v28  ;;  %v54_v31 = vmul.f32 %v153_v29, %v42_v22  ;;  %vm60_vm6 = vweird.f32 %v153_v29 }
  0x8f   :  { %vm61_vm8 = vmor %vm59_vm7, %vm60_vm6 }
  0x90   :  { %v52_v33 = vsel %vm51_vm4, %v151_v21, %v48_v30  ;;  %v55_v34 = vmul.f32 %v153_v29, %v54_v31 }
  0x91   :  { %v63_v35 = vmul.f32 %v145_v1, %v52_v33 }
  0x92   :  { %v56_v36 = vmul.f32 0.5, %v55_v34 }
  0x93   :  { %v70_v37 = vmul.f32 %v68_v32, %v63_v35 }
  0x94   :  { %v57_v38 = vsub.f32 1.5, %v56_v36 }
  0x95   :  { %v72_v39 = vpack.c.bf16 %v70_v37, %v70_v37 }
  0x96   :  { %v58_v40 = vmul.f32 %v153_v29, %v57_v38 }
  0x97   :  { %75 = vst.msk [vmem:[#allocation2] sm:$0xf] %vm74_vm5, %v72_v39 }
  0x98   :  { %v62_v41 = vsel %vm61_vm8, %v153_v29, %v58_v40 }
  0x99   :  { %v64_v42 = vmul.f32 %v146_v3, %v62_v41 }
  0x9b   :  { %v71_v43 = vmul.f32 %v68_v32, %v64_v42 }
  0x9d   :  { %v73_v44 = vpack.c.bf16 %v71_v43, %v71_v43 }
  0x9f   :  { %76 = vst.msk [vmem:[#allocation2 + $0x4] sm:$0xf] %vm74_vm5, %v73_v44 }
  0xa6   :  { %v140_v45 = vld [vmem:[#allocation2] sm:$0xff] }
  0xa7   :  { %139 = vmatmul.msk.bf16.vlgmr.msra.gmra.mxu0 %vm25_vm0, %v140_v45 }
 0x124   :  { %v113_v46 = vpop.f32.mrf.mxu0 }
 0x125   :  { %v118_v47 = vpack.c.bf16 %v113_v46, %v113_v46 }
 0x127   :  { %121 = vst.msk [vmem:[%s199_s3] sm:$0xf] %vm120_vm9, %v118_v47 }
 0x12c   :  { %v115_v48 = vpop.f32.mrf.mxu0 }
 0x12d   :  { %v119_v49 = vpack.c.bf16 %v115_v48, %v115_v48 }
 0x12f   :  { %122 = vst.msk [vmem:[%s199_s3 + $0x4] sm:$0xf] %vm120_vm9, %v119_v49 }

// kernel: paligemma_forward.29
= control target key start
LH: loop header
LB: loop body
LE: loop exit
PB: predicated region body
PF: predicated region fallthrough
CT: control target
= control target key end

     0   :  { %s237_s0 = inlined_call_operand.vmem [shape: bf16[16,32], index: 0, kind: input, shape index: {}]   ;;  %s238_s1 = inlined_call_operand.vmem [shape: f32[1,32], index: 1, kind: input, shape index: {}]   ;;  %s239_s2 = inlined_call_operand.vmem [shape: bf16[32,128], index: 2, kind: input, shape index: {}]   ;;  %s240_s3 = inlined_call_operand.hbm [shape: f32[16,128], index: 3, kind: output, shape index: {}]  }
   0x1   :  { %v156_v0 = vld [vmem:[%s237_s0] sm:$0xff]  }
   0x2   :  { %v157_v1 = vunpack.c.l.bf16 %v156_v0 }
   0x3   :  { %8 = vsyncpa [#allocation4], 0  ;;  %vm26_vm0 = vcmask 261120   ;;  %v158_v3 = vunpack.c.h.bf16 %v156_v0  ;;  %v195_v7 = vmov 32.0   ;;  %v154_v17 = vld [vmem:[%s239_s2 + $0x8] sm:$0xff]  ;;  %v153_v18 = vld [vmem:[%s239_s2] sm:$0xff] }
   0x4   :  { %v24_v2 = vmul.f32 %v157_v1, %v157_v1  ;;  %163 = vrcp.f32 %v195_v7  ;;  %111 = vmatpush.bf16.msra.mxu0 %v154_v17  ;;  %v66_v24 = vld [vmem:[%s238_s1] sm:$0x1]  ;;  %vm75_vm5 = vcmask 257024   ;;  %s196_s1 = smov [#allocation3]   ;;  %s127_s21 = sshll.u32 %s240_s3, 4  ;;  %s128_s21 = int_to_ptr.hbm [resolvable:$true] %s127_s21 }
   0x5   :  { %v25_v5 = vmul.f32 %v158_v3, %v158_v3  ;;  %v67_v27 = vadd.f32 1.0, %v66_v24  ;;  %s125_s2 = sshll.u32 %s196_s1, 4  ;;  %s197_s22 = smov 128   ;;  %s126_s2 = int_to_ptr.vmem [resolvable:$true] %s125_s2 }
   0x6   :  { %v27_v4 = vsel %vm26_vm0, %v24_v2, 0.0  ;;  %s198_s23 = smov 8  }
   0x7   :  { %28 = vadd.xlane.f32.xlu0 %v27_v4  ;;  %v30_v6 = vsel %vm26_vm0, %v25_v5, 0.0  ;;  %v69_v32 = vperm.slane %v67_v27, 0 }
   0x8   :  { %112 = vmatpush.bf16.msra.mxu0 %v153_v18 }
   0xa   :  { %v164_v8 = vpop.eup %163 }
   0xb   :  { %v34_v9 = vmul.f32 32.0, %v164_v8  ;;  %vm38_vm1 = vweird.f32 %v164_v8 }
   0xd   :  { %v35_v10 = vsub.f32 1.0, %v34_v9 }
   0xf   :  { %31 = vadd.xlane.f32.xlu0 %v30_v6  ;;  %v36_v11 = vmul.f32 %v164_v8, %v35_v10 }
  0x11   :  { %v37_v12 = vadd.f32 %v164_v8, %v36_v11 }
  0x13   :  { %v39_v13 = vsel %vm38_vm1, %v164_v8, %v37_v12 }
  0x7a   :  { %v29_v14 = vpop.xlane.xlu0 %28 }
  0x7b   :  { %v40_v15 = vmul.f32 %v39_v13, %v29_v14 }
  0x7d   :  { %v42_v16 = vadd.f32 1e-06, %v40_v15 }
  0x7f   :  { %165 = vrsqrt.f32 %v42_v16  ;;  %vm50_vm3 = vweird.f32 %v42_v16 }
  0x82   :  { %v32_v19 = vpop.xlane.xlu0 %31 }
  0x83   :  { %v41_v20 = vmul.f32 %v39_v13, %v32_v19 }
  0x85   :  { %v166_v21 = vpop.eup %165  ;;  %v43_v22 = vadd.f32 1e-06, %v41_v20 }
  0x86   :  { %v45_v23 = vmul.f32 %v166_v21, %v42_v16  ;;  %vm51_vm2 = vweird.f32 %v166_v21 }
  0x87   :  { %167 = vrsqrt.f32 %v43_v22  ;;  %vm52_vm4 = vmor %vm50_vm3, %vm51_vm2  ;;  %vm60_vm7 = vweird.f32 %v43_v22 }
  0x88   :  { %v46_v25 = vmul.f32 %v166_v21, %v45_v23 }
  0x8a   :  { %v47_v26 = vmul.f32 0.5, %v46_v25 }
  0x8c   :  { %v48_v28 = vsub.f32 1.5, %v47_v26 }
  0x8d   :  { %v168_v29 = vpop.eup %167 }
  0x8e   :  { %v49_v30 = vmul.f32 %v166_v21, %v48_v28  ;;  %v55_v31 = vmul.f32 %v168_v29, %v43_v22  ;;  %vm61_vm6 = vweird.f32 %v168_v29 }
  0x8f   :  { %vm62_vm8 = vmor %vm60_vm7, %vm61_vm6 }
  0x90   :  { %v53_v33 = vsel %vm52_vm4, %v166_v21, %v49_v30  ;;  %v56_v34 = vmul.f32 %v168_v29, %v55_v31 }
  0x91   :  { %v64_v35 = vmul.f32 %v157_v1, %v53_v33 }
  0x92   :  { %v57_v36 = vmul.f32 0.5, %v56_v34 }
  0x93   :  { %v71_v37 = vmul.f32 %v69_v32, %v64_v35 }
  0x94   :  { %v58_v38 = vsub.f32 1.5, %v57_v36 }
  0x95   :  { %v73_v39 = vpack.c.bf16 %v71_v37, %v71_v37 }
  0x96   :  { %v59_v40 = vmul.f32 %v168_v29, %v58_v38 }
  0x97   :  { %76 = vst.msk [vmem:[#allocation2] sm:$0xf] %vm75_vm5, %v73_v39 }
  0x98   :  { %v63_v41 = vsel %vm62_vm8, %v168_v29, %v59_v40 }
  0x99   :  { %v65_v42 = vmul.f32 %v158_v3, %v63_v41 }
  0x9b   :  { %v72_v43 = vmul.f32 %v69_v32, %v65_v42 }
  0x9d   :  { %v74_v44 = vpack.c.bf16 %v72_v43, %v72_v43 }
  0x9f   :  { %77 = vst.msk [vmem:[#allocation2 + $0x4] sm:$0xf] %vm75_vm5, %v74_v44 }
  0xa6   :  { %v152_v45 = vld [vmem:[#allocation2] sm:$0xff] }
  0xa7   :  { %151 = vmatmul.msk.bf16.vlgmr.msra.gmra.mxu0 %vm26_vm0, %v152_v45 }
 0x124   :  { %v114_v46 = vpop.f32.mrf.mxu0 }
 0x125   :  { %119 = vst [vmem:[#allocation3] sm:$0xff] %v114_v46 }
 0x12c   :  { %v116_v47 = vpop.f32.mrf.mxu0 }
 0x12d   :  { %120 = vst [vmem:[#allocation3 + $0x8] sm:$0xff] %v116_v47 }
 0x12e   :  { %133 = dma.vmem_to_hbm [thread:$0]  %s126_s2, 256, %s128_s21, [#allocation4], %s197_s22, %s197_s22, %s198_s23  }
 0x12f   :  { %193 = dma.done.wait [#allocation4], 256  }
 0x130   :  { %194 = vsyncadd [#allocation4], 4294967040 }
 0x131   :  { %138 = vsyncpa [#allocation4], 1 }

// kernel: paligemma_forward.24
= control target key start
LH: loop header
LB: loop body
LE: loop exit
PB: predicated region body
PF: predicated region fallthrough
CT: control target
= control target key end

     0   :  { %s813_s18 = smov 0   ;;  %s903_s0 = inlined_call_operand.vmem [shape: bf16[2,8,32], index: 0, kind: input, shape index: {}]   ;;  %s904_s1 = inlined_call_operand.vmem [shape: bf16[2,8,16], index: 1, kind: input, shape index: {}]   ;;  %s905_s2 = inlined_call_operand.vmem [shape: bf16[2,8,16], index: 2, kind: input, shape index: {}]   ;;  %s906_s3 = inlined_call_operand.vmem [shape: bf16[32,32], index: 3, kind: input, shape index: {}]   ;;  %s907_s4 = inlined_call_operand.vmem [shape: bf16[2,8,32], index: 4, kind: input, shape index: {}]   ;;  %s908_s5 = inlined_call_operand.vmem [shape: bf16[2,8,32], index: 5, kind: output, shape index: {}]  }
   0x1 LB: > { %s721_s19 = sadd.s32 4294967295, %s778_s18   ;;  %p725_p0 = scmp.ge.s32.totalorder %s778_s18, 1  ;;  %s778_s18 = sphi %s813_s18, %s15_s18  }
   0x2   : > { %p213_p1 = scmp.lt.s32.totalorder %s778_s18, 3 }
   0x4   : > { %p214_p2 = pnand %p725_p0, %p213_p1 }
   0x5   : > { %p251_p3 = scmp.lt.s32.totalorder (!%p214_p2), %s721_s19, 1  ;;  %s780_s27 = smov (!%p214_p2), 120  }
   0x6   : > { %217 = sbr.rel (%p214_p2) target bundleno = 1256 (0x4e8), region = 40  ;;  %s781_s28 = smov (!%p214_p2), 104  }
   0x7   : > { %s782_s7 = smov (!%p214_p2), 112  }
   0xb   : > { %s910_s19 = smov (!%p251_p3, %s721_s19), 1  ;;  %vm275_vm0 = vcmask 64512   ;;  %vm324_vm1 = vcmask 1043456   ;;  %v342_v41 = vld [vmem:[%s906_s3] sm:$0xf] }
   0xc   : > { %s821_s20 = sshll.u32 %s910_s19, 2  ;;  %v431_v42 = vsel %vm324_vm1, %v342_v41, 0  ;;  %v407_v63 = vld [vmem:[%s906_s3 + $0x4] sm:$0xf] }
   0xd   : > { %s258_s23 = scalar_lea.vmem %s904_s1, %s821_s20  ;;  %s254_s26 = scalar_lea.vmem %s903_s0, %s821_s20 }
   0xe   : > { %v831_v0 = vld [vmem:[%s258_s23] sm:$0xf]  ;;  %s262_s6 = scalar_lea.vmem %s905_s2, %s821_s20  ;;  %s266_s19 = scalar_lea.vmem %s907_s4, %s821_s20 }
   0xf   : > { %v272_v1 = vld [vmem:[%s254_s26] sm:$0xf]  ;;  %v280_v2 = vsel %vm275_vm0, %v831_v0, 0  ;;  %v449_v39 = vunpack.c.l.b16 %v831_v0  ;;  %v412_v0 = vsel %vm324_vm1, %v407_v63, 0  ;;  %s270_s23 = scalar_lea.vmem %s908_s5, %s821_s20 }
  0x10   : > { %v344_v3 = vunpack.c.l.b16 %v272_v1  ;;  %289 = vmatpush.bf16.xpose.msra.mxu0 %v280_v2  ;;  %358 = vmatpush.bf16.xpose.msra.mxu2 %v280_v2  ;;  %v845_v19 = vld [vmem:[%s262_s6] sm:$0xf] }
  0x11   : > { %v326_v20 = vsel %vm324_vm1, %v845_v19, 0  ;;  %v450_v40 = vpack.c.b16 %v449_v39, %v449_v39 }
  0x12   : > { %v345_v4 = vpack.c.b16 %v344_v3, %v344_v3  ;;  %335 = vmatpush.bf16.msra.mxu1 %v326_v20  ;;  %400 = vmatpush.bf16.msra.mxu3 %v326_v20 }
  0x14   : > { %346 = vrot.lane.b32.xlu0 %v345_v4, %s780_s27 }
  0x16   : > { %440 = vmatpush.bf16.msrb.mxu3 %v431_v42  ;;  %421 = vmatpush.bf16.msrb.mxu1 %v412_v0 }
  0x17   : > { %731 = vmatmul.msk.bf16.vlgmr.msra.gmra.mxu0 %vm275_vm0, %v272_v1 }
  0x86   : > { %v347_v5 = vpop.permute.xlu0 %346 }
  0x87   : > { %733 = vmatmul.msk.bf16.vlgmr.msra.gmra.mxu2 %vm275_vm0, %v347_v5 }
  0x94   : > { %v291_v6 = vpop.f32.mrf.mxu0 }
  0x95   : > { %v295_v7 = vmul.f32 0.35355338, %v291_v6 }
  0x97   : > { %v296_v8 = vsel %vm275_vm0, %v295_v7, -inf }
  0x98   : > { %297 = vmax.xlane.f32.xlu0 %v296_v8 }
  0x9c   : > { %v293_v9 = vpop.f32.mrf.mxu0 }
 0x10a   : > { %v360_v10 = vpop.f32.mrf.mxu2 }
 0x10b   : > { %v298_v11 = vpop.xlane.xlu0 %297  ;;  %v364_v17 = vmul.f32 0.35355338, %v360_v10 }
 0x10c   : > { %v299_v12 = vsub.f32 %v295_v7, %v298_v11 }
 0x10d   : > { %v365_v18 = vsel %vm275_vm0, %v364_v17, -inf }
 0x10e   : > { %v300_v13 = vmul.f32 1.442695, %v299_v12 }
 0x110   : > { %756 = vpow2.f32 %v300_v13 }
 0x112   : > { %v362_v14 = vpop.f32.mrf.mxu2 }
 0x116   : > { %v757_v15 = vpop.eup %756 }
 0x117   : > { %v302_v16 = vsel %vm275_vm0, %v757_v15, 0.0 }
 0x118   : > { %303 = vadd.xlane.f32.xlu1 %v302_v16 }
 0x120   : > { %366 = vmax.xlane.f32.xlu1 %v365_v18 }
 0x139   : > { %544 = vrot.lane.b32.xlu1 %v345_v4, %s781_s28 }
 0x18b   : > { %v304_v21 = vpop.xlane.xlu1 %303 }
 0x18c   : > { %758 = vrcp.f32 %v304_v21  ;;  %v316_v27 = vand.u32 2147483648, %v304_v21  ;;  %v314_v30 = vand.u32 2147483647, %v304_v21  ;;  %vm310_vm3 = vweird.f32 %v304_v21 }
 0x18e   : > { %v317_v32 = vor.u32 1.1754944e-38, %v316_v27  ;;  %vm315_vm5 = vcmp.eq.f32.partialorder %v314_v30, 8.507059e+37  ;;  %v499_v27 = vunpack.c.l.b16 %v845_v19 }
 0x192   : > { %v759_v22 = vpop.eup %758 }
 0x193   : > { %v306_v23 = vmul.f32 %v759_v22, %v304_v21  ;;  %v367_v24 = vpop.xlane.xlu1 %366  ;;  %vm311_vm2 = vweird.f32 %v759_v22 }
 0x194   : > { %v368_v25 = vsub.f32 %v364_v17, %v367_v24  ;;  %vm312_vm4 = vmor %vm310_vm3, %vm311_vm2 }
 0x195   : > { %v307_v26 = vsub.f32 1.0, %v306_v23 }
 0x196   : > { %v369_v28 = vmul.f32 1.442695, %v368_v25 }
 0x197   : > { %v308_v29 = vmul.f32 %v759_v22, %v307_v26 }
 0x198   : > { %760 = vpow2.f32 %v369_v28  ;;  %v500_v28 = vpack.c.b16 %v499_v27, %v499_v27 }
 0x199   : > { %v309_v31 = vadd.f32 %v759_v22, %v308_v29 }
 0x19b   : > { %v313_v33 = vsel %vm312_vm4, %v759_v22, %v309_v31 }
 0x19c   : > { %v318_v34 = vsel %vm315_vm5, %v317_v32, %v313_v33 }
 0x19d   : > { %v319_v35 = vmul.f32 %v757_v15, %v318_v34 }
 0x19e   : > { %v761_v36 = vpop.eup %760 }
 0x19f   : > { %v371_v37 = vsel %vm275_vm0, %v761_v36, 0.0  ;;  %v320_v38 = vpack.c.bf16 %v319_v35, %v319_v35 }
 0x1a0   : > { %372 = vadd.xlane.f32.xlu2 %v371_v37 }
 0x1a1   : > { %732 = vmatmul.msk.bf16.vlgmr.msra.gmra.mxu1 %vm275_vm0, %v320_v38 }
 0x1ab   : > { %v545_v62 = vpop.permute.xlu1 %544 }
 0x1b8   : > { %451 = vrot.lane.b32.xlu2 %v450_v40, %s780_s27 }
 0x1c0   : > { %446 = vrot.lane.b32.xlu2 %v345_v4, %s782_s7 }
 0x213   : > { %v373_v43 = vpop.xlane.xlu2 %372 }
 0x214   : > { %762 = vrcp.f32 %v373_v43  ;;  %v385_v49 = vand.u32 2147483648, %v373_v43  ;;  %v383_v52 = vand.u32 2147483647, %v373_v43  ;;  %vm379_vm7 = vweird.f32 %v373_v43 }
 0x216   : > { %v386_v54 = vor.u32 1.1754944e-38, %v385_v49  ;;  %vm384_vm9 = vcmp.eq.f32.partialorder %v383_v52, 8.507059e+37 }
 0x21a   : > { %v763_v44 = vpop.eup %762 }
 0x21b   : > { %v375_v45 = vmul.f32 %v763_v44, %v373_v43  ;;  %v452_v46 = vpop.permute.xlu2 %451  ;;  %vm380_vm6 = vweird.f32 %v763_v44 }
 0x21c   : > { %v457_v47 = vsel %vm275_vm0, %v452_v46, 0  ;;  %vm381_vm8 = vmor %vm379_vm7, %vm380_vm6 }
 0x21d   : > { %v376_v48 = vsub.f32 1.0, %v375_v45  ;;  %466 = vmatpush.bf16.xpose.msrb.mxu0 %v457_v47 }
 0x21e   : > { %v337_v50 = vpop.f32.mrf.mxu1 }
 0x21f   : > { %v377_v51 = vmul.f32 %v763_v44, %v376_v48  ;;  %v341_v61 = vpack.c.bf16 %v337_v50, %v337_v50 }
 0x221   : > { %v378_v53 = vadd.f32 %v763_v44, %v377_v51 }
 0x223   : > { %v447_v55 = vpop.permute.xlu2 %446  ;;  %v382_v56 = vsel %vm381_vm8, %v763_v44, %v378_v53 }
 0x224   : > { %737 = vmatmul.msk.bf16.vlgmr.msrb.gmra.mxu0 %vm275_vm0, %v447_v55  ;;  %v387_v57 = vsel %vm384_vm9, %v386_v54, %v382_v56  ;;  %v605_v56 = vld [vmem:[%s906_s3 + $0xc] sm:$0xf] }
 0x225   : > { %v388_v58 = vmul.f32 %v761_v36, %v387_v57  ;;  %v610_v57 = vsel %vm324_vm1, %v605_v56, 0 }
 0x226   : > { %v339_v59 = vpop.f32.mrf.mxu1 }
 0x227   : > { %v389_v60 = vpack.c.bf16 %v388_v58, %v388_v58  ;;  %v523_v58 = vld [vmem:[%s906_s3 + $0x8] sm:$0xf] }
 0x228   : > { %v528_v59 = vsel %vm324_vm1, %v523_v58, 0 }
 0x229   : > { %734 = vmatmul.msk.bf16.vlgmr.msra.gmra.mxu3 %vm275_vm0, %v389_v60  ;;  %537 = vmatpush.bf16.msra.mxu1 %v528_v59 }
 0x22a   : > { %556 = vmatpush.bf16.xpose.msra.mxu3 %v457_v47 }
 0x239   : > { %736 = vmatmul.msk.bf16.vlgmr.msrb.gmra.mxu3 %vm275_vm0, %v341_v61 }
 0x249   : > { %740 = vmatmul.msk.bf16.vlgmr.msra.gmra.mxu3 %vm275_vm0, %v545_v62 }
 0x2a1   : > { %v468_v1 = vpop.f32.mrf.mxu0 }
 0x2a2   : > { %v472_v2 = vmul.f32 0.35355338, %v468_v1 }
 0x2a4   : > { %v473_v3 = vsel %vm275_vm0, %v472_v2, -inf }
 0x2a5   : > { %474 = vmax.xlane.f32.xlu2 %v473_v3 }
 0x2a9   : > { %v470_v4 = vpop.f32.mrf.mxu0 }
 0x2ac   : > { %v402_v5 = vpop.f32.mrf.mxu3 }
 0x2ad   : > { %v406_v6 = vpack.c.bf16 %v402_v5, %v402_v5 }
 0x2af   : > { %735 = vmatmul.msk.bf16.vlgmr.msrb.gmra.mxu1 %vm275_vm0, %v406_v6 }
 0x2b4   : > { %v404_v7 = vpop.f32.mrf.mxu3 }
 0x2bc   : > { %v868_v8 = vpop.f32.mrf.mxu3 }
 0x2c4   : > { %v444_v9 = vpop.f32.mrf.mxu3 }
 0x2cc   : > { %v558_v10 = vpop.f32.mrf.mxu3 }
 0x2cd   : > { %v562_v11 = vmul.f32 0.35355338, %v558_v10 }
 0x2cf   : > { %v563_v12 = vsel %vm275_vm0, %v562_v11, -inf }
 0x2d0   : > { %564 = vmax.xlane.f32.xlu1 %v563_v12 }
 0x2d4   : > { %v560_v13 = vpop.f32.mrf.mxu3 }
 0x318   : > { %v475_v14 = vpop.xlane.xlu2 %474 }
 0x319   : > { %v476_v15 = vsub.f32 %v472_v2, %v475_v14  ;;  %v626_v2 = vld [vmem:[%s266_s19] sm:$0xf] }
 0x31a   : > { %v627_v7 = vunpack.c.l.bf16 %v626_v2 }
 0x31b   : > { %v477_v16 = vmul.f32 1.442695, %v476_v15 }
 0x31d   : > { %764 = vpow2.f32 %v477_v16 }
 0x323   : > { %v765_v17 = vpop.eup %764 }
 0x324   : > { %v479_v18 = vsel %vm275_vm0, %v765_v17, 0.0 }
 0x325   : > { %480 = vadd.xlane.f32.xlu0 %v479_v18 }
 0x32c   : > { %v872_v20 = vpop.f32.mrf.mxu1 }
 0x32d   : > { %v443_v3 = vadd.f32 %v868_v8, %v872_v20 }
 0x334   : > { %v425_v21 = vpop.f32.mrf.mxu1 }
 0x343   : > { %v565_v22 = vpop.xlane.xlu1 %564 }
 0x344   : > { %v566_v23 = vsub.f32 %v562_v11, %v565_v22 }
 0x346   : > { %v567_v24 = vmul.f32 1.442695, %v566_v23 }
 0x348   : > { %766 = vpow2.f32 %v567_v24 }
 0x34e   : > { %v767_v25 = vpop.eup %766 }
 0x34f   : > { %v569_v26 = vsel %vm275_vm0, %v767_v25, 0.0 }
 0x350   : > { %570 = vadd.xlane.f32.xlu0 %v569_v26 }
 0x364   : > { %501 = vrot.lane.b32.xlu0 %v500_v28, %s780_s27 }
 0x398   : > { %v481_v29 = vpop.xlane.xlu0 %480 }
 0x399   : > { %768 = vrcp.f32 %v481_v29  ;;  %v493_v38 = vand.u32 2147483648, %v481_v29  ;;  %vm487_vm11 = vweird.f32 %v481_v29  ;;  %v491_v39 = vand.u32 2147483647, %v481_v29 }
 0x39b   : > { %v494_v44 = vor.u32 1.1754944e-38, %v493_v38  ;;  %vm492_vm14 = vcmp.eq.f32.partialorder %v491_v39, 8.507059e+37 }
 0x39f   : > { %v769_v30 = vpop.eup %768 }
 0x3a0   : > { %v483_v31 = vmul.f32 %v769_v30, %v481_v29  ;;  %vm488_vm10 = vweird.f32 %v769_v30 }
 0x3a1   : > { %vm489_vm12 = vmor %vm487_vm11, %vm488_vm10 }
 0x3a2   : > { %v484_v32 = vsub.f32 1.0, %v483_v31 }
 0x3a4   : > { %v485_v34 = vmul.f32 %v769_v30, %v484_v32 }
 0x3a6   : > { %v486_v36 = vadd.f32 %v769_v30, %v485_v34 }
 0x3a8   : > { %v490_v43 = vsel %vm489_vm12, %v769_v30, %v486_v36 }
 0x3a9   : > { %v495_v47 = vsel %vm492_vm14, %v494_v44, %v490_v43 }
 0x3aa   : > { %v496_v51 = vmul.f32 %v765_v17, %v495_v47 }
 0x3ac   : > { %v497_v54 = vpack.c.bf16 %v496_v51, %v496_v51 }
 0x3c3   : > { %v571_v33 = vpop.xlane.xlu0 %570 }
 0x3c4   : > { %770 = vrcp.f32 %v571_v33  ;;  %v583_v19 = vand.u32 2147483648, %v571_v33  ;;  %v581_v42 = vand.u32 2147483647, %v571_v33  ;;  %vm577_vm15 = vweird.f32 %v571_v33 }
 0x3c6   : > { %v584_v46 = vor.u32 1.1754944e-38, %v583_v19  ;;  %vm582_vm3 = vcmp.eq.f32.partialorder %v581_v42, 8.507059e+37 }
 0x3ca   : > { %v771_v35 = vpop.eup %770 }
 0x3cb   : > { %v573_v37 = vmul.f32 %v771_v35, %v571_v33  ;;  %vm578_vm13 = vweird.f32 %v771_v35 }
 0x3cc   : > { %vm579_vm2 = vmor %vm577_vm15, %vm578_vm13 }
 0x3cd   : > { %v574_v40 = vsub.f32 1.0, %v573_v37 }
 0x3cf   : > { %v575_v41 = vmul.f32 %v771_v35, %v574_v40 }
 0x3d1   : > { %v576_v45 = vadd.f32 %v771_v35, %v575_v41 }
 0x3d3   : > { %v580_v48 = vsel %vm579_vm2, %v771_v35, %v576_v45 }
 0x3d4   : > { %v585_v49 = vsel %vm582_vm3, %v584_v46, %v580_v48 }
 0x3d5   : > { %v586_v50 = vmul.f32 %v767_v25, %v585_v49 }
 0x3d6   : > { %v502_v52 = vpop.permute.xlu0 %501 }
 0x3d7   : > { %v507_v53 = vsel %vm324_vm1, %v502_v52, 0  ;;  %v587_v55 = vpack.c.bf16 %v586_v50, %v586_v50 }
 0x3d8   : > { %516 = vmatpush.bf16.msrb.mxu2 %v507_v53  ;;  %598 = vmatpush.bf16.msra.mxu0 %v507_v53 }
 0x3db   : > { %738 = vmatmul.msk.bf16.vlgmr.msrb.gmra.mxu2 %vm275_vm0, %v497_v54  ;;  %741 = vmatmul.msk.bf16.vlgmr.msra.gmra.mxu0 %vm275_vm0, %v587_v55 }
 0x3dc   : > { %619 = vmatpush.bf16.msra.mxu2 %v610_v57 }
 0x458   : > { %v600_v60 = vpop.f32.mrf.mxu0 }
 0x459   : > { %v604_v61 = vpack.c.bf16 %v600_v60, %v600_v60 }
 0x45b   : > { %742 = vmatmul.msk.bf16.vlgmr.msra.gmra.mxu2 %vm275_vm0, %v604_v61 }
 0x45e   : > { %v518_v62 = vpop.f32.mrf.mxu2 }
 0x45f   : > { %v522_v63 = vpack.c.bf16 %v518_v62, %v518_v62 }
 0x460   : > { %v602_v0 = vpop.f32.mrf.mxu0 }
 0x461   : > { %739 = vmatmul.msk.bf16.vlgmr.msra.gmra.mxu1 %vm275_vm0, %v522_v63  ;;  %vm630_vm0 = vcmask 257024  }
 0x466   : > { %v520_v1 = vpop.f32.mrf.mxu2 }
 0x4de   : > { %v539_v4 = vpop.f32.mrf.mxu1  ;;  %v621_v5 = vpop.f32.mrf.mxu2 }
 0x4df   : > { %v543_v6 = vadd.f32 %v539_v4, %v443_v3 }
 0x4e1   : > { %v625_v9 = vadd.f32 %v621_v5, %v543_v6 }
 0x4e3   : > { %v628_v10 = vadd.f32 %v627_v7, %v625_v9 }
 0x4e5   : > { %v629_v11 = vpack.c.bf16 %v628_v10, %v628_v10 }
 0x4e6   : > { %v541_v12 = vpop.f32.mrf.mxu1  ;;  %v623_v13 = vpop.f32.mrf.mxu2 }
 0x4e7   : > { %631 = vst.msk [vmem:[%s270_s23] sm:$0xf] %vm630_vm0, %v629_v11 }
 0x4e8 PF: > { %s15_s18 = sadd.s32 1, %s778_s18  }
 0x4e9   : > { %p12_p4 = scmp.ge.s32.totalorder %s15_s18, 4  }
 0x4eb   :  { %14 = sbr.rel (!%p12_p4) target bundleno = 1 (0x1), region = 79 }

// kernel: paligemma_forward.25
= control target key start
LH: loop header
LB: loop body
LE: loop exit
PB: predicated region body
PF: predicated region fallthrough
CT: control target
= control target key end

     0   :  { %vm31_vm0 = vcmask 261120   ;;  %v321_v7 = vmov 32.0   ;;  %vm80_vm5 = vcmask 257024   ;;  %v322_v56 = vmov 0.0   ;;  %s413_s0 = inlined_call_operand.vmem [shape: bf16[16,32], index: 0, kind: input, shape index: {}]   ;;  %s414_s2 = inlined_call_operand.vmem [shape: bf16[32,64], index: 2, kind: input, shape index: {}]   ;;  %s415_s3 = inlined_call_operand.vmem [shape: bf16[32,64], index: 3, kind: input, shape index: {}]   ;;  %s416_s1 = inlined_call_operand.vmem [shape: f32[1,32], index: 1, kind: input, shape index: {}]   ;;  %s417_s4 = inlined_call_operand.vmem [shape: bf16[64,32], index: 4, kind: input, shape index: {}]   ;;  %s418_s5 = inlined_call_operand.vmem [shape: bf16[16,32], index: 5, kind: output, shape index: {}]  }
   0x1   :  { %v302_v0 = vld [vmem:[%s413_s0] sm:$0xff]   ;;  %311 = vrcp.f32 %v321_v7  ;;  %v294_v17 = vld [vmem:[%s414_s2 + $0x8] sm:$0xff]  ;;  %v300_v48 = vld [vmem:[%s417_s4 + $0x18] sm:$0xff]  ;;  %83 = vst.msk [vmem:[#allocation3] sm:$0xff] %vm31_vm0, %v322_v56  ;;  %vm211_vm9 = vcmask 523264  }
   0x2   :  { %v356_v1 = vunpack.c.l.bf16 %v302_v0  ;;  %v360_v3 = vunpack.c.h.bf16 %v302_v0  ;;  %v296_v18 = vld [vmem:[%s415_s3 + $0x8] sm:$0xff]  ;;  %118 = vmatpush.bf16.msra.mxu0 %v294_v17  ;;  %v293_v19 = vld [vmem:[%s414_s2] sm:$0xff]  ;;  %219 = vmatpush.bf16.msra.mxu2 %v300_v48  ;;  %v299_v49 = vld [vmem:[%s417_s4 + $0x10] sm:$0xff]  ;;  %84 = vst.msk [vmem:[#allocation3 + $0x8] sm:$0xff] %vm31_vm0, %v322_v56 }
   0x3   :  { %148 = vmatpush.bf16.msra.mxu1 %v296_v18  ;;  %v295_v20 = vld [vmem:[%s415_s3] sm:$0xff]  ;;  %v298_v50 = vld [vmem:[%s417_s4 + $0x8] sm:$0xff] }
   0x4   :  { %v29_v2 = vmul.f32 %v356_v1, %v356_v1  ;;  %v30_v5 = vmul.f32 %v360_v3, %v360_v3  ;;  %v71_v26 = vld [vmem:[%s416_s1] sm:$0x1] }
   0x5   :  { %v72_v29 = vadd.f32 1.0, %v71_v26  ;;  %v297_v51 = vld [vmem:[%s417_s4] sm:$0xff] }
   0x6   :  { %v32_v4 = vsel %vm31_vm0, %v29_v2, 0.0  ;;  %v35_v6 = vsel %vm31_vm0, %v30_v5, 0.0  ;;  %119 = vmatpush.bf16.msra.mxu0 %v293_v19  ;;  %220 = vmatpush.bf16.msra.mxu2 %v299_v49 }
   0x7   :  { %33 = vadd.xlane.f32.xlu0 %v32_v4  ;;  %v312_v8 = vpop.eup %311  ;;  %149 = vmatpush.bf16.msra.mxu1 %v295_v20  ;;  %v74_v34 = vperm.slane %v72_v29, 0 }
   0x8   :  { %v39_v9 = vmul.f32 32.0, %v312_v8  ;;  %vm43_vm1 = vweird.f32 %v312_v8 }
   0x9   :  { %v178_v19 = vld [vmem:[#allocation3 + $0x8] sm:$0xff] }
   0xa   :  { %v40_v10 = vsub.f32 1.0, %v39_v9  ;;  %221 = vmatpush.bf16.msra.mxu2 %v298_v50 }
   0xc   :  { %v41_v11 = vmul.f32 %v312_v8, %v40_v10 }
   0xe   :  { %v42_v12 = vadd.f32 %v312_v8, %v41_v11  ;;  %222 = vmatpush.bf16.msra.mxu2 %v297_v51 }
   0xf   :  { %36 = vadd.xlane.f32.xlu0 %v35_v6 }
  0x10   :  { %v44_v13 = vsel %vm43_vm1, %v312_v8, %v42_v12 }
  0x7a   :  { %v34_v14 = vpop.xlane.xlu0 %33 }
  0x7b   :  { %v45_v15 = vmul.f32 %v44_v13, %v34_v14 }
  0x7d   :  { %v47_v16 = vadd.f32 1e-06, %v45_v15 }
  0x7f   :  { %313 = vrsqrt.f32 %v47_v16  ;;  %vm55_vm3 = vweird.f32 %v47_v16 }
  0x82   :  { %v37_v21 = vpop.xlane.xlu0 %36 }
  0x83   :  { %v46_v22 = vmul.f32 %v44_v13, %v37_v21 }
  0x85   :  { %v314_v23 = vpop.eup %313  ;;  %v48_v24 = vadd.f32 1e-06, %v46_v22 }
  0x86   :  { %v50_v25 = vmul.f32 %v314_v23, %v47_v16  ;;  %vm56_vm2 = vweird.f32 %v314_v23  ;;  %v177_v16 = vld [vmem:[#allocation3] sm:$0xff] }
  0x87   :  { %315 = vrsqrt.f32 %v48_v24  ;;  %vm57_vm4 = vmor %vm55_vm3, %vm56_vm2  ;;  %vm65_vm7 = vweird.f32 %v48_v24 }
  0x88   :  { %v51_v27 = vmul.f32 %v314_v23, %v50_v25 }
  0x8a   :  { %v52_v28 = vmul.f32 0.5, %v51_v27 }
  0x8c   :  { %v53_v30 = vsub.f32 1.5, %v52_v28 }
  0x8d   :  { %v316_v31 = vpop.eup %315 }
  0x8e   :  { %v54_v32 = vmul.f32 %v314_v23, %v53_v30  ;;  %v60_v33 = vmul.f32 %v316_v31, %v48_v24  ;;  %vm66_vm6 = vweird.f32 %v316_v31 }
  0x8f   :  { %vm67_vm8 = vmor %vm65_vm7, %vm66_vm6 }
  0x90   :  { %v58_v35 = vsel %vm57_vm4, %v314_v23, %v54_v32  ;;  %v61_v36 = vmul.f32 %v316_v31, %v60_v33 }
  0x91   :  { %v69_v37 = vmul.f32 %v356_v1, %v58_v35 }
  0x92   :  { %v62_v38 = vmul.f32 0.5, %v61_v36 }
  0x93   :  { %v76_v39 = vmul.f32 %v74_v34, %v69_v37 }
  0x94   :  { %v63_v40 = vsub.f32 1.5, %v62_v38 }
  0x95   :  { %v78_v41 = vpack.c.bf16 %v76_v39, %v76_v39 }
  0x96   :  { %v64_v42 = vmul.f32 %v316_v31, %v63_v40 }
  0x97   :  { %81 = vst.msk [vmem:[#allocation2] sm:$0xf] %vm80_vm5, %v78_v41 }
  0x98   :  { %v68_v43 = vsel %vm67_vm8, %v316_v31, %v64_v42 }
  0x99   :  { %v70_v44 = vmul.f32 %v360_v3, %v68_v43 }
  0x9b   :  { %v77_v45 = vmul.f32 %v74_v34, %v70_v44 }
  0x9d   :  { %v79_v46 = vpack.c.bf16 %v77_v45, %v77_v45 }
  0x9f   :  { %82 = vst.msk [vmem:[#allocation2 + $0x4] sm:$0xf] %vm80_vm5, %v79_v46 }
  0xa6   :  { %v292_v47 = vld [vmem:[#allocation2] sm:$0xff] }
  0xa7   :  { %265 = vmatmul.msk.bf16.vlgmr.msra.gmra.mxu0 %vm31_vm0, %v292_v47  ;;  %274 = vmatmul.msk.bf16.vlgmr.msra.gmra.mxu1 %vm31_vm0, %v292_v47 }
 0x124   :  { %v121_v52 = vpop.f32.mrf.mxu0  ;;  %v151_v5 = vpop.f32.mrf.mxu1 }
 0x125   :  { %v156_v53 = vmul.f32 %v121_v52, %v121_v52 }
 0x127   :  { %v158_v54 = vmul.f32 %v156_v53, %v121_v52 }
 0x129   :  { %v160_v55 = vmul.f32 0.044715, %v158_v54 }
 0x12b   :  { %v162_v57 = vadd.f32 %v160_v55, %v121_v52 }
 0x12c   :  { %v123_v58 = vpop.f32.mrf.mxu0  ;;  %v153_v12 = vpop.f32.mrf.mxu1 }
 0x12d   :  { %v164_v59 = vmul.f32 0.7978846, %v162_v57  ;;  %v157_v60 = vmul.f32 %v123_v58, %v123_v58 }
 0x12f   :  { %317 = vtanh.f32 %v164_v59  ;;  %v159_v61 = vmul.f32 %v157_v60, %v123_v58 }
 0x131   :  { %v161_v62 = vmul.f32 0.044715, %v159_v61 }
 0x133   :  { %v163_v63 = vadd.f32 %v161_v62, %v123_v58 }
 0x135   :  { %v318_v0 = vpop.eup %317  ;;  %v165_v2 = vmul.f32 0.7978846, %v163_v63 }
 0x136   :  { %v168_v4 = vadd.f32 1.0, %v318_v0 }
 0x137   :  { %319 = vtanh.f32 %v165_v2 }
 0x138   :  { %v170_v6 = vmul.f32 0.5, %v168_v4 }
 0x13a   :  { %v172_v9 = vmul.f32 %v170_v6, %v121_v52 }
 0x13c   :  { %v174_v13 = vmul.f32 %v172_v9, %v151_v5 }
 0x13d   :  { %v320_v7 = vpop.eup %319 }
 0x13e   :  { %v169_v8 = vadd.f32 1.0, %v320_v7 }
 0x140   :  { %v171_v10 = vmul.f32 0.5, %v169_v8 }
 0x142   :  { %v173_v11 = vmul.f32 %v171_v10, %v123_v58 }
 0x144   :  { %v175_v14 = vmul.f32 %v173_v11, %v153_v12 }
 0x146   :  { %v176_v15 = vpack.c.bf16 %v175_v14, %v174_v13 }
 0x148   :  { %291 = vmatmul.msk.bf16.vlgmr.msra.gmra.mxu2 %vm211_vm9, %v176_v15 }
 0x1cb   :  { %v224_v17 = vpop.f32.mrf.mxu2 }
 0x1cc   :  { %v229_v18 = vadd.f32 %v224_v17, %v177_v16 }
 0x1ce   :  { %231 = vst.msk [vmem:[#allocation3] sm:$0xff] %vm31_vm0, %v229_v18 }
 0x1d3   :  { %v226_v20 = vpop.f32.mrf.mxu2 }
 0x1d4   :  { %v230_v21 = vadd.f32 %v226_v20, %v178_v19 }
 0x1d5   :  { %v240_v22 = vld [vmem:[#allocation3] sm:$0xff] }
 0x1d6   :  { %v242_v23 = vadd.f32 %v356_v1, %v240_v22  ;;  %232 = vst.msk [vmem:[#allocation3 + $0x8] sm:$0xff] %vm31_vm0, %v230_v21 }
 0x1d8   :  { %v244_v24 = vpack.c.bf16 %v242_v23, %v242_v23 }
 0x1da   :  { %247 = vst.msk [vmem:[%s418_s5] sm:$0xf] %vm80_vm5, %v244_v24 }
 0x1dd   :  { %v241_v25 = vld [vmem:[#allocation3 + $0x8] sm:$0xff] }
 0x1de   :  { %v243_v26 = vadd.f32 %v360_v3, %v241_v25 }
 0x1e0   :  { %v245_v27 = vpack.c.bf16 %v243_v26, %v243_v26 }
 0x1e2   :  { %248 = vst.msk [vmem:[%s418_s5 + $0x4] sm:$0xf] %vm80_vm5, %v245_v27 }

</bundles_post_ra>
